<compile_context>
chip_gen: v7x
topology: tpu7x:2x2x1
jax: 0.10.0
libtpu: 0.0.40
codegen_flags: <defaults>
</compile_context>

<pallas_src>
import jax
import jax.numpy as jnp
from jax import lax
from jax.experimental import pallas as pl
from jax.experimental.pallas import tpu as pltpu


def _round_up(x, m):
    return ((x + m - 1) // m) * m


TIME_CHUNK = 8          # timesteps per grid step (amortizes grid overhead)


# ------------------------------- kernel -----------------------------------

def contextgru_seq_kernel(x_ref, h0_ref, w_ref, b_ref, wo_ref, bo_ref,
                          out_ref, z_ref):
    """One grid step == TIME_CHUNK GRU timesteps for one batch block."""
    Tc, TB, Dp = x_ref.shape
    Hp = h0_ref.shape[1]
    Op = wo_ref.shape[1]

    # (Re)initialize the carried hidden state at the start of each sequence
    # (time-chunk 0 of every batch block).  The carry lives inside z_ref.
    @pl.when(pl.program_id(1) == 0)
    def _():
        z_ref[:, Dp:] = h0_ref[...]

    def step(t, carry):
        # Stage x_t next to the carried hidden state: z = [x_t | h].
        # Pure 128-aligned slice stores -- no per-step concatenate.
        z_ref[:, :Dp] = x_ref[t]
        h = z_ref[:, Dp:]                                  # f32 carry
        zb = z_ref[...].astype(jnp.bfloat16)               # MXU operand

        # Fused gate matmul, shared-column layout:
        #   columns = [ r_sum | i_sum | i_n | h_n ]  (each Hp lanes, 128-aligned)
        gates = jnp.dot(zb, w_ref[...],
                        preferred_element_type=jnp.float32) + b_ref[...]

        resetgate = jax.nn.sigmoid(gates[:, 0:Hp])
        inputgate = jax.nn.sigmoid(gates[:, Hp:2 * Hp])
        newgate = jnp.tanh(gates[:, 2 * Hp:3 * Hp]
                           + resetgate * gates[:, 3 * Hp:4 * Hp])
        h_new = newgate + inputgate * (h - newgate)

        # y = (cr * h_new) @ Wo + bo, with cr folded into Wo on the host.
        y = jnp.dot(h_new.astype(jnp.bfloat16), wo_ref[...],
                    preferred_element_type=jnp.float32) + bo_ref[...]

        # Carry the hidden state to the next timestep (stays f32 inside z).
        z_ref[:, Dp:] = h_new

        # Direct 128-aligned slice stores into the lane-dense output slab:
        #   [ y | h | resetgate | inputgate | newgate ]
        out_ref[t, :, 0:Op] = y
        out_ref[t, :, Op:Op + Hp] = h_new
        out_ref[t, :, Op + Hp:Op + 2 * Hp] = resetgate
        out_ref[t, :, Op + 2 * Hp:Op + 3 * Hp] = inputgate
        out_ref[t, :, Op + 3 * Hp:Op + 4 * Hp] = newgate
        return carry

    lax.fori_loop(0, Tc, step, 0, unroll=True)


# -------------------------- parameter packing ------------------------------

def pack_kernel_params(p, dim_input, dim_hidden, dim_output, Dp, Hp, Op):
    """Build padded / fused kernel-side parameters (bf16 matmul operands)."""
    H = dim_hidden
    wx, wh, wo = p["wx"], p["wh"], p["wo"]           # (Din,3H), (H,3H), (H,O)
    bx, bh, bo = p["bx"], p["bh"], p["bo"]           # (3H,), (3H,), (O,)
    assert p["context"].shape[0] == H, "cr * h requires dim_context == dim_hidden"

    # Shared-column layout: columns = [ r_sum | i_sum | i_n | h_n ].
    # x rows are zero only in the h_n block; h rows are zero only in the i_n block.
    w = jnp.zeros((Dp + Hp, 4 * Hp), jnp.float32)
    b = jnp.zeros((1, 4 * Hp), jnp.float32)
    # reset gate (shared column block 0)
    w = w.at[:dim_input, 0:H].set(wx[:, 0:H])
    w = w.at[Dp:Dp + H, 0:H].set(wh[:, 0:H])
    b = b.at[0, 0:H].set(bx[0:H] + bh[0:H])
    # input/update gate (shared column block 1)
    w = w.at[:dim_input, Hp:Hp + H].set(wx[:, H:2 * H])
    w = w.at[Dp:Dp + H, Hp:Hp + H].set(wh[:, H:2 * H])
    b = b.at[0, Hp:Hp + H].set(bx[H:2 * H] + bh[H:2 * H])
    # new gate, x part (column block 2)
    w = w.at[:dim_input, 2 * Hp:2 * Hp + H].set(wx[:, 2 * H:3 * H])
    b = b.at[0, 2 * Hp:2 * Hp + H].set(bx[2 * H:3 * H])
    # new gate, h part (column block 3)
    w = w.at[Dp:Dp + H, 3 * Hp:3 * Hp + H].set(wh[:, 2 * H:3 * H])
    b = b.at[0, 3 * Hp:3 * Hp + H].set(bh[2 * H:3 * H])

    # Fold cr = tanh(context) into Wo (mathematically identical, removes a
    # per-step broadcast multiply and one resident input).
    cr = jnp.tanh(p["context"])
    wo_eff = cr[:, None] * wo
    wo_p = jnp.zeros((Hp, Op), jnp.float32).at[:H, :dim_output].set(wo_eff)
    bo_p = jnp.zeros((1, Op), jnp.float32).at[0, :dim_output].set(bo)

    return {"w": w.astype(jnp.bfloat16), "b": b,
            "wo": wo_p.astype(jnp.bfloat16), "bo": bo_p}


def _vmem_limit_bytes(Tc, TB, Dp, Hp, Op, slab_w):
    w_b = (Dp + Hp) * 4 * Hp * 2          # bf16 fused gate weight
    b_b = 4 * Hp * 4
    wo_b = Hp * Op * 2
    bo_b = Op * 4
    h0_b = TB * Hp * 4
    x_b = Tc * TB * Dp * 4
    out_b = Tc * TB * slab_w * 4
    z_b = TB * (Dp + Hp) * 4
    # conservative: assume double-buffering of every pipelined block + headroom
    total = 2 * (w_b + b_b + wo_b + bo_b + h0_b + x_b + out_b) + z_b + (4 << 20)
    return int(min(max(total, 16 << 20), 100 << 20))


# -------------------------------- wrapper ----------------------------------

@jax.jit
def context_gru_forward_seq(x_seq, hidden, params):
    """
    x_seq : (T, B, dim_input)  -- B independent sequences, T timesteps
    hidden: (B, dim_hidden)    -- initial hidden state per sequence
    Returns ([y_seq, h_seq], cache) where
        y_seq (T, B, dim_output), h_seq (T, B, dim_hidden)
        cache = [context, cr, resetgate_seq, inputgate_seq, newgate_seq]
    matching the PyTorch module's per-step forward, stacked over time.
    """
    T, B, dim_input = x_seq.shape
    dim_hidden = hidden.shape[1]
    dim_output = params["bo"].shape[0]

    Dp = _round_up(dim_input, 128)
    Hp = _round_up(dim_hidden, 128)
    Op = _round_up(dim_output, 128)

    # Batch blocking: TB rows per grid step (parallel axis -> megacore on v7x).
    Bp = _round_up(B, 8)
    TB = min(Bp, 128)
    Bp = _round_up(Bp, TB)
    nb = Bp // TB

    # Time chunking: Tc timesteps per grid step (padded steps are harmless:
    # they consume zero inputs and their outputs are sliced off).
    Tc = TIME_CHUNK
    T_pad = _round_up(T, Tc)
    nt = T_pad // Tc

    kp = pack_kernel_params(params, dim_input, dim_hidden, dim_output,
                            Dp, Hp, Op)

    x_pad = jnp.zeros((T_pad, Bp, Dp), jnp.float32).at[:T, :B, :dim_input].set(
        x_seq.astype(jnp.float32))
    h_pad = jnp.zeros((Bp, Hp), jnp.float32).at[:B, :dim_hidden].set(
        hidden.astype(jnp.float32))

    slab_w = Op + 4 * Hp          # [y | h | rg | ig | ng], each 128-aligned

    out = pl.pallas_call(
        contextgru_seq_kernel,
        out_shape=jax.ShapeDtypeStruct((T_pad, Bp, slab_w), jnp.float32),
        grid=(nb, nt),
        in_specs=[
            pl.BlockSpec((Tc, TB, Dp), lambda bi, ti: (ti, bi, 0)),   # x chunk
            pl.BlockSpec((TB, Hp), lambda bi, ti: (bi, 0)),           # h0
            pl.BlockSpec((Dp + Hp, 4 * Hp), lambda bi, ti: (0, 0)),   # fused W (resident)
            pl.BlockSpec((1, 4 * Hp), lambda bi, ti: (0, 0)),         # fused bias
            pl.BlockSpec((Hp, Op), lambda bi, ti: (0, 0)),            # Wo' = cr*Wo
            pl.BlockSpec((1, Op), lambda bi, ti: (0, 0)),             # bo
        ],
        out_specs=pl.BlockSpec((Tc, TB, slab_w), lambda bi, ti: (ti, bi, 0)),
        scratch_shapes=[pltpu.VMEM((TB, Dp + Hp), jnp.float32)],      # z = [x|h] + carry
        compiler_params=pltpu.CompilerParams(
            dimension_semantics=("parallel", "arbitrary"),
            vmem_limit_bytes=_vmem_limit_bytes(Tc, TB, Dp, Hp, Op, slab_w)),
    )(x_pad, h_pad, kp["w"], kp["b"], kp["wo"], kp["bo"])

    y_seq = out[:T, :B, 0:dim_output]
    h_seq = out[:T, :B, Op:Op + dim_hidden]
    rg_seq = out[:T, :B, Op + Hp:Op + Hp + dim_hidden]
    ig_seq = out[:T, :B, Op + 2 * Hp:Op + 2 * Hp + dim_hidden]
    ng_seq = out[:T, :B, Op + 3 * Hp:Op + 3 * Hp + dim_hidden]

    cr = jnp.tanh(params["context"])
    output = [y_seq, h_seq]
    cache = [params["context"], cr, rg_seq, ig_seq, ng_seq]
    return output, cache


# ------------------------- parameter construction ---------------------------

def _orthogonal(key, shape):
    """Deterministic orthogonal init (same spirit as nn.init.orthogonal_)."""
    n_rows, n_cols = shape
    big, small = max(n_rows, n_cols), min(n_rows, n_cols)
    a = jax.random.normal(key, (big, small), dtype=jnp.float32)
    q, r = jnp.linalg.qr(a)
    q = q * jnp.sign(jnp.diag(r))[None, :]
    if n_rows < n_cols:
        q = q.T
    return q[:n_rows, :n_cols]


def init_params(key, dim_input, dim_hidden, dim_output, dim_context):
    k1, k2, k3, k4 = jax.random.split(key, 4)
    # PyTorch Linear weight is (out, in); kernel math wants (in, out) -> transpose.
    wx = _orthogonal(k1, (3 * dim_hidden, dim_input)).T          # (Din, 3H)
    wh = _orthogonal(k2, (3 * dim_hidden, dim_hidden)).T         # (H, 3H)
    wo = _orthogonal(k3, (dim_output, dim_hidden)).T             # (H, O)
    bx = jnp.full((3 * dim_hidden,), 0.1, jnp.float32)
    bh = jnp.full((3 * dim_hidden,), 0.1, jnp.float32)
    bo = jnp.full((dim_output,), 0.1, jnp.float32)
    # context_ = relu(rand(dim_context)) -- uniform[0,1) is already >= 0
    context = jax.nn.relu(
        jax.random.uniform(k4, (dim_context,), dtype=jnp.float32))
    return {"wx": wx, "bx": bx, "wh": wh, "bh": bh,
            "wo": wo, "bo": bo, "context": context}


# ------------------------------ reference -----------------------------------

def reference_forward_seq(x_seq, h0, p):
    """Pure-JAX scan reference matching the PyTorch per-step forward.

    Matmul operands are rounded to bf16 (f32 accumulation), mirroring the
    kernel's precision so the comparison isolates layout/fusion correctness.
    """
    H = h0.shape[1]
    bf = jnp.bfloat16
    wx_b = p["wx"].astype(bf)
    wh_b = p["wh"].astype(bf)
    cr = jnp.tanh(p["context"])
    wo_b = (cr[:, None] * p["wo"]).astype(bf)   # same cr-fold as the kernel

    def step(h, x):
        gate_x = jnp.dot(x.astype(bf), wx_b,
                         preferred_element_type=jnp.float32) + p["bx"]
        gate_h = jnp.dot(h.astype(bf), wh_b,
                         preferred_element_type=jnp.float32) + p["bh"]
        i_r, i_i, i_n = gate_x[:, :H], gate_x[:, H:2 * H], gate_x[:, 2 * H:]
        h_r, h_i, h_n = gate_h[:, :H], gate_h[:, H:2 * H], gate_h[:, 2 * H:]
        rg = jax.nn.sigmoid(i_r + h_r)
        ig = jax.nn.sigmoid(i_i + h_i)
        ng = jnp.tanh(i_n + rg * h_n)
        h_new = ng + ig * (h - ng)
        y = jnp.dot(h_new.astype(bf), wo_b,
                    preferred_element_type=jnp.float32) + p["bo"]
        return h_new, (y, h_new, rg, ig, ng)

    _, (ys, hs, rgs, igs, ngs) = lax.scan(step, h0, x_seq)
    return ys, hs, rgs, igs, ngs


# TODO(synk): training-side machinery of the PyTorch module (Adam optimizers,
# ReduceLROnPlateau scheduler, update_context inner loop) is host-side training
# code, not part of the forward pass, and is intentionally not translated.

if __name__ == "__main__":
    dim_input, dim_hidden, dim_output, dim_context = 16, 32, 8, 32
    T, B = 8, 8   # 8 timesteps, 8 independent sequences

    key = jax.random.PRNGKey(0)
    kp_, kx, kh = jax.random.split(key, 3)
    params = init_params(kp_, dim_input, dim_hidden, dim_output, dim_context)

    x_seq = jax.random.normal(kx, (T, B, dim_input), dtype=jnp.float32)
    # get_rand_states(): randn(dim_hidden) * 0.1 (per sequence)
    hidden = jax.random.normal(kh, (B, dim_hidden), dtype=jnp.float32) * 0.1

    (y_seq, h_seq), cache = context_gru_forward_seq(x_seq, hidden, params)
    jax.block_until_ready((y_seq, h_seq))

    y_ref, h_ref, rg_ref, ig_ref, ng_ref = reference_forward_seq(
        x_seq, hidden, params)

    _, _, rg_seq, ig_seq, ng_seq = cache
    tol = dict(rtol=2e-3, atol=2e-3)
    assert jnp.allclose(y_seq, y_ref, **tol), "y mismatch"
    assert jnp.allclose(h_seq, h_ref, **tol), "h mismatch"
    assert jnp.allclose(rg_seq, rg_ref, **tol), "resetgate mismatch"
    assert jnp.allclose(ig_seq, ig_ref, **tol), "inputgate mismatch"
    assert jnp.allclose(ng_seq, ng_ref, **tol), "newgate mismatch"

    print("KERNEL_OK")
</pallas_src>

<mosaic_0001>
module attributes {stable_mosaic.version = 11 : i64} {
  func.func @contextgru_seq_kernel(%arg0: i32, %arg1: i32, %arg2: memref<8x8x128xf32, #tpu.memory_space<vmem>>, %arg3: memref<8x128xf32, #tpu.memory_space<vmem>>, %arg4: memref<256x512xbf16, #tpu.memory_space<vmem>>, %arg5: memref<1x512xf32, #tpu.memory_space<vmem>>, %arg6: memref<128x128xbf16, #tpu.memory_space<vmem>>, %arg7: memref<1x128xf32, #tpu.memory_space<vmem>>, %arg8: memref<8x8x640xf32, #tpu.memory_space<vmem>>, %arg9: memref<8x256xf32, #tpu.memory_space<vmem>>) attributes {dimension_semantics = [#tpu.dimension_semantics<parallel>, #tpu.dimension_semantics<arbitrary>], iteration_bounds = array<i64: 1, 1>, scalar_prefetch = 0 : i64, scratch_operands = 1 : i64, tpu.core_type = #tpu.core_type<tc>, window_params = [{transform_indices = @transform_0, window_bounds = array<i64: 8, 8, 128>}, {transform_indices = @transform_1, window_bounds = array<i64: 8, 128>}, {pipeline_mode = #tpu.pipeline_mode<synchronous>, transform_indices = @transform_2, window_bounds = array<i64: 256, 512>}, {pipeline_mode = #tpu.pipeline_mode<synchronous>, transform_indices = @transform_3, window_bounds = array<i64: 1, 512>}, {pipeline_mode = #tpu.pipeline_mode<synchronous>, transform_indices = @transform_4, window_bounds = array<i64: 128, 128>}, {pipeline_mode = #tpu.pipeline_mode<synchronous>, transform_indices = @transform_5, window_bounds = array<i64: 1, 128>}, {transform_indices = @transform_6, window_bounds = array<i64: 8, 8, 640>}]} {
    %c0_i32 = arith.constant 0 : i32
    %0 = arith.cmpi eq, %arg1, %c0_i32 : i32
    %1 = arith.extui %0 : i1 to i32
    %c0_i32_0 = arith.constant 0 : i32
    %2 = arith.cmpi ne, %1, %c0_i32_0 : i32
    scf.if %2 {
      %c0_252 = arith.constant 0 : index
      %c0_253 = arith.constant 0 : index
      %475 = vector.load %arg3[%c0_252, %c0_253] : memref<8x128xf32, #tpu.memory_space<vmem>>, vector<8x128xf32>
      %c0_254 = arith.constant 0 : index
      %c128_255 = arith.constant 128 : index
      %476 = vector.load %arg9[%c0_254, %c128_255] : memref<8x256xf32, #tpu.memory_space<vmem>>, vector<8x128xf32>
      tpu.vector_store %arg9[%c0_254, %c128_255], %475 {strides = array<i32>} : memref<8x256xf32, #tpu.memory_space<vmem>>, vector<8x128xf32>,
    } else {
    }
    %c0_i32_1 = arith.constant 0 : i32
    %3 = arith.index_cast %c0_i32_1 : i32 to index
    %c0 = arith.constant 0 : index
    %c0_2 = arith.constant 0 : index
    %4 = vector.load %arg2[%3, %c0, %c0_2] : memref<8x8x128xf32, #tpu.memory_space<vmem>>, vector<1x8x128xf32>
    %5 = vector.shape_cast %4 : vector<1x8x128xf32> to vector<8x128xf32>
    %c0_3 = arith.constant 0 : index
    %c0_4 = arith.constant 0 : index
    %6 = vector.load %arg9[%c0_3, %c0_4] : memref<8x256xf32, #tpu.memory_space<vmem>>, vector<8x128xf32>
    tpu.vector_store %arg9[%c0_3, %c0_4], %5 {strides = array<i32>} : memref<8x256xf32, #tpu.memory_space<vmem>>, vector<8x128xf32>,
    %c0_5 = arith.constant 0 : index
    %c128 = arith.constant 128 : index
    %7 = vector.load %arg9[%c0_5, %c128] : memref<8x256xf32, #tpu.memory_space<vmem>>, vector<8x128xf32>
    %c0_6 = arith.constant 0 : index
    %c0_7 = arith.constant 0 : index
    %8 = vector.load %arg9[%c0_6, %c0_7] : memref<8x256xf32, #tpu.memory_space<vmem>>, vector<8x256xf32>
    %9 = arith.truncf %8 : vector<8x256xf32> to vector<8x256xbf16>
    %c0_8 = arith.constant 0 : index
    %c0_9 = arith.constant 0 : index
    %10 = vector.load %arg4[%c0_8, %c0_9] : memref<256x512xbf16, #tpu.memory_space<vmem>>, vector<256x512xbf16>
    %cst = arith.constant dense<0.000000e+00> : vector<8x512xf32>
    %11 = tpu.matmul %9, %10, %cst {dimension_numbers = #tpu.dot_dimension_numbers<[1], [0], [0], [1], [0, 0, 1, 1], [], []>} : vector<8x256xbf16>, vector<256x512xbf16>, vector<8x512xf32> -> vector<8x512xf32>
    %c0_10 = arith.constant 0 : index
    %c0_11 = arith.constant 0 : index
    %12 = vector.load %arg5[%c0_10, %c0_11] : memref<1x512xf32, #tpu.memory_space<vmem>>, vector<1x512xf32>
    %13 = vector.broadcast %12 : vector<1x512xf32> to vector<8x512xf32>
    %14 = arith.addf %11, %13 : vector<8x512xf32>
    %15 = vector.extract_strided_slice %14 {offsets = [0, 0], sizes = [8, 128], strides = [1, 1]} : vector<8x512xf32> to vector<8x128xf32>
    %16 = arith.negf %15 : vector<8x128xf32>
    %17 = math.exp %16 : vector<8x128xf32>
    %cst_12 = arith.constant 1.000000e+00 : f32
    %18 = vector.broadcast %cst_12 : f32 to vector<8x128xf32>
    %19 = arith.addf %18, %17 : vector<8x128xf32>
    %20 = arith.divf %18, %19 : vector<8x128xf32>
    %21 = vector.extract_strided_slice %14 {offsets = [0, 128], sizes = [8, 128], strides = [1, 1]} : vector<8x512xf32> to vector<8x128xf32>
    %22 = arith.negf %21 : vector<8x128xf32>
    %23 = math.exp %22 : vector<8x128xf32>
    %cst_13 = arith.constant 1.000000e+00 : f32
    %24 = vector.broadcast %cst_13 : f32 to vector<8x128xf32>
    %25 = arith.addf %24, %23 : vector<8x128xf32>
    %26 = arith.divf %24, %25 : vector<8x128xf32>
    %27 = vector.extract_strided_slice %14 {offsets = [0, 256], sizes = [8, 128], strides = [1, 1]} : vector<8x512xf32> to vector<8x128xf32>
    %28 = vector.extract_strided_slice %14 {offsets = [0, 384], sizes = [8, 128], strides = [1, 1]} : vector<8x512xf32> to vector<8x128xf32>
    %29 = arith.mulf %20, %28 : vector<8x128xf32>
    %30 = arith.addf %27, %29 : vector<8x128xf32>
    %31 = math.tanh %30 : vector<8x128xf32>
    %32 = arith.subf %7, %31 : vector<8x128xf32>
    %33 = arith.mulf %26, %32 : vector<8x128xf32>
    %34 = arith.addf %31, %33 : vector<8x128xf32>
    %35 = arith.truncf %34 : vector<8x128xf32> to vector<8x128xbf16>
    %c0_14 = arith.constant 0 : index
    %c0_15 = arith.constant 0 : index
    %36 = vector.load %arg6[%c0_14, %c0_15] : memref<128x128xbf16, #tpu.memory_space<vmem>>, vector<128x128xbf16>
    %cst_16 = arith.constant dense<0.000000e+00> : vector<8x128xf32>
    %37 = tpu.matmul %35, %36, %cst_16 {dimension_numbers = #tpu.dot_dimension_numbers<[1], [0], [0], [1], [0, 0, 1, 1], [], []>} : vector<8x128xbf16>, vector<128x128xbf16>, vector<8x128xf32> -> vector<8x128xf32>
    %c0_17 = arith.constant 0 : index
    %c0_18 = arith.constant 0 : index
    %38 = vector.load %arg7[%c0_17, %c0_18] : memref<1x128xf32, #tpu.memory_space<vmem>>, vector<1x128xf32>
    %39 = vector.broadcast %38 : vector<1x128xf32> to vector<8x128xf32>
    %40 = arith.addf %37, %39 : vector<8x128xf32>
    %c0_19 = arith.constant 0 : index
    %c128_20 = arith.constant 128 : index
    %41 = vector.load %arg9[%c0_19, %c128_20] : memref<8x256xf32, #tpu.memory_space<vmem>>, vector<8x128xf32>
    tpu.vector_store %arg9[%c0_19, %c128_20], %34 {strides = array<i32>} : memref<8x256xf32, #tpu.memory_space<vmem>>, vector<8x128xf32>,
    %42 = arith.index_cast %c0_i32_1 : i32 to index
    %c0_21 = arith.constant 0 : index
    %c0_22 = arith.constant 0 : index
    %43 = vector.load %arg8[%42, %c0_21, %c0_22] : memref<8x8x640xf32, #tpu.memory_space<vmem>>, vector<1x8x128xf32>
    %44 = vector.shape_cast %43 : vector<1x8x128xf32> to vector<8x128xf32>
    %45 = vector.shape_cast %40 : vector<8x128xf32> to vector<1x8x128xf32>
    tpu.vector_store %arg8[%42, %c0_21, %c0_22], %45 {strides = array<i32>} : memref<8x8x640xf32, #tpu.memory_space<vmem>>, vector<1x8x128xf32>,
    %46 = arith.index_cast %c0_i32_1 : i32 to index
    %c0_23 = arith.constant 0 : index
    %c128_24 = arith.constant 128 : index
    %47 = vector.load %arg8[%46, %c0_23, %c128_24] : memref<8x8x640xf32, #tpu.memory_space<vmem>>, vector<1x8x128xf32>
    %48 = vector.shape_cast %47 : vector<1x8x128xf32> to vector<8x128xf32>
    %49 = vector.shape_cast %34 : vector<8x128xf32> to vector<1x8x128xf32>
    tpu.vector_store %arg8[%46, %c0_23, %c128_24], %49 {strides = array<i32>} : memref<8x8x640xf32, #tpu.memory_space<vmem>>, vector<1x8x128xf32>,
    %50 = arith.index_cast %c0_i32_1 : i32 to index
    %c0_25 = arith.constant 0 : index
    %c256 = arith.constant 256 : index
    %51 = vector.load %arg8[%50, %c0_25, %c256] : memref<8x8x640xf32, #tpu.memory_space<vmem>>, vector<1x8x128xf32>
    %52 = vector.shape_cast %51 : vector<1x8x128xf32> to vector<8x128xf32>
    %53 = vector.shape_cast %20 : vector<8x128xf32> to vector<1x8x128xf32>
    tpu.vector_store %arg8[%50, %c0_25, %c256], %53 {strides = array<i32>} : memref<8x8x640xf32, #tpu.memory_space<vmem>>, vector<1x8x128xf32>,
    %54 = arith.index_cast %c0_i32_1 : i32 to index
    %c0_26 = arith.constant 0 : index
    %c384 = arith.constant 384 : index
    %55 = vector.load %arg8[%54, %c0_26, %c384] : memref<8x8x640xf32, #tpu.memory_space<vmem>>, vector<1x8x128xf32>
    %56 = vector.shape_cast %55 : vector<1x8x128xf32> to vector<8x128xf32>
    %57 = vector.shape_cast %26 : vector<8x128xf32> to vector<1x8x128xf32>
    tpu.vector_store %arg8[%54, %c0_26, %c384], %57 {strides = array<i32>} : memref<8x8x640xf32, #tpu.memory_space<vmem>>, vector<1x8x128xf32>,
    %58 = arith.index_cast %c0_i32_1 : i32 to index
    %c0_27 = arith.constant 0 : index
    %c512 = arith.constant 512 : index
    %59 = vector.load %arg8[%58, %c0_27, %c512] : memref<8x8x640xf32, #tpu.memory_space<vmem>>, vector<1x8x128xf32>
    %60 = vector.shape_cast %59 : vector<1x8x128xf32> to vector<8x128xf32>
    %61 = vector.shape_cast %31 : vector<8x128xf32> to vector<1x8x128xf32>
    tpu.vector_store %arg8[%58, %c0_27, %c512], %61 {strides = array<i32>} : memref<8x8x640xf32, #tpu.memory_space<vmem>>, vector<1x8x128xf32>,
    %c1_i32 = arith.constant 1 : i32
    %62 = arith.index_cast %c1_i32 : i32 to index
    %c0_28 = arith.constant 0 : index
    %c0_29 = arith.constant 0 : index
    %63 = vector.load %arg2[%62, %c0_28, %c0_29] : memref<8x8x128xf32, #tpu.memory_space<vmem>>, vector<1x8x128xf32>
    %64 = vector.shape_cast %63 : vector<1x8x128xf32> to vector<8x128xf32>
    %c0_30 = arith.constant 0 : index
    %c0_31 = arith.constant 0 : index
    %65 = vector.load %arg9[%c0_30, %c0_31] : memref<8x256xf32, #tpu.memory_space<vmem>>, vector<8x128xf32>
    tpu.vector_store %arg9[%c0_30, %c0_31], %64 {strides = array<i32>} : memref<8x256xf32, #tpu.memory_space<vmem>>, vector<8x128xf32>,
    %c0_32 = arith.constant 0 : index
    %c128_33 = arith.constant 128 : index
    %66 = vector.load %arg9[%c0_32, %c128_33] : memref<8x256xf32, #tpu.memory_space<vmem>>, vector<8x128xf32>
    %c0_34 = arith.constant 0 : index
    %c0_35 = arith.constant 0 : index
    %67 = vector.load %arg9[%c0_34, %c0_35] : memref<8x256xf32, #tpu.memory_space<vmem>>, vector<8x256xf32>
    %68 = arith.truncf %67 : vector<8x256xf32> to vector<8x256xbf16>
    %c0_36 = arith.constant 0 : index
    %c0_37 = arith.constant 0 : index
    %69 = vector.load %arg4[%c0_36, %c0_37] : memref<256x512xbf16, #tpu.memory_space<vmem>>, vector<256x512xbf16>
    %cst_38 = arith.constant dense<0.000000e+00> : vector<8x512xf32>
    %70 = tpu.matmul %68, %69, %cst_38 {dimension_numbers = #tpu.dot_dimension_numbers<[1], [0], [0], [1], [0, 0, 1, 1], [], []>} : vector<8x256xbf16>, vector<256x512xbf16>, vector<8x512xf32> -> vector<8x512xf32>
    %c0_39 = arith.constant 0 : index
    %c0_40 = arith.constant 0 : index
    %71 = vector.load %arg5[%c0_39, %c0_40] : memref<1x512xf32, #tpu.memory_space<vmem>>, vector<1x512xf32>
    %72 = vector.broadcast %71 : vector<1x512xf32> to vector<8x512xf32>
    %73 = arith.addf %70, %72 : vector<8x512xf32>
    %74 = vector.extract_strided_slice %73 {offsets = [0, 0], sizes = [8, 128], strides = [1, 1]} : vector<8x512xf32> to vector<8x128xf32>
    %75 = arith.negf %74 : vector<8x128xf32>
    %76 = math.exp %75 : vector<8x128xf32>
    %cst_41 = arith.constant 1.000000e+00 : f32
    %77 = vector.broadcast %cst_41 : f32 to vector<8x128xf32>
    %78 = arith.addf %77, %76 : vector<8x128xf32>
    %79 = arith.divf %77, %78 : vector<8x128xf32>
    %80 = vector.extract_strided_slice %73 {offsets = [0, 128], sizes = [8, 128], strides = [1, 1]} : vector<8x512xf32> to vector<8x128xf32>
    %81 = arith.negf %80 : vector<8x128xf32>
    %82 = math.exp %81 : vector<8x128xf32>
    %cst_42 = arith.constant 1.000000e+00 : f32
    %83 = vector.broadcast %cst_42 : f32 to vector<8x128xf32>
    %84 = arith.addf %83, %82 : vector<8x128xf32>
    %85 = arith.divf %83, %84 : vector<8x128xf32>
    %86 = vector.extract_strided_slice %73 {offsets = [0, 256], sizes = [8, 128], strides = [1, 1]} : vector<8x512xf32> to vector<8x128xf32>
    %87 = vector.extract_strided_slice %73 {offsets = [0, 384], sizes = [8, 128], strides = [1, 1]} : vector<8x512xf32> to vector<8x128xf32>
    %88 = arith.mulf %79, %87 : vector<8x128xf32>
    %89 = arith.addf %86, %88 : vector<8x128xf32>
    %90 = math.tanh %89 : vector<8x128xf32>
    %91 = arith.subf %66, %90 : vector<8x128xf32>
    %92 = arith.mulf %85, %91 : vector<8x128xf32>
    %93 = arith.addf %90, %92 : vector<8x128xf32>
    %94 = arith.truncf %93 : vector<8x128xf32> to vector<8x128xbf16>
    %c0_43 = arith.constant 0 : index
    %c0_44 = arith.constant 0 : index
    %95 = vector.load %arg6[%c0_43, %c0_44] : memref<128x128xbf16, #tpu.memory_space<vmem>>, vector<128x128xbf16>
    %cst_45 = arith.constant dense<0.000000e+00> : vector<8x128xf32>
    %96 = tpu.matmul %94, %95, %cst_45 {dimension_numbers = #tpu.dot_dimension_numbers<[1], [0], [0], [1], [0, 0, 1, 1], [], []>} : vector<8x128xbf16>, vector<128x128xbf16>, vector<8x128xf32> -> vector<8x128xf32>
    %c0_46 = arith.constant 0 : index
    %c0_47 = arith.constant 0 : index
    %97 = vector.load %arg7[%c0_46, %c0_47] : memref<1x128xf32, #tpu.memory_space<vmem>>, vector<1x128xf32>
    %98 = vector.broadcast %97 : vector<1x128xf32> to vector<8x128xf32>
    %99 = arith.addf %96, %98 : vector<8x128xf32>
    %c0_48 = arith.constant 0 : index
    %c128_49 = arith.constant 128 : index
    %100 = vector.load %arg9[%c0_48, %c128_49] : memref<8x256xf32, #tpu.memory_space<vmem>>, vector<8x128xf32>
    tpu.vector_store %arg9[%c0_48, %c128_49], %93 {strides = array<i32>} : memref<8x256xf32, #tpu.memory_space<vmem>>, vector<8x128xf32>,
    %101 = arith.index_cast %c1_i32 : i32 to index
    %c0_50 = arith.constant 0 : index
    %c0_51 = arith.constant 0 : index
    %102 = vector.load %arg8[%101, %c0_50, %c0_51] : memref<8x8x640xf32, #tpu.memory_space<vmem>>, vector<1x8x128xf32>
    %103 = vector.shape_cast %102 : vector<1x8x128xf32> to vector<8x128xf32>
    %104 = vector.shape_cast %99 : vector<8x128xf32> to vector<1x8x128xf32>
    tpu.vector_store %arg8[%101, %c0_50, %c0_51], %104 {strides = array<i32>} : memref<8x8x640xf32, #tpu.memory_space<vmem>>, vector<1x8x128xf32>,
    %105 = arith.index_cast %c1_i32 : i32 to index
    %c0_52 = arith.constant 0 : index
    %c128_53 = arith.constant 128 : index
    %106 = vector.load %arg8[%105, %c0_52, %c128_53] : memref<8x8x640xf32, #tpu.memory_space<vmem>>, vector<1x8x128xf32>
    %107 = vector.shape_cast %106 : vector<1x8x128xf32> to vector<8x128xf32>
    %108 = vector.shape_cast %93 : vector<8x128xf32> to vector<1x8x128xf32>
    tpu.vector_store %arg8[%105, %c0_52, %c128_53], %108 {strides = array<i32>} : memref<8x8x640xf32, #tpu.memory_space<vmem>>, vector<1x8x128xf32>,
    %109 = arith.index_cast %c1_i32 : i32 to index
    %c0_54 = arith.constant 0 : index
    %c256_55 = arith.constant 256 : index
    %110 = vector.load %arg8[%109, %c0_54, %c256_55] : memref<8x8x640xf32, #tpu.memory_space<vmem>>, vector<1x8x128xf32>
    %111 = vector.shape_cast %110 : vector<1x8x128xf32> to vector<8x128xf32>
    %112 = vector.shape_cast %79 : vector<8x128xf32> to vector<1x8x128xf32>
    tpu.vector_store %arg8[%109, %c0_54, %c256_55], %112 {strides = array<i32>} : memref<8x8x640xf32, #tpu.memory_space<vmem>>, vector<1x8x128xf32>,
    %113 = arith.index_cast %c1_i32 : i32 to index
    %c0_56 = arith.constant 0 : index
    %c384_57 = arith.constant 384 : index
    %114 = vector.load %arg8[%113, %c0_56, %c384_57] : memref<8x8x640xf32, #tpu.memory_space<vmem>>, vector<1x8x128xf32>
    %115 = vector.shape_cast %114 : vector<1x8x128xf32> to vector<8x128xf32>
    %116 = vector.shape_cast %85 : vector<8x128xf32> to vector<1x8x128xf32>
    tpu.vector_store %arg8[%113, %c0_56, %c384_57], %116 {strides = array<i32>} : memref<8x8x640xf32, #tpu.memory_space<vmem>>, vector<1x8x128xf32>,
    %117 = arith.index_cast %c1_i32 : i32 to index
    %c0_58 = arith.constant 0 : index
    %c512_59 = arith.constant 512 : index
    %118 = vector.load %arg8[%117, %c0_58, %c512_59] : memref<8x8x640xf32, #tpu.memory_space<vmem>>, vector<1x8x128xf32>
    %119 = vector.shape_cast %118 : vector<1x8x128xf32> to vector<8x128xf32>
    %120 = vector.shape_cast %90 : vector<8x128xf32> to vector<1x8x128xf32>
    tpu.vector_store %arg8[%117, %c0_58, %c512_59], %120 {strides = array<i32>} : memref<8x8x640xf32, #tpu.memory_space<vmem>>, vector<1x8x128xf32>,
    %c2_i32 = arith.constant 2 : i32
    %121 = arith.index_cast %c2_i32 : i32 to index
    %c0_60 = arith.constant 0 : index
    %c0_61 = arith.constant 0 : index
    %122 = vector.load %arg2[%121, %c0_60, %c0_61] : memref<8x8x128xf32, #tpu.memory_space<vmem>>, vector<1x8x128xf32>
    %123 = vector.shape_cast %122 : vector<1x8x128xf32> to vector<8x128xf32>
    %c0_62 = arith.constant 0 : index
    %c0_63 = arith.constant 0 : index
    %124 = vector.load %arg9[%c0_62, %c0_63] : memref<8x256xf32, #tpu.memory_space<vmem>>, vector<8x128xf32>
    tpu.vector_store %arg9[%c0_62, %c0_63], %123 {strides = array<i32>} : memref<8x256xf32, #tpu.memory_space<vmem>>, vector<8x128xf32>,
    %c0_64 = arith.constant 0 : index
    %c128_65 = arith.constant 128 : index
    %125 = vector.load %arg9[%c0_64, %c128_65] : memref<8x256xf32, #tpu.memory_space<vmem>>, vector<8x128xf32>
    %c0_66 = arith.constant 0 : index
    %c0_67 = arith.constant 0 : index
    %126 = vector.load %arg9[%c0_66, %c0_67] : memref<8x256xf32, #tpu.memory_space<vmem>>, vector<8x256xf32>
    %127 = arith.truncf %126 : vector<8x256xf32> to vector<8x256xbf16>
    %c0_68 = arith.constant 0 : index
    %c0_69 = arith.constant 0 : index
    %128 = vector.load %arg4[%c0_68, %c0_69] : memref<256x512xbf16, #tpu.memory_space<vmem>>, vector<256x512xbf16>
    %cst_70 = arith.constant dense<0.000000e+00> : vector<8x512xf32>
    %129 = tpu.matmul %127, %128, %cst_70 {dimension_numbers = #tpu.dot_dimension_numbers<[1], [0], [0], [1], [0, 0, 1, 1], [], []>} : vector<8x256xbf16>, vector<256x512xbf16>, vector<8x512xf32> -> vector<8x512xf32>
    %c0_71 = arith.constant 0 : index
    %c0_72 = arith.constant 0 : index
    %130 = vector.load %arg5[%c0_71, %c0_72] : memref<1x512xf32, #tpu.memory_space<vmem>>, vector<1x512xf32>
    %131 = vector.broadcast %130 : vector<1x512xf32> to vector<8x512xf32>
    %132 = arith.addf %129, %131 : vector<8x512xf32>
    %133 = vector.extract_strided_slice %132 {offsets = [0, 0], sizes = [8, 128], strides = [1, 1]} : vector<8x512xf32> to vector<8x128xf32>
    %134 = arith.negf %133 : vector<8x128xf32>
    %135 = math.exp %134 : vector<8x128xf32>
    %cst_73 = arith.constant 1.000000e+00 : f32
    %136 = vector.broadcast %cst_73 : f32 to vector<8x128xf32>
    %137 = arith.addf %136, %135 : vector<8x128xf32>
    %138 = arith.divf %136, %137 : vector<8x128xf32>
    %139 = vector.extract_strided_slice %132 {offsets = [0, 128], sizes = [8, 128], strides = [1, 1]} : vector<8x512xf32> to vector<8x128xf32>
    %140 = arith.negf %139 : vector<8x128xf32>
    %141 = math.exp %140 : vector<8x128xf32>
    %cst_74 = arith.constant 1.000000e+00 : f32
    %142 = vector.broadcast %cst_74 : f32 to vector<8x128xf32>
    %143 = arith.addf %142, %141 : vector<8x128xf32>
    %144 = arith.divf %142, %143 : vector<8x128xf32>
    %145 = vector.extract_strided_slice %132 {offsets = [0, 256], sizes = [8, 128], strides = [1, 1]} : vector<8x512xf32> to vector<8x128xf32>
    %146 = vector.extract_strided_slice %132 {offsets = [0, 384], sizes = [8, 128], strides = [1, 1]} : vector<8x512xf32> to vector<8x128xf32>
    %147 = arith.mulf %138, %146 : vector<8x128xf32>
    %148 = arith.addf %145, %147 : vector<8x128xf32>
    %149 = math.tanh %148 : vector<8x128xf32>
    %150 = arith.subf %125, %149 : vector<8x128xf32>
    %151 = arith.mulf %144, %150 : vector<8x128xf32>
    %152 = arith.addf %149, %151 : vector<8x128xf32>
    %153 = arith.truncf %152 : vector<8x128xf32> to vector<8x128xbf16>
    %c0_75 = arith.constant 0 : index
    %c0_76 = arith.constant 0 : index
    %154 = vector.load %arg6[%c0_75, %c0_76] : memref<128x128xbf16, #tpu.memory_space<vmem>>, vector<128x128xbf16>
    %cst_77 = arith.constant dense<0.000000e+00> : vector<8x128xf32>
    %155 = tpu.matmul %153, %154, %cst_77 {dimension_numbers = #tpu.dot_dimension_numbers<[1], [0], [0], [1], [0, 0, 1, 1], [], []>} : vector<8x128xbf16>, vector<128x128xbf16>, vector<8x128xf32> -> vector<8x128xf32>
    %c0_78 = arith.constant 0 : index
    %c0_79 = arith.constant 0 : index
    %156 = vector.load %arg7[%c0_78, %c0_79] : memref<1x128xf32, #tpu.memory_space<vmem>>, vector<1x128xf32>
    %157 = vector.broadcast %156 : vector<1x128xf32> to vector<8x128xf32>
    %158 = arith.addf %155, %157 : vector<8x128xf32>
    %c0_80 = arith.constant 0 : index
    %c128_81 = arith.constant 128 : index
    %159 = vector.load %arg9[%c0_80, %c128_81] : memref<8x256xf32, #tpu.memory_space<vmem>>, vector<8x128xf32>
    tpu.vector_store %arg9[%c0_80, %c128_81], %152 {strides = array<i32>} : memref<8x256xf32, #tpu.memory_space<vmem>>, vector<8x128xf32>,
    %160 = arith.index_cast %c2_i32 : i32 to index
    %c0_82 = arith.constant 0 : index
    %c0_83 = arith.constant 0 : index
    %161 = vector.load %arg8[%160, %c0_82, %c0_83] : memref<8x8x640xf32, #tpu.memory_space<vmem>>, vector<1x8x128xf32>
    %162 = vector.shape_cast %161 : vector<1x8x128xf32> to vector<8x128xf32>
    %163 = vector.shape_cast %158 : vector<8x128xf32> to vector<1x8x128xf32>
    tpu.vector_store %arg8[%160, %c0_82, %c0_83], %163 {strides = array<i32>} : memref<8x8x640xf32, #tpu.memory_space<vmem>>, vector<1x8x128xf32>,
    %164 = arith.index_cast %c2_i32 : i32 to index
    %c0_84 = arith.constant 0 : index
    %c128_85 = arith.constant 128 : index
    %165 = vector.load %arg8[%164, %c0_84, %c128_85] : memref<8x8x640xf32, #tpu.memory_space<vmem>>, vector<1x8x128xf32>
    %166 = vector.shape_cast %165 : vector<1x8x128xf32> to vector<8x128xf32>
    %167 = vector.shape_cast %152 : vector<8x128xf32> to vector<1x8x128xf32>
    tpu.vector_store %arg8[%164, %c0_84, %c128_85], %167 {strides = array<i32>} : memref<8x8x640xf32, #tpu.memory_space<vmem>>, vector<1x8x128xf32>,
    %168 = arith.index_cast %c2_i32 : i32 to index
    %c0_86 = arith.constant 0 : index
    %c256_87 = arith.constant 256 : index
    %169 = vector.load %arg8[%168, %c0_86, %c256_87] : memref<8x8x640xf32, #tpu.memory_space<vmem>>, vector<1x8x128xf32>
    %170 = vector.shape_cast %169 : vector<1x8x128xf32> to vector<8x128xf32>
    %171 = vector.shape_cast %138 : vector<8x128xf32> to vector<1x8x128xf32>
    tpu.vector_store %arg8[%168, %c0_86, %c256_87], %171 {strides = array<i32>} : memref<8x8x640xf32, #tpu.memory_space<vmem>>, vector<1x8x128xf32>,
    %172 = arith.index_cast %c2_i32 : i32 to index
    %c0_88 = arith.constant 0 : index
    %c384_89 = arith.constant 384 : index
    %173 = vector.load %arg8[%172, %c0_88, %c384_89] : memref<8x8x640xf32, #tpu.memory_space<vmem>>, vector<1x8x128xf32>
    %174 = vector.shape_cast %173 : vector<1x8x128xf32> to vector<8x128xf32>
    %175 = vector.shape_cast %144 : vector<8x128xf32> to vector<1x8x128xf32>
    tpu.vector_store %arg8[%172, %c0_88, %c384_89], %175 {strides = array<i32>} : memref<8x8x640xf32, #tpu.memory_space<vmem>>, vector<1x8x128xf32>,
    %176 = arith.index_cast %c2_i32 : i32 to index
    %c0_90 = arith.constant 0 : index
    %c512_91 = arith.constant 512 : index
    %177 = vector.load %arg8[%176, %c0_90, %c512_91] : memref<8x8x640xf32, #tpu.memory_space<vmem>>, vector<1x8x128xf32>
    %178 = vector.shape_cast %177 : vector<1x8x128xf32> to vector<8x128xf32>
    %179 = vector.shape_cast %149 : vector<8x128xf32> to vector<1x8x128xf32>
    tpu.vector_store %arg8[%176, %c0_90, %c512_91], %179 {strides = array<i32>} : memref<8x8x640xf32, #tpu.memory_space<vmem>>, vector<1x8x128xf32>,
    %c3_i32 = arith.constant 3 : i32
    %180 = arith.index_cast %c3_i32 : i32 to index
    %c0_92 = arith.constant 0 : index
    %c0_93 = arith.constant 0 : index
    %181 = vector.load %arg2[%180, %c0_92, %c0_93] : memref<8x8x128xf32, #tpu.memory_space<vmem>>, vector<1x8x128xf32>
    %182 = vector.shape_cast %181 : vector<1x8x128xf32> to vector<8x128xf32>
    %c0_94 = arith.constant 0 : index
    %c0_95 = arith.constant 0 : index
    %183 = vector.load %arg9[%c0_94, %c0_95] : memref<8x256xf32, #tpu.memory_space<vmem>>, vector<8x128xf32>
    tpu.vector_store %arg9[%c0_94, %c0_95], %182 {strides = array<i32>} : memref<8x256xf32, #tpu.memory_space<vmem>>, vector<8x128xf32>,
    %c0_96 = arith.constant 0 : index
    %c128_97 = arith.constant 128 : index
    %184 = vector.load %arg9[%c0_96, %c128_97] : memref<8x256xf32, #tpu.memory_space<vmem>>, vector<8x128xf32>
    %c0_98 = arith.constant 0 : index
    %c0_99 = arith.constant 0 : index
    %185 = vector.load %arg9[%c0_98, %c0_99] : memref<8x256xf32, #tpu.memory_space<vmem>>, vector<8x256xf32>
    %186 = arith.truncf %185 : vector<8x256xf32> to vector<8x256xbf16>
    %c0_100 = arith.constant 0 : index
    %c0_101 = arith.constant 0 : index
    %187 = vector.load %arg4[%c0_100, %c0_101] : memref<256x512xbf16, #tpu.memory_space<vmem>>, vector<256x512xbf16>
    %cst_102 = arith.constant dense<0.000000e+00> : vector<8x512xf32>
    %188 = tpu.matmul %186, %187, %cst_102 {dimension_numbers = #tpu.dot_dimension_numbers<[1], [0], [0], [1], [0, 0, 1, 1], [], []>} : vector<8x256xbf16>, vector<256x512xbf16>, vector<8x512xf32> -> vector<8x512xf32>
    %c0_103 = arith.constant 0 : index
    %c0_104 = arith.constant 0 : index
    %189 = vector.load %arg5[%c0_103, %c0_104] : memref<1x512xf32, #tpu.memory_space<vmem>>, vector<1x512xf32>
    %190 = vector.broadcast %189 : vector<1x512xf32> to vector<8x512xf32>
    %191 = arith.addf %188, %190 : vector<8x512xf32>
    %192 = vector.extract_strided_slice %191 {offsets = [0, 0], sizes = [8, 128], strides = [1, 1]} : vector<8x512xf32> to vector<8x128xf32>
    %193 = arith.negf %192 : vector<8x128xf32>
    %194 = math.exp %193 : vector<8x128xf32>
    %cst_105 = arith.constant 1.000000e+00 : f32
    %195 = vector.broadcast %cst_105 : f32 to vector<8x128xf32>
    %196 = arith.addf %195, %194 : vector<8x128xf32>
    %197 = arith.divf %195, %196 : vector<8x128xf32>
    %198 = vector.extract_strided_slice %191 {offsets = [0, 128], sizes = [8, 128], strides = [1, 1]} : vector<8x512xf32> to vector<8x128xf32>
    %199 = arith.negf %198 : vector<8x128xf32>
    %200 = math.exp %199 : vector<8x128xf32>
    %cst_106 = arith.constant 1.000000e+00 : f32
    %201 = vector.broadcast %cst_106 : f32 to vector<8x128xf32>
    %202 = arith.addf %201, %200 : vector<8x128xf32>
    %203 = arith.divf %201, %202 : vector<8x128xf32>
    %204 = vector.extract_strided_slice %191 {offsets = [0, 256], sizes = [8, 128], strides = [1, 1]} : vector<8x512xf32> to vector<8x128xf32>
    %205 = vector.extract_strided_slice %191 {offsets = [0, 384], sizes = [8, 128], strides = [1, 1]} : vector<8x512xf32> to vector<8x128xf32>
    %206 = arith.mulf %197, %205 : vector<8x128xf32>
    %207 = arith.addf %204, %206 : vector<8x128xf32>
    %208 = math.tanh %207 : vector<8x128xf32>
    %209 = arith.subf %184, %208 : vector<8x128xf32>
    %210 = arith.mulf %203, %209 : vector<8x128xf32>
    %211 = arith.addf %208, %210 : vector<8x128xf32>
    %212 = arith.truncf %211 : vector<8x128xf32> to vector<8x128xbf16>
    %c0_107 = arith.constant 0 : index
    %c0_108 = arith.constant 0 : index
    %213 = vector.load %arg6[%c0_107, %c0_108] : memref<128x128xbf16, #tpu.memory_space<vmem>>, vector<128x128xbf16>
    %cst_109 = arith.constant dense<0.000000e+00> : vector<8x128xf32>
    %214 = tpu.matmul %212, %213, %cst_109 {dimension_numbers = #tpu.dot_dimension_numbers<[1], [0], [0], [1], [0, 0, 1, 1], [], []>} : vector<8x128xbf16>, vector<128x128xbf16>, vector<8x128xf32> -> vector<8x128xf32>
    %c0_110 = arith.constant 0 : index
    %c0_111 = arith.constant 0 : index
    %215 = vector.load %arg7[%c0_110, %c0_111] : memref<1x128xf32, #tpu.memory_space<vmem>>, vector<1x128xf32>
    %216 = vector.broadcast %215 : vector<1x128xf32> to vector<8x128xf32>
    %217 = arith.addf %214, %216 : vector<8x128xf32>
    %c0_112 = arith.constant 0 : index
    %c128_113 = arith.constant 128 : index
    %218 = vector.load %arg9[%c0_112, %c128_113] : memref<8x256xf32, #tpu.memory_space<vmem>>, vector<8x128xf32>
    tpu.vector_store %arg9[%c0_112, %c128_113], %211 {strides = array<i32>} : memref<8x256xf32, #tpu.memory_space<vmem>>, vector<8x128xf32>,
    %219 = arith.index_cast %c3_i32 : i32 to index
    %c0_114 = arith.constant 0 : index
    %c0_115 = arith.constant 0 : index
    %220 = vector.load %arg8[%219, %c0_114, %c0_115] : memref<8x8x640xf32, #tpu.memory_space<vmem>>, vector<1x8x128xf32>
    %221 = vector.shape_cast %220 : vector<1x8x128xf32> to vector<8x128xf32>
    %222 = vector.shape_cast %217 : vector<8x128xf32> to vector<1x8x128xf32>
    tpu.vector_store %arg8[%219, %c0_114, %c0_115], %222 {strides = array<i32>} : memref<8x8x640xf32, #tpu.memory_space<vmem>>, vector<1x8x128xf32>,
    %223 = arith.index_cast %c3_i32 : i32 to index
    %c0_116 = arith.constant 0 : index
    %c128_117 = arith.constant 128 : index
    %224 = vector.load %arg8[%223, %c0_116, %c128_117] : memref<8x8x640xf32, #tpu.memory_space<vmem>>, vector<1x8x128xf32>
    %225 = vector.shape_cast %224 : vector<1x8x128xf32> to vector<8x128xf32>
    %226 = vector.shape_cast %211 : vector<8x128xf32> to vector<1x8x128xf32>
    tpu.vector_store %arg8[%223, %c0_116, %c128_117], %226 {strides = array<i32>} : memref<8x8x640xf32, #tpu.memory_space<vmem>>, vector<1x8x128xf32>,
    %227 = arith.index_cast %c3_i32 : i32 to index
    %c0_118 = arith.constant 0 : index
    %c256_119 = arith.constant 256 : index
    %228 = vector.load %arg8[%227, %c0_118, %c256_119] : memref<8x8x640xf32, #tpu.memory_space<vmem>>, vector<1x8x128xf32>
    %229 = vector.shape_cast %228 : vector<1x8x128xf32> to vector<8x128xf32>
    %230 = vector.shape_cast %197 : vector<8x128xf32> to vector<1x8x128xf32>
    tpu.vector_store %arg8[%227, %c0_118, %c256_119], %230 {strides = array<i32>} : memref<8x8x640xf32, #tpu.memory_space<vmem>>, vector<1x8x128xf32>,
    %231 = arith.index_cast %c3_i32 : i32 to index
    %c0_120 = arith.constant 0 : index
    %c384_121 = arith.constant 384 : index
    %232 = vector.load %arg8[%231, %c0_120, %c384_121] : memref<8x8x640xf32, #tpu.memory_space<vmem>>, vector<1x8x128xf32>
    %233 = vector.shape_cast %232 : vector<1x8x128xf32> to vector<8x128xf32>
    %234 = vector.shape_cast %203 : vector<8x128xf32> to vector<1x8x128xf32>
    tpu.vector_store %arg8[%231, %c0_120, %c384_121], %234 {strides = array<i32>} : memref<8x8x640xf32, #tpu.memory_space<vmem>>, vector<1x8x128xf32>,
    %235 = arith.index_cast %c3_i32 : i32 to index
    %c0_122 = arith.constant 0 : index
    %c512_123 = arith.constant 512 : index
    %236 = vector.load %arg8[%235, %c0_122, %c512_123] : memref<8x8x640xf32, #tpu.memory_space<vmem>>, vector<1x8x128xf32>
    %237 = vector.shape_cast %236 : vector<1x8x128xf32> to vector<8x128xf32>
    %238 = vector.shape_cast %208 : vector<8x128xf32> to vector<1x8x128xf32>
    tpu.vector_store %arg8[%235, %c0_122, %c512_123], %238 {strides = array<i32>} : memref<8x8x640xf32, #tpu.memory_space<vmem>>, vector<1x8x128xf32>,
    %c4_i32 = arith.constant 4 : i32
    %239 = arith.index_cast %c4_i32 : i32 to index
    %c0_124 = arith.constant 0 : index
    %c0_125 = arith.constant 0 : index
    %240 = vector.load %arg2[%239, %c0_124, %c0_125] : memref<8x8x128xf32, #tpu.memory_space<vmem>>, vector<1x8x128xf32>
    %241 = vector.shape_cast %240 : vector<1x8x128xf32> to vector<8x128xf32>
    %c0_126 = arith.constant 0 : index
    %c0_127 = arith.constant 0 : index
    %242 = vector.load %arg9[%c0_126, %c0_127] : memref<8x256xf32, #tpu.memory_space<vmem>>, vector<8x128xf32>
    tpu.vector_store %arg9[%c0_126, %c0_127], %241 {strides = array<i32>} : memref<8x256xf32, #tpu.memory_space<vmem>>, vector<8x128xf32>,
    %c0_128 = arith.constant 0 : index
    %c128_129 = arith.constant 128 : index
    %243 = vector.load %arg9[%c0_128, %c128_129] : memref<8x256xf32, #tpu.memory_space<vmem>>, vector<8x128xf32>
    %c0_130 = arith.constant 0 : index
    %c0_131 = arith.constant 0 : index
    %244 = vector.load %arg9[%c0_130, %c0_131] : memref<8x256xf32, #tpu.memory_space<vmem>>, vector<8x256xf32>
    %245 = arith.truncf %244 : vector<8x256xf32> to vector<8x256xbf16>
    %c0_132 = arith.constant 0 : index
    %c0_133 = arith.constant 0 : index
    %246 = vector.load %arg4[%c0_132, %c0_133] : memref<256x512xbf16, #tpu.memory_space<vmem>>, vector<256x512xbf16>
    %cst_134 = arith.constant dense<0.000000e+00> : vector<8x512xf32>
    %247 = tpu.matmul %245, %246, %cst_134 {dimension_numbers = #tpu.dot_dimension_numbers<[1], [0], [0], [1], [0, 0, 1, 1], [], []>} : vector<8x256xbf16>, vector<256x512xbf16>, vector<8x512xf32> -> vector<8x512xf32>
    %c0_135 = arith.constant 0 : index
    %c0_136 = arith.constant 0 : index
    %248 = vector.load %arg5[%c0_135, %c0_136] : memref<1x512xf32, #tpu.memory_space<vmem>>, vector<1x512xf32>
    %249 = vector.broadcast %248 : vector<1x512xf32> to vector<8x512xf32>
    %250 = arith.addf %247, %249 : vector<8x512xf32>
    %251 = vector.extract_strided_slice %250 {offsets = [0, 0], sizes = [8, 128], strides = [1, 1]} : vector<8x512xf32> to vector<8x128xf32>
    %252 = arith.negf %251 : vector<8x128xf32>
    %253 = math.exp %252 : vector<8x128xf32>
    %cst_137 = arith.constant 1.000000e+00 : f32
    %254 = vector.broadcast %cst_137 : f32 to vector<8x128xf32>
    %255 = arith.addf %254, %253 : vector<8x128xf32>
    %256 = arith.divf %254, %255 : vector<8x128xf32>
    %257 = vector.extract_strided_slice %250 {offsets = [0, 128], sizes = [8, 128], strides = [1, 1]} : vector<8x512xf32> to vector<8x128xf32>
    %258 = arith.negf %257 : vector<8x128xf32>
    %259 = math.exp %258 : vector<8x128xf32>
    %cst_138 = arith.constant 1.000000e+00 : f32
    %260 = vector.broadcast %cst_138 : f32 to vector<8x128xf32>
    %261 = arith.addf %260, %259 : vector<8x128xf32>
    %262 = arith.divf %260, %261 : vector<8x128xf32>
    %263 = vector.extract_strided_slice %250 {offsets = [0, 256], sizes = [8, 128], strides = [1, 1]} : vector<8x512xf32> to vector<8x128xf32>
    %264 = vector.extract_strided_slice %250 {offsets = [0, 384], sizes = [8, 128], strides = [1, 1]} : vector<8x512xf32> to vector<8x128xf32>
    %265 = arith.mulf %256, %264 : vector<8x128xf32>
    %266 = arith.addf %263, %265 : vector<8x128xf32>
    %267 = math.tanh %266 : vector<8x128xf32>
    %268 = arith.subf %243, %267 : vector<8x128xf32>
    %269 = arith.mulf %262, %268 : vector<8x128xf32>
    %270 = arith.addf %267, %269 : vector<8x128xf32>
    %271 = arith.truncf %270 : vector<8x128xf32> to vector<8x128xbf16>
    %c0_139 = arith.constant 0 : index
    %c0_140 = arith.constant 0 : index
    %272 = vector.load %arg6[%c0_139, %c0_140] : memref<128x128xbf16, #tpu.memory_space<vmem>>, vector<128x128xbf16>
    %cst_141 = arith.constant dense<0.000000e+00> : vector<8x128xf32>
    %273 = tpu.matmul %271, %272, %cst_141 {dimension_numbers = #tpu.dot_dimension_numbers<[1], [0], [0], [1], [0, 0, 1, 1], [], []>} : vector<8x128xbf16>, vector<128x128xbf16>, vector<8x128xf32> -> vector<8x128xf32>
    %c0_142 = arith.constant 0 : index
    %c0_143 = arith.constant 0 : index
    %274 = vector.load %arg7[%c0_142, %c0_143] : memref<1x128xf32, #tpu.memory_space<vmem>>, vector<1x128xf32>
    %275 = vector.broadcast %274 : vector<1x128xf32> to vector<8x128xf32>
    %276 = arith.addf %273, %275 : vector<8x128xf32>
    %c0_144 = arith.constant 0 : index
    %c128_145 = arith.constant 128 : index
    %277 = vector.load %arg9[%c0_144, %c128_145] : memref<8x256xf32, #tpu.memory_space<vmem>>, vector<8x128xf32>
    tpu.vector_store %arg9[%c0_144, %c128_145], %270 {strides = array<i32>} : memref<8x256xf32, #tpu.memory_space<vmem>>, vector<8x128xf32>,
    %278 = arith.index_cast %c4_i32 : i32 to index
    %c0_146 = arith.constant 0 : index
    %c0_147 = arith.constant 0 : index
    %279 = vector.load %arg8[%278, %c0_146, %c0_147] : memref<8x8x640xf32, #tpu.memory_space<vmem>>, vector<1x8x128xf32>
    %280 = vector.shape_cast %279 : vector<1x8x128xf32> to vector<8x128xf32>
    %281 = vector.shape_cast %276 : vector<8x128xf32> to vector<1x8x128xf32>
    tpu.vector_store %arg8[%278, %c0_146, %c0_147], %281 {strides = array<i32>} : memref<8x8x640xf32, #tpu.memory_space<vmem>>, vector<1x8x128xf32>,
    %282 = arith.index_cast %c4_i32 : i32 to index
    %c0_148 = arith.constant 0 : index
    %c128_149 = arith.constant 128 : index
    %283 = vector.load %arg8[%282, %c0_148, %c128_149] : memref<8x8x640xf32, #tpu.memory_space<vmem>>, vector<1x8x128xf32>
    %284 = vector.shape_cast %283 : vector<1x8x128xf32> to vector<8x128xf32>
    %285 = vector.shape_cast %270 : vector<8x128xf32> to vector<1x8x128xf32>
    tpu.vector_store %arg8[%282, %c0_148, %c128_149], %285 {strides = array<i32>} : memref<8x8x640xf32, #tpu.memory_space<vmem>>, vector<1x8x128xf32>,
    %286 = arith.index_cast %c4_i32 : i32 to index
    %c0_150 = arith.constant 0 : index
    %c256_151 = arith.constant 256 : index
    %287 = vector.load %arg8[%286, %c0_150, %c256_151] : memref<8x8x640xf32, #tpu.memory_space<vmem>>, vector<1x8x128xf32>
    %288 = vector.shape_cast %287 : vector<1x8x128xf32> to vector<8x128xf32>
    %289 = vector.shape_cast %256 : vector<8x128xf32> to vector<1x8x128xf32>
    tpu.vector_store %arg8[%286, %c0_150, %c256_151], %289 {strides = array<i32>} : memref<8x8x640xf32, #tpu.memory_space<vmem>>, vector<1x8x128xf32>,
    %290 = arith.index_cast %c4_i32 : i32 to index
    %c0_152 = arith.constant 0 : index
    %c384_153 = arith.constant 384 : index
    %291 = vector.load %arg8[%290, %c0_152, %c384_153] : memref<8x8x640xf32, #tpu.memory_space<vmem>>, vector<1x8x128xf32>
    %292 = vector.shape_cast %291 : vector<1x8x128xf32> to vector<8x128xf32>
    %293 = vector.shape_cast %262 : vector<8x128xf32> to vector<1x8x128xf32>
    tpu.vector_store %arg8[%290, %c0_152, %c384_153], %293 {strides = array<i32>} : memref<8x8x640xf32, #tpu.memory_space<vmem>>, vector<1x8x128xf32>,
    %294 = arith.index_cast %c4_i32 : i32 to index
    %c0_154 = arith.constant 0 : index
    %c512_155 = arith.constant 512 : index
    %295 = vector.load %arg8[%294, %c0_154, %c512_155] : memref<8x8x640xf32, #tpu.memory_space<vmem>>, vector<1x8x128xf32>
    %296 = vector.shape_cast %295 : vector<1x8x128xf32> to vector<8x128xf32>
    %297 = vector.shape_cast %267 : vector<8x128xf32> to vector<1x8x128xf32>
    tpu.vector_store %arg8[%294, %c0_154, %c512_155], %297 {strides = array<i32>} : memref<8x8x640xf32, #tpu.memory_space<vmem>>, vector<1x8x128xf32>,
    %c5_i32 = arith.constant 5 : i32
    %298 = arith.index_cast %c5_i32 : i32 to index
    %c0_156 = arith.constant 0 : index
    %c0_157 = arith.constant 0 : index
    %299 = vector.load %arg2[%298, %c0_156, %c0_157] : memref<8x8x128xf32, #tpu.memory_space<vmem>>, vector<1x8x128xf32>
    %300 = vector.shape_cast %299 : vector<1x8x128xf32> to vector<8x128xf32>
    %c0_158 = arith.constant 0 : index
    %c0_159 = arith.constant 0 : index
    %301 = vector.load %arg9[%c0_158, %c0_159] : memref<8x256xf32, #tpu.memory_space<vmem>>, vector<8x128xf32>
    tpu.vector_store %arg9[%c0_158, %c0_159], %300 {strides = array<i32>} : memref<8x256xf32, #tpu.memory_space<vmem>>, vector<8x128xf32>,
    %c0_160 = arith.constant 0 : index
    %c128_161 = arith.constant 128 : index
    %302 = vector.load %arg9[%c0_160, %c128_161] : memref<8x256xf32, #tpu.memory_space<vmem>>, vector<8x128xf32>
    %c0_162 = arith.constant 0 : index
    %c0_163 = arith.constant 0 : index
    %303 = vector.load %arg9[%c0_162, %c0_163] : memref<8x256xf32, #tpu.memory_space<vmem>>, vector<8x256xf32>
    %304 = arith.truncf %303 : vector<8x256xf32> to vector<8x256xbf16>
    %c0_164 = arith.constant 0 : index
    %c0_165 = arith.constant 0 : index
    %305 = vector.load %arg4[%c0_164, %c0_165] : memref<256x512xbf16, #tpu.memory_space<vmem>>, vector<256x512xbf16>
    %cst_166 = arith.constant dense<0.000000e+00> : vector<8x512xf32>
    %306 = tpu.matmul %304, %305, %cst_166 {dimension_numbers = #tpu.dot_dimension_numbers<[1], [0], [0], [1], [0, 0, 1, 1], [], []>} : vector<8x256xbf16>, vector<256x512xbf16>, vector<8x512xf32> -> vector<8x512xf32>
    %c0_167 = arith.constant 0 : index
    %c0_168 = arith.constant 0 : index
    %307 = vector.load %arg5[%c0_167, %c0_168] : memref<1x512xf32, #tpu.memory_space<vmem>>, vector<1x512xf32>
    %308 = vector.broadcast %307 : vector<1x512xf32> to vector<8x512xf32>
    %309 = arith.addf %306, %308 : vector<8x512xf32>
    %310 = vector.extract_strided_slice %309 {offsets = [0, 0], sizes = [8, 128], strides = [1, 1]} : vector<8x512xf32> to vector<8x128xf32>
    %311 = arith.negf %310 : vector<8x128xf32>
    %312 = math.exp %311 : vector<8x128xf32>
    %cst_169 = arith.constant 1.000000e+00 : f32
    %313 = vector.broadcast %cst_169 : f32 to vector<8x128xf32>
    %314 = arith.addf %313, %312 : vector<8x128xf32>
    %315 = arith.divf %313, %314 : vector<8x128xf32>
    %316 = vector.extract_strided_slice %309 {offsets = [0, 128], sizes = [8, 128], strides = [1, 1]} : vector<8x512xf32> to vector<8x128xf32>
    %317 = arith.negf %316 : vector<8x128xf32>
    %318 = math.exp %317 : vector<8x128xf32>
    %cst_170 = arith.constant 1.000000e+00 : f32
    %319 = vector.broadcast %cst_170 : f32 to vector<8x128xf32>
    %320 = arith.addf %319, %318 : vector<8x128xf32>
    %321 = arith.divf %319, %320 : vector<8x128xf32>
    %322 = vector.extract_strided_slice %309 {offsets = [0, 256], sizes = [8, 128], strides = [1, 1]} : vector<8x512xf32> to vector<8x128xf32>
    %323 = vector.extract_strided_slice %309 {offsets = [0, 384], sizes = [8, 128], strides = [1, 1]} : vector<8x512xf32> to vector<8x128xf32>
    %324 = arith.mulf %315, %323 : vector<8x128xf32>
    %325 = arith.addf %322, %324 : vector<8x128xf32>
    %326 = math.tanh %325 : vector<8x128xf32>
    %327 = arith.subf %302, %326 : vector<8x128xf32>
    %328 = arith.mulf %321, %327 : vector<8x128xf32>
    %329 = arith.addf %326, %328 : vector<8x128xf32>
    %330 = arith.truncf %329 : vector<8x128xf32> to vector<8x128xbf16>
    %c0_171 = arith.constant 0 : index
    %c0_172 = arith.constant 0 : index
    %331 = vector.load %arg6[%c0_171, %c0_172] : memref<128x128xbf16, #tpu.memory_space<vmem>>, vector<128x128xbf16>
    %cst_173 = arith.constant dense<0.000000e+00> : vector<8x128xf32>
    %332 = tpu.matmul %330, %331, %cst_173 {dimension_numbers = #tpu.dot_dimension_numbers<[1], [0], [0], [1], [0, 0, 1, 1], [], []>} : vector<8x128xbf16>, vector<128x128xbf16>, vector<8x128xf32> -> vector<8x128xf32>
    %c0_174 = arith.constant 0 : index
    %c0_175 = arith.constant 0 : index
    %333 = vector.load %arg7[%c0_174, %c0_175] : memref<1x128xf32, #tpu.memory_space<vmem>>, vector<1x128xf32>
    %334 = vector.broadcast %333 : vector<1x128xf32> to vector<8x128xf32>
    %335 = arith.addf %332, %334 : vector<8x128xf32>
    %c0_176 = arith.constant 0 : index
    %c128_177 = arith.constant 128 : index
    %336 = vector.load %arg9[%c0_176, %c128_177] : memref<8x256xf32, #tpu.memory_space<vmem>>, vector<8x128xf32>
    tpu.vector_store %arg9[%c0_176, %c128_177], %329 {strides = array<i32>} : memref<8x256xf32, #tpu.memory_space<vmem>>, vector<8x128xf32>,
    %337 = arith.index_cast %c5_i32 : i32 to index
    %c0_178 = arith.constant 0 : index
    %c0_179 = arith.constant 0 : index
    %338 = vector.load %arg8[%337, %c0_178, %c0_179] : memref<8x8x640xf32, #tpu.memory_space<vmem>>, vector<1x8x128xf32>
    %339 = vector.shape_cast %338 : vector<1x8x128xf32> to vector<8x128xf32>
    %340 = vector.shape_cast %335 : vector<8x128xf32> to vector<1x8x128xf32>
    tpu.vector_store %arg8[%337, %c0_178, %c0_179], %340 {strides = array<i32>} : memref<8x8x640xf32, #tpu.memory_space<vmem>>, vector<1x8x128xf32>,
    %341 = arith.index_cast %c5_i32 : i32 to index
    %c0_180 = arith.constant 0 : index
    %c128_181 = arith.constant 128 : index
    %342 = vector.load %arg8[%341, %c0_180, %c128_181] : memref<8x8x640xf32, #tpu.memory_space<vmem>>, vector<1x8x128xf32>
    %343 = vector.shape_cast %342 : vector<1x8x128xf32> to vector<8x128xf32>
    %344 = vector.shape_cast %329 : vector<8x128xf32> to vector<1x8x128xf32>
    tpu.vector_store %arg8[%341, %c0_180, %c128_181], %344 {strides = array<i32>} : memref<8x8x640xf32, #tpu.memory_space<vmem>>, vector<1x8x128xf32>,
    %345 = arith.index_cast %c5_i32 : i32 to index
    %c0_182 = arith.constant 0 : index
    %c256_183 = arith.constant 256 : index
    %346 = vector.load %arg8[%345, %c0_182, %c256_183] : memref<8x8x640xf32, #tpu.memory_space<vmem>>, vector<1x8x128xf32>
    %347 = vector.shape_cast %346 : vector<1x8x128xf32> to vector<8x128xf32>
    %348 = vector.shape_cast %315 : vector<8x128xf32> to vector<1x8x128xf32>
    tpu.vector_store %arg8[%345, %c0_182, %c256_183], %348 {strides = array<i32>} : memref<8x8x640xf32, #tpu.memory_space<vmem>>, vector<1x8x128xf32>,
    %349 = arith.index_cast %c5_i32 : i32 to index
    %c0_184 = arith.constant 0 : index
    %c384_185 = arith.constant 384 : index
    %350 = vector.load %arg8[%349, %c0_184, %c384_185] : memref<8x8x640xf32, #tpu.memory_space<vmem>>, vector<1x8x128xf32>
    %351 = vector.shape_cast %350 : vector<1x8x128xf32> to vector<8x128xf32>
    %352 = vector.shape_cast %321 : vector<8x128xf32> to vector<1x8x128xf32>
    tpu.vector_store %arg8[%349, %c0_184, %c384_185], %352 {strides = array<i32>} : memref<8x8x640xf32, #tpu.memory_space<vmem>>, vector<1x8x128xf32>,
    %353 = arith.index_cast %c5_i32 : i32 to index
    %c0_186 = arith.constant 0 : index
    %c512_187 = arith.constant 512 : index
    %354 = vector.load %arg8[%353, %c0_186, %c512_187] : memref<8x8x640xf32, #tpu.memory_space<vmem>>, vector<1x8x128xf32>
    %355 = vector.shape_cast %354 : vector<1x8x128xf32> to vector<8x128xf32>
    %356 = vector.shape_cast %326 : vector<8x128xf32> to vector<1x8x128xf32>
    tpu.vector_store %arg8[%353, %c0_186, %c512_187], %356 {strides = array<i32>} : memref<8x8x640xf32, #tpu.memory_space<vmem>>, vector<1x8x128xf32>,
    %c6_i32 = arith.constant 6 : i32
    %357 = arith.index_cast %c6_i32 : i32 to index
    %c0_188 = arith.constant 0 : index
    %c0_189 = arith.constant 0 : index
    %358 = vector.load %arg2[%357, %c0_188, %c0_189] : memref<8x8x128xf32, #tpu.memory_space<vmem>>, vector<1x8x128xf32>
    %359 = vector.shape_cast %358 : vector<1x8x128xf32> to vector<8x128xf32>
    %c0_190 = arith.constant 0 : index
    %c0_191 = arith.constant 0 : index
    %360 = vector.load %arg9[%c0_190, %c0_191] : memref<8x256xf32, #tpu.memory_space<vmem>>, vector<8x128xf32>
    tpu.vector_store %arg9[%c0_190, %c0_191], %359 {strides = array<i32>} : memref<8x256xf32, #tpu.memory_space<vmem>>, vector<8x128xf32>,
    %c0_192 = arith.constant 0 : index
    %c128_193 = arith.constant 128 : index
    %361 = vector.load %arg9[%c0_192, %c128_193] : memref<8x256xf32, #tpu.memory_space<vmem>>, vector<8x128xf32>
    %c0_194 = arith.constant 0 : index
    %c0_195 = arith.constant 0 : index
    %362 = vector.load %arg9[%c0_194, %c0_195] : memref<8x256xf32, #tpu.memory_space<vmem>>, vector<8x256xf32>
    %363 = arith.truncf %362 : vector<8x256xf32> to vector<8x256xbf16>
    %c0_196 = arith.constant 0 : index
    %c0_197 = arith.constant 0 : index
    %364 = vector.load %arg4[%c0_196, %c0_197] : memref<256x512xbf16, #tpu.memory_space<vmem>>, vector<256x512xbf16>
    %cst_198 = arith.constant dense<0.000000e+00> : vector<8x512xf32>
    %365 = tpu.matmul %363, %364, %cst_198 {dimension_numbers = #tpu.dot_dimension_numbers<[1], [0], [0], [1], [0, 0, 1, 1], [], []>} : vector<8x256xbf16>, vector<256x512xbf16>, vector<8x512xf32> -> vector<8x512xf32>
    %c0_199 = arith.constant 0 : index
    %c0_200 = arith.constant 0 : index
    %366 = vector.load %arg5[%c0_199, %c0_200] : memref<1x512xf32, #tpu.memory_space<vmem>>, vector<1x512xf32>
    %367 = vector.broadcast %366 : vector<1x512xf32> to vector<8x512xf32>
    %368 = arith.addf %365, %367 : vector<8x512xf32>
    %369 = vector.extract_strided_slice %368 {offsets = [0, 0], sizes = [8, 128], strides = [1, 1]} : vector<8x512xf32> to vector<8x128xf32>
    %370 = arith.negf %369 : vector<8x128xf32>
    %371 = math.exp %370 : vector<8x128xf32>
    %cst_201 = arith.constant 1.000000e+00 : f32
    %372 = vector.broadcast %cst_201 : f32 to vector<8x128xf32>
    %373 = arith.addf %372, %371 : vector<8x128xf32>
    %374 = arith.divf %372, %373 : vector<8x128xf32>
    %375 = vector.extract_strided_slice %368 {offsets = [0, 128], sizes = [8, 128], strides = [1, 1]} : vector<8x512xf32> to vector<8x128xf32>
    %376 = arith.negf %375 : vector<8x128xf32>
    %377 = math.exp %376 : vector<8x128xf32>
    %cst_202 = arith.constant 1.000000e+00 : f32
    %378 = vector.broadcast %cst_202 : f32 to vector<8x128xf32>
    %379 = arith.addf %378, %377 : vector<8x128xf32>
    %380 = arith.divf %378, %379 : vector<8x128xf32>
    %381 = vector.extract_strided_slice %368 {offsets = [0, 256], sizes = [8, 128], strides = [1, 1]} : vector<8x512xf32> to vector<8x128xf32>
    %382 = vector.extract_strided_slice %368 {offsets = [0, 384], sizes = [8, 128], strides = [1, 1]} : vector<8x512xf32> to vector<8x128xf32>
    %383 = arith.mulf %374, %382 : vector<8x128xf32>
    %384 = arith.addf %381, %383 : vector<8x128xf32>
    %385 = math.tanh %384 : vector<8x128xf32>
    %386 = arith.subf %361, %385 : vector<8x128xf32>
    %387 = arith.mulf %380, %386 : vector<8x128xf32>
    %388 = arith.addf %385, %387 : vector<8x128xf32>
    %389 = arith.truncf %388 : vector<8x128xf32> to vector<8x128xbf16>
    %c0_203 = arith.constant 0 : index
    %c0_204 = arith.constant 0 : index
    %390 = vector.load %arg6[%c0_203, %c0_204] : memref<128x128xbf16, #tpu.memory_space<vmem>>, vector<128x128xbf16>
    %cst_205 = arith.constant dense<0.000000e+00> : vector<8x128xf32>
    %391 = tpu.matmul %389, %390, %cst_205 {dimension_numbers = #tpu.dot_dimension_numbers<[1], [0], [0], [1], [0, 0, 1, 1], [], []>} : vector<8x128xbf16>, vector<128x128xbf16>, vector<8x128xf32> -> vector<8x128xf32>
    %c0_206 = arith.constant 0 : index
    %c0_207 = arith.constant 0 : index
    %392 = vector.load %arg7[%c0_206, %c0_207] : memref<1x128xf32, #tpu.memory_space<vmem>>, vector<1x128xf32>
    %393 = vector.broadcast %392 : vector<1x128xf32> to vector<8x128xf32>
    %394 = arith.addf %391, %393 : vector<8x128xf32>
    %c0_208 = arith.constant 0 : index
    %c128_209 = arith.constant 128 : index
    %395 = vector.load %arg9[%c0_208, %c128_209] : memref<8x256xf32, #tpu.memory_space<vmem>>, vector<8x128xf32>
    tpu.vector_store %arg9[%c0_208, %c128_209], %388 {strides = array<i32>} : memref<8x256xf32, #tpu.memory_space<vmem>>, vector<8x128xf32>,
    %396 = arith.index_cast %c6_i32 : i32 to index
    %c0_210 = arith.constant 0 : index
    %c0_211 = arith.constant 0 : index
    %397 = vector.load %arg8[%396, %c0_210, %c0_211] : memref<8x8x640xf32, #tpu.memory_space<vmem>>, vector<1x8x128xf32>
    %398 = vector.shape_cast %397 : vector<1x8x128xf32> to vector<8x128xf32>
    %399 = vector.shape_cast %394 : vector<8x128xf32> to vector<1x8x128xf32>
    tpu.vector_store %arg8[%396, %c0_210, %c0_211], %399 {strides = array<i32>} : memref<8x8x640xf32, #tpu.memory_space<vmem>>, vector<1x8x128xf32>,
    %400 = arith.index_cast %c6_i32 : i32 to index
    %c0_212 = arith.constant 0 : index
    %c128_213 = arith.constant 128 : index
    %401 = vector.load %arg8[%400, %c0_212, %c128_213] : memref<8x8x640xf32, #tpu.memory_space<vmem>>, vector<1x8x128xf32>
    %402 = vector.shape_cast %401 : vector<1x8x128xf32> to vector<8x128xf32>
    %403 = vector.shape_cast %388 : vector<8x128xf32> to vector<1x8x128xf32>
    tpu.vector_store %arg8[%400, %c0_212, %c128_213], %403 {strides = array<i32>} : memref<8x8x640xf32, #tpu.memory_space<vmem>>, vector<1x8x128xf32>,
    %404 = arith.index_cast %c6_i32 : i32 to index
    %c0_214 = arith.constant 0 : index
    %c256_215 = arith.constant 256 : index
    %405 = vector.load %arg8[%404, %c0_214, %c256_215] : memref<8x8x640xf32, #tpu.memory_space<vmem>>, vector<1x8x128xf32>
    %406 = vector.shape_cast %405 : vector<1x8x128xf32> to vector<8x128xf32>
    %407 = vector.shape_cast %374 : vector<8x128xf32> to vector<1x8x128xf32>
    tpu.vector_store %arg8[%404, %c0_214, %c256_215], %407 {strides = array<i32>} : memref<8x8x640xf32, #tpu.memory_space<vmem>>, vector<1x8x128xf32>,
    %408 = arith.index_cast %c6_i32 : i32 to index
    %c0_216 = arith.constant 0 : index
    %c384_217 = arith.constant 384 : index
    %409 = vector.load %arg8[%408, %c0_216, %c384_217] : memref<8x8x640xf32, #tpu.memory_space<vmem>>, vector<1x8x128xf32>
    %410 = vector.shape_cast %409 : vector<1x8x128xf32> to vector<8x128xf32>
    %411 = vector.shape_cast %380 : vector<8x128xf32> to vector<1x8x128xf32>
    tpu.vector_store %arg8[%408, %c0_216, %c384_217], %411 {strides = array<i32>} : memref<8x8x640xf32, #tpu.memory_space<vmem>>, vector<1x8x128xf32>,
    %412 = arith.index_cast %c6_i32 : i32 to index
    %c0_218 = arith.constant 0 : index
    %c512_219 = arith.constant 512 : index
    %413 = vector.load %arg8[%412, %c0_218, %c512_219] : memref<8x8x640xf32, #tpu.memory_space<vmem>>, vector<1x8x128xf32>
    %414 = vector.shape_cast %413 : vector<1x8x128xf32> to vector<8x128xf32>
    %415 = vector.shape_cast %385 : vector<8x128xf32> to vector<1x8x128xf32>
    tpu.vector_store %arg8[%412, %c0_218, %c512_219], %415 {strides = array<i32>} : memref<8x8x640xf32, #tpu.memory_space<vmem>>, vector<1x8x128xf32>,
    %c7_i32 = arith.constant 7 : i32
    %416 = arith.index_cast %c7_i32 : i32 to index
    %c0_220 = arith.constant 0 : index
    %c0_221 = arith.constant 0 : index
    %417 = vector.load %arg2[%416, %c0_220, %c0_221] : memref<8x8x128xf32, #tpu.memory_space<vmem>>, vector<1x8x128xf32>
    %418 = vector.shape_cast %417 : vector<1x8x128xf32> to vector<8x128xf32>
    %c0_222 = arith.constant 0 : index
    %c0_223 = arith.constant 0 : index
    %419 = vector.load %arg9[%c0_222, %c0_223] : memref<8x256xf32, #tpu.memory_space<vmem>>, vector<8x128xf32>
    tpu.vector_store %arg9[%c0_222, %c0_223], %418 {strides = array<i32>} : memref<8x256xf32, #tpu.memory_space<vmem>>, vector<8x128xf32>,
    %c0_224 = arith.constant 0 : index
    %c128_225 = arith.constant 128 : index
    %420 = vector.load %arg9[%c0_224, %c128_225] : memref<8x256xf32, #tpu.memory_space<vmem>>, vector<8x128xf32>
    %c0_226 = arith.constant 0 : index
    %c0_227 = arith.constant 0 : index
    %421 = vector.load %arg9[%c0_226, %c0_227] : memref<8x256xf32, #tpu.memory_space<vmem>>, vector<8x256xf32>
    %422 = arith.truncf %421 : vector<8x256xf32> to vector<8x256xbf16>
    %c0_228 = arith.constant 0 : index
    %c0_229 = arith.constant 0 : index
    %423 = vector.load %arg4[%c0_228, %c0_229] : memref<256x512xbf16, #tpu.memory_space<vmem>>, vector<256x512xbf16>
    %cst_230 = arith.constant dense<0.000000e+00> : vector<8x512xf32>
    %424 = tpu.matmul %422, %423, %cst_230 {dimension_numbers = #tpu.dot_dimension_numbers<[1], [0], [0], [1], [0, 0, 1, 1], [], []>} : vector<8x256xbf16>, vector<256x512xbf16>, vector<8x512xf32> -> vector<8x512xf32>
    %c0_231 = arith.constant 0 : index
    %c0_232 = arith.constant 0 : index
    %425 = vector.load %arg5[%c0_231, %c0_232] : memref<1x512xf32, #tpu.memory_space<vmem>>, vector<1x512xf32>
    %426 = vector.broadcast %425 : vector<1x512xf32> to vector<8x512xf32>
    %427 = arith.addf %424, %426 : vector<8x512xf32>
    %428 = vector.extract_strided_slice %427 {offsets = [0, 0], sizes = [8, 128], strides = [1, 1]} : vector<8x512xf32> to vector<8x128xf32>
    %429 = arith.negf %428 : vector<8x128xf32>
    %430 = math.exp %429 : vector<8x128xf32>
    %cst_233 = arith.constant 1.000000e+00 : f32
    %431 = vector.broadcast %cst_233 : f32 to vector<8x128xf32>
    %432 = arith.addf %431, %430 : vector<8x128xf32>
    %433 = arith.divf %431, %432 : vector<8x128xf32>
    %434 = vector.extract_strided_slice %427 {offsets = [0, 128], sizes = [8, 128], strides = [1, 1]} : vector<8x512xf32> to vector<8x128xf32>
    %435 = arith.negf %434 : vector<8x128xf32>
    %436 = math.exp %435 : vector<8x128xf32>
    %cst_234 = arith.constant 1.000000e+00 : f32
    %437 = vector.broadcast %cst_234 : f32 to vector<8x128xf32>
    %438 = arith.addf %437, %436 : vector<8x128xf32>
    %439 = arith.divf %437, %438 : vector<8x128xf32>
    %440 = vector.extract_strided_slice %427 {offsets = [0, 256], sizes = [8, 128], strides = [1, 1]} : vector<8x512xf32> to vector<8x128xf32>
    %441 = vector.extract_strided_slice %427 {offsets = [0, 384], sizes = [8, 128], strides = [1, 1]} : vector<8x512xf32> to vector<8x128xf32>
    %442 = arith.mulf %433, %441 : vector<8x128xf32>
    %443 = arith.addf %440, %442 : vector<8x128xf32>
    %444 = math.tanh %443 : vector<8x128xf32>
    %445 = arith.subf %420, %444 : vector<8x128xf32>
    %446 = arith.mulf %439, %445 : vector<8x128xf32>
    %447 = arith.addf %444, %446 : vector<8x128xf32>
    %448 = arith.truncf %447 : vector<8x128xf32> to vector<8x128xbf16>
    %c0_235 = arith.constant 0 : index
    %c0_236 = arith.constant 0 : index
    %449 = vector.load %arg6[%c0_235, %c0_236] : memref<128x128xbf16, #tpu.memory_space<vmem>>, vector<128x128xbf16>
    %cst_237 = arith.constant dense<0.000000e+00> : vector<8x128xf32>
    %450 = tpu.matmul %448, %449, %cst_237 {dimension_numbers = #tpu.dot_dimension_numbers<[1], [0], [0], [1], [0, 0, 1, 1], [], []>} : vector<8x128xbf16>, vector<128x128xbf16>, vector<8x128xf32> -> vector<8x128xf32>
    %c0_238 = arith.constant 0 : index
    %c0_239 = arith.constant 0 : index
    %451 = vector.load %arg7[%c0_238, %c0_239] : memref<1x128xf32, #tpu.memory_space<vmem>>, vector<1x128xf32>
    %452 = vector.broadcast %451 : vector<1x128xf32> to vector<8x128xf32>
    %453 = arith.addf %450, %452 : vector<8x128xf32>
    %c0_240 = arith.constant 0 : index
    %c128_241 = arith.constant 128 : index
    %454 = vector.load %arg9[%c0_240, %c128_241] : memref<8x256xf32, #tpu.memory_space<vmem>>, vector<8x128xf32>
    tpu.vector_store %arg9[%c0_240, %c128_241], %447 {strides = array<i32>} : memref<8x256xf32, #tpu.memory_space<vmem>>, vector<8x128xf32>,
    %455 = arith.index_cast %c7_i32 : i32 to index
    %c0_242 = arith.constant 0 : index
    %c0_243 = arith.constant 0 : index
    %456 = vector.load %arg8[%455, %c0_242, %c0_243] : memref<8x8x640xf32, #tpu.memory_space<vmem>>, vector<1x8x128xf32>
    %457 = vector.shape_cast %456 : vector<1x8x128xf32> to vector<8x128xf32>
    %458 = vector.shape_cast %453 : vector<8x128xf32> to vector<1x8x128xf32>
    tpu.vector_store %arg8[%455, %c0_242, %c0_243], %458 {strides = array<i32>} : memref<8x8x640xf32, #tpu.memory_space<vmem>>, vector<1x8x128xf32>,
    %459 = arith.index_cast %c7_i32 : i32 to index
    %c0_244 = arith.constant 0 : index
    %c128_245 = arith.constant 128 : index
    %460 = vector.load %arg8[%459, %c0_244, %c128_245] : memref<8x8x640xf32, #tpu.memory_space<vmem>>, vector<1x8x128xf32>
    %461 = vector.shape_cast %460 : vector<1x8x128xf32> to vector<8x128xf32>
    %462 = vector.shape_cast %447 : vector<8x128xf32> to vector<1x8x128xf32>
    tpu.vector_store %arg8[%459, %c0_244, %c128_245], %462 {strides = array<i32>} : memref<8x8x640xf32, #tpu.memory_space<vmem>>, vector<1x8x128xf32>,
    %463 = arith.index_cast %c7_i32 : i32 to index
    %c0_246 = arith.constant 0 : index
    %c256_247 = arith.constant 256 : index
    %464 = vector.load %arg8[%463, %c0_246, %c256_247] : memref<8x8x640xf32, #tpu.memory_space<vmem>>, vector<1x8x128xf32>
    %465 = vector.shape_cast %464 : vector<1x8x128xf32> to vector<8x128xf32>
    %466 = vector.shape_cast %433 : vector<8x128xf32> to vector<1x8x128xf32>
    tpu.vector_store %arg8[%463, %c0_246, %c256_247], %466 {strides = array<i32>} : memref<8x8x640xf32, #tpu.memory_space<vmem>>, vector<1x8x128xf32>,
    %467 = arith.index_cast %c7_i32 : i32 to index
    %c0_248 = arith.constant 0 : index
    %c384_249 = arith.constant 384 : index
    %468 = vector.load %arg8[%467, %c0_248, %c384_249] : memref<8x8x640xf32, #tpu.memory_space<vmem>>, vector<1x8x128xf32>
    %469 = vector.shape_cast %468 : vector<1x8x128xf32> to vector<8x128xf32>
    %470 = vector.shape_cast %439 : vector<8x128xf32> to vector<1x8x128xf32>
    tpu.vector_store %arg8[%467, %c0_248, %c384_249], %470 {strides = array<i32>} : memref<8x8x640xf32, #tpu.memory_space<vmem>>, vector<1x8x128xf32>,
    %471 = arith.index_cast %c7_i32 : i32 to index
    %c0_250 = arith.constant 0 : index
    %c512_251 = arith.constant 512 : index
    %472 = vector.load %arg8[%471, %c0_250, %c512_251] : memref<8x8x640xf32, #tpu.memory_space<vmem>>, vector<1x8x128xf32>
    %473 = vector.shape_cast %472 : vector<1x8x128xf32> to vector<8x128xf32>
    %474 = vector.shape_cast %444 : vector<8x128xf32> to vector<1x8x128xf32>
    tpu.vector_store %arg8[%471, %c0_250, %c512_251], %474 {strides = array<i32>} : memref<8x8x640xf32, #tpu.memory_space<vmem>>, vector<1x8x128xf32>,
    %c8_i32 = arith.constant 8 : i32
    return
  }
  func.func @transform_0(%arg0: i32, %arg1: i32) -> (i32, i32, i32) {
    %c0_i32 = arith.constant 0 : i32
    %c0_i32_0 = arith.constant 0 : i32
    return %arg1, %arg0, %c0_i32 : i32, i32, i32
  }
  func.func @transform_1(%arg0: i32, %arg1: i32) -> (i32, i32) {
    %c0_i32 = arith.constant 0 : i32
    %c0_i32_0 = arith.constant 0 : i32
    return %arg0, %c0_i32 : i32, i32
  }
  func.func @transform_2(%arg0: i32, %arg1: i32) -> (i32, i32) {
    %c0_i32 = arith.constant 0 : i32
    %c0_i32_0 = arith.constant 0 : i32
    %c0_i32_1 = arith.constant 0 : i32
    return %c0_i32, %c0_i32_0 : i32, i32
  }
  func.func @transform_3(%arg0: i32, %arg1: i32) -> (i32, i32) {
    %c0_i32 = arith.constant 0 : i32
    %c0_i32_0 = arith.constant 0 : i32
    %c0_i32_1 = arith.constant 0 : i32
    return %c0_i32, %c0_i32_0 : i32, i32
  }
  func.func @transform_4(%arg0: i32, %arg1: i32) -> (i32, i32) {
    %c0_i32 = arith.constant 0 : i32
    %c0_i32_0 = arith.constant 0 : i32
    %c0_i32_1 = arith.constant 0 : i32
    return %c0_i32, %c0_i32_0 : i32, i32
  }
  func.func @transform_5(%arg0: i32, %arg1: i32) -> (i32, i32) {
    %c0_i32 = arith.constant 0 : i32
    %c0_i32_0 = arith.constant 0 : i32
    %c0_i32_1 = arith.constant 0 : i32
    return %c0_i32, %c0_i32_0 : i32, i32
  }
  func.func @transform_6(%arg0: i32, %arg1: i32) -> (i32, i32, i32) {
    %c0_i32 = arith.constant 0 : i32
    %c0_i32_0 = arith.constant 0 : i32
    return %arg1, %arg0, %c0_i32 : i32, i32, i32
  }
}

</mosaic_0001>

<bundles_post_ra>
// kernel: context_gru_forward_seq.1
= control target key start
LH: loop header
LB: loop body
LE: loop exit
PB: predicated region body
PF: predicated region fallthrough
CT: control target
= control target key end

     0   :  { %vm6512_vm0 = vmmov 0   ;;  %s8871_s2 = inlined_call_operand.vmem [shape: bf16[256,512], index: 2, kind: input, shape index: {}]   ;;  %s8872_s1 = inlined_call_operand.vmem [shape: f32[8,128], index: 1, kind: input, shape index: {}]   ;;  %s8873_s0 = inlined_call_operand.vmem [shape: f32[8,8,128], index: 0, kind: input, shape index: {}]   ;;  %s8874_s4 = inlined_call_operand.vmem [shape: bf16[128,128], index: 4, kind: input, shape index: {}]   ;;  %s8875_s3 = inlined_call_operand.vmem [shape: f32[1,512], index: 3, kind: input, shape index: {}]   ;;  %s8876_s6 = inlined_call_operand.vmem [shape: f32[8,8,640], index: 6, kind: output, shape index: {}]   ;;  %s8877_s5 = inlined_call_operand.vmem [shape: f32[1,128], index: 5, kind: input, shape index: {}]  }
   0x1   :  { %v6551_v0 = vld [vmem:[%s8871_s2 + $0x4] ss:$16 sps:$4 sm:$0xff]   ;;  %v6556_v1 = vld [vmem:[%s8871_s2] ss:$16 sps:$4 sm:$0xff]   ;;  %v5982_v7 = vld [vmem:[%s8871_s2 + $0xc] ss:$16 sps:$4 sm:$0xff]  }
   0x2   :  { %442 = vmatprep.subr.bf16.mxu0 %v6551_v0  ;;  %v6562_v2 = vld [vmem:[%s8871_s2 + $0x24] ss:$16 sps:$4 sm:$0xff]   ;;  %v6568_v3 = vld [vmem:[%s8871_s2 + $0x20] ss:$16 sps:$4 sm:$0xff]   ;;  %v5984_v8 = vld [vmem:[%s8871_s2 + $0x8] ss:$16 sps:$4 sm:$0xff]   ;;  %483 = vmatprep.subr.bf16.mxu1 %v5982_v7 }
   0x3   :  { %443 = vmatpush1.bf16.msra.mxu0 %v6556_v1  ;;  %v6574_v4 = vld [vmem:[%s8871_s2 + $0x44] ss:$16 sps:$4 sm:$0xff]   ;;  %v6580_v5 = vld [vmem:[%s8871_s2 + $0x40] ss:$16 sps:$4 sm:$0xff]   ;;  %484 = vmatpush1.bf16.msra.mxu1 %v5984_v8  ;;  %v5988_v10 = vld [vmem:[%s8871_s2 + $0x2c] ss:$16 sps:$4 sm:$0xff]  }
   0x4   :  { %444 = vmatprep.subr.bf16.mxu0 %v6562_v2  ;;  %v6585_v6 = vld [vmem:[%s8871_s2 + $0x64] ss:$16 sps:$4 sm:$0xff]   ;;  %v6597_v9 = vld [vmem:[%s8871_s2 + $0x60] ss:$16 sps:$4 sm:$0xff]   ;;  %v5990_v11 = vld [vmem:[%s8871_s2 + $0x28] ss:$16 sps:$4 sm:$0xff]   ;;  %485 = vmatprep.subr.bf16.mxu1 %v5988_v10 }
   0x5   :  { %v6610_v12 = vld [vmem:[%s8871_s2 + $0x84] ss:$16 sps:$4 sm:$0xff]   ;;  %v6615_v13 = vld [vmem:[%s8871_s2 + $0x80] ss:$16 sps:$4 sm:$0xff]   ;;  %v5994_v14 = vld [vmem:[%s8871_s2 + $0x4c] ss:$16 sps:$4 sm:$0xff]  }
   0x6   :  { %v6624_v15 = vld [vmem:[%s8871_s2 + $0xa4] ss:$16 sps:$4 sm:$0xff]   ;;  %v5996_v16 = vld [vmem:[%s8871_s2 + $0x48] ss:$16 sps:$4 sm:$0xff]   ;;  %v6000_v17 = vld [vmem:[%s8871_s2 + $0x6c] ss:$16 sps:$4 sm:$0xff]  }
   0x7   :  { %445 = vmatpush1.bf16.msra.mxu0 %v6568_v3  ;;  %486 = vmatpush1.bf16.msra.mxu1 %v5990_v11  ;;  %v6636_v18 = vld [vmem:[%s8871_s2 + $0xa0] ss:$16 sps:$4 sm:$0xff]   ;;  %v6642_v19 = vld [vmem:[%s8871_s2 + $0xc4] ss:$16 sps:$4 sm:$0xff]   ;;  %v6002_v20 = vld [vmem:[%s8871_s2 + $0x68] ss:$16 sps:$4 sm:$0xff]  }
   0x8   :  { %446 = vmatprep.subr.bf16.mxu0 %v6574_v4  ;;  %487 = vmatprep.subr.bf16.mxu1 %v5994_v14  ;;  %v6006_v21 = vld [vmem:[%s8871_s2 + $0x8c] ss:$16 sps:$4 sm:$0xff]   ;;  %v6654_v22 = vld [vmem:[%s8871_s2 + $0xc0] ss:$16 sps:$4 sm:$0xff]   ;;  %v6660_v23 = vld [vmem:[%s8871_s2 + $0xe4] ss:$16 sps:$4 sm:$0xff]   ;;  %v102_v14 = vlaneseq }
   0x9   :  { %v6008_v24 = vld [vmem:[%s8871_s2 + $0x88] ss:$16 sps:$4 sm:$0xff]   ;;  %v6012_v25 = vld [vmem:[%s8871_s2 + $0xac] ss:$16 sps:$4 sm:$0xff]   ;;  %v6672_v26 = vld [vmem:[%s8871_s2 + $0xe0] ss:$16 sps:$4 sm:$0xff]  }
   0xa   :  { %v6678_v27 = vld [vmem:[%s8871_s2 + $0x104] ss:$16 sps:$4 sm:$0xff]   ;;  %v6014_v28 = vld [vmem:[%s8871_s2 + $0xa8] ss:$16 sps:$4 sm:$0xff]   ;;  %v6018_v29 = vld [vmem:[%s8871_s2 + $0xcc] ss:$16 sps:$4 sm:$0xff]  }
   0xb   :  { %447 = vmatpush1.bf16.msra.mxu0 %v6580_v5  ;;  %488 = vmatpush1.bf16.msra.mxu1 %v5996_v16  ;;  %v6690_v30 = vld [vmem:[%s8871_s2 + $0x100] ss:$16 sps:$4 sm:$0xff]   ;;  %v6696_v31 = vld [vmem:[%s8871_s2 + $0x124] ss:$16 sps:$4 sm:$0xff]   ;;  %v6020_v32 = vld [vmem:[%s8871_s2 + $0xc8] ss:$16 sps:$4 sm:$0xff]  }
   0xc   :  { %448 = vmatprep.subr.bf16.mxu0 %v6585_v6  ;;  %489 = vmatprep.subr.bf16.mxu1 %v6000_v17  ;;  %v6024_v33 = vld [vmem:[%s8871_s2 + $0xec] ss:$16 sps:$4 sm:$0xff]   ;;  %v6708_v34 = vld [vmem:[%s8871_s2 + $0x120] ss:$16 sps:$4 sm:$0xff]   ;;  %v6026_v35 = vld [vmem:[%s8871_s2 + $0xe8] ss:$16 sps:$4 sm:$0xff]  }
   0xd   :  { %v6717_v36 = vld [vmem:[%s8872_s1] sm:$0xff]  ;;  %v6030_v38 = vld [vmem:[%s8871_s2 + $0x10c] ss:$16 sps:$4 sm:$0xff]   ;;  %v6032_v41 = vld [vmem:[%s8871_s2 + $0x108] ss:$16 sps:$4 sm:$0xff]  }
   0xe   :  { %v6723_v37 = vld [vmem:[%s8871_s2 + $0x144] ss:$16 sps:$4 sm:$0xff]   ;;  %v35_v39 = vpack.c.bf16 %v6717_v36, %v6717_v36  ;;  %v6733_v40 = vld [vmem:[%s8871_s2 + $0x140] ss:$16 sps:$4 sm:$0xff]   ;;  %v6036_v43 = vld [vmem:[%s8871_s2 + $0x12c] ss:$16 sps:$4 sm:$0xff]  }
   0xf   :  { %449 = vmatpush1.bf16.msra.mxu0 %v6597_v9  ;;  %490 = vmatpush1.bf16.msra.mxu1 %v6002_v20  ;;  %v6743_v42 = vld [vmem:[%s8871_s2 + $0x164] ss:$16 sps:$4 sm:$0xff]   ;;  %v6751_v44 = vld [vmem:[%s8871_s2 + $0x160] ss:$16 sps:$4 sm:$0xff]   ;;  %v6762_v46 = vld [vmem:[%s8871_s2 + $0x128] ss:$16 sps:$4 sm:$0xff]  }
  0x10   :  { %450 = vmatprep.subr.bf16.mxu0 %v6610_v12  ;;  %491 = vmatprep.subr.bf16.mxu1 %v6006_v21  ;;  %v6756_v45 = vld [vmem:[%s8871_s2 + $0x184] ss:$16 sps:$4 sm:$0xff]   ;;  %v6767_v47 = vld [vmem:[%s8871_s2 + $0x14c] ss:$16 sps:$4 sm:$0xff]   ;;  %v6773_v48 = vld [vmem:[%s8871_s2 + $0x180] ss:$16 sps:$4 sm:$0xff]  }
  0x11   :  { %474 = vmatprep.mubr.bf16.mxu0 %v35_v39  ;;  %515 = vmatprep.mubr.bf16.mxu1 %v35_v39  ;;  %v6778_v49 = vld [vmem:[%s8871_s2 + $0x148] ss:$16 sps:$4 sm:$0xff]   ;;  %v6783_v50 = vld [vmem:[%s8871_s2 + $0x1a4] ss:$16 sps:$4 sm:$0xff]   ;;  %v6788_v51 = vld [vmem:[%s8871_s2 + $0x16c] ss:$16 sps:$4 sm:$0xff]  }
  0x12   :  { %v6797_v52 = vld [vmem:[%s8871_s2 + $0x1a0] ss:$16 sps:$4 sm:$0xff]   ;;  %v6802_v53 = vld [vmem:[%s8871_s2 + $0x168] ss:$16 sps:$4 sm:$0xff]   ;;  %v6033_v54 = vld [vmem:[%s8871_s2 + $0x1c4] ss:$16 sps:$4 sm:$0xff]  }
  0x13   :  { %451 = vmatpush1.bf16.msra.mxu0 %v6615_v13  ;;  %492 = vmatpush1.bf16.msra.mxu1 %v6008_v24  ;;  %v6810_v55 = vld [vmem:[%s8871_s2 + $0x18c] ss:$16 sps:$4 sm:$0xff]   ;;  %v6035_v56 = vld [vmem:[%s8871_s2 + $0x1c0] ss:$16 sps:$4 sm:$0xff]   ;;  %v6822_v57 = vld [vmem:[%s8871_s2 + $0x188] ss:$16 sps:$4 sm:$0xff]  }
  0x14   :  { %452 = vmatprep.subr.bf16.mxu0 %v6624_v15  ;;  %493 = vmatprep.subr.bf16.mxu1 %v6012_v25  ;;  %v6039_v58 = vld [vmem:[%s8871_s2 + $0x1e4] ss:$16 sps:$4 sm:$0xff]   ;;  %v6830_v59 = vld [vmem:[%s8871_s2 + $0x1ac] ss:$16 sps:$4 sm:$0xff]   ;;  %v6041_v60 = vld [vmem:[%s8871_s2 + $0x1e0] ss:$16 sps:$4 sm:$0xff]  }
  0x15   :  { %v30_v61 = vld [vmem:[%s8873_s0] sm:$0xff]  ;;  %v6844_v62 = vld [vmem:[%s8871_s2 + $0x1a8] ss:$16 sps:$4 sm:$0xff]   ;;  %v6849_v63 = vld [vmem:[%s8871_s2 + $0x1cc] ss:$16 sps:$4 sm:$0xff]  }
  0x16   :  { %v6856_v7 = vld [vmem:[%s8871_s2 + $0x1c8] ss:$16 sps:$4 sm:$0xff]   ;;  %v34_v8 = vpack.c.bf16 %v30_v61, %v30_v61  ;;  %v6861_v10 = vld [vmem:[%s8871_s2 + $0x1ec] ss:$16 sps:$4 sm:$0xff]   ;;  %v100_v17 = vld [vmem:[%s8875_s3] sm:$0xf] }
  0x17   :  { %453 = vmatpush1.bf16.msra.mxu0 %v6636_v18  ;;  %494 = vmatpush1.bf16.msra.mxu1 %v6014_v28  ;;  %v6868_v11 = vld [vmem:[%s8871_s2 + $0x1e8] ss:$16 sps:$4 sm:$0xff]  }
  0x18   :  { %454 = vmatprep.subr.bf16.mxu0 %v6642_v19  ;;  %495 = vmatprep.subr.bf16.mxu1 %v6018_v29 }
  0x1b   :  { %455 = vmatpush1.bf16.msra.mxu0 %v6654_v22  ;;  %496 = vmatpush1.bf16.msra.mxu1 %v6020_v32 }
  0x1c   :  { %456 = vmatprep.subr.bf16.mxu0 %v6660_v23  ;;  %497 = vmatprep.subr.bf16.mxu1 %v6024_v33 }
  0x1f   :  { %457 = vmatpush1.bf16.msra.mxu0 %v6672_v26  ;;  %498 = vmatpush1.bf16.msra.mxu1 %v6026_v35 }
  0x20   :  { %458 = vmatprep.subr.bf16.mxu0 %v6678_v27  ;;  %499 = vmatprep.subr.bf16.mxu1 %v6030_v38 }
  0x23   :  { %459 = vmatpush1.bf16.msra.mxu0 %v6690_v30  ;;  %500 = vmatpush1.bf16.msra.mxu1 %v6032_v41 }
  0x24   :  { %460 = vmatprep.subr.bf16.mxu0 %v6696_v31  ;;  %501 = vmatprep.subr.bf16.mxu1 %v6036_v43 }
  0x27   :  { %461 = vmatpush1.bf16.msra.mxu0 %v6708_v34  ;;  %502 = vmatpush1.bf16.msra.mxu1 %v6762_v46 }
  0x28   :  { %462 = vmatprep.subr.bf16.mxu0 %v6723_v37  ;;  %503 = vmatprep.subr.bf16.mxu1 %v6767_v47 }
  0x2b   :  { %463 = vmatpush1.bf16.msra.mxu0 %v6733_v40  ;;  %504 = vmatpush1.bf16.msra.mxu1 %v6778_v49 }
  0x2c   :  { %464 = vmatprep.subr.bf16.mxu0 %v6743_v42  ;;  %505 = vmatprep.subr.bf16.mxu1 %v6788_v51 }
  0x2f   :  { %465 = vmatpush1.bf16.msra.mxu0 %v6751_v44  ;;  %506 = vmatpush1.bf16.msra.mxu1 %v6802_v53 }
  0x30   :  { %466 = vmatprep.subr.bf16.mxu0 %v6756_v45  ;;  %507 = vmatprep.subr.bf16.mxu1 %v6810_v55 }
  0x33   :  { %467 = vmatpush1.bf16.msra.mxu0 %v6773_v48  ;;  %508 = vmatpush1.bf16.msra.mxu1 %v6822_v57 }
  0x34   :  { %468 = vmatprep.subr.bf16.mxu0 %v6783_v50  ;;  %509 = vmatprep.subr.bf16.mxu1 %v6830_v59 }
  0x37   :  { %469 = vmatpush1.bf16.msra.mxu0 %v6797_v52  ;;  %510 = vmatpush1.bf16.msra.mxu1 %v6844_v62 }
  0x38   :  { %470 = vmatprep.subr.bf16.mxu0 %v6033_v54  ;;  %511 = vmatprep.subr.bf16.mxu1 %v6849_v63 }
  0x3b   :  { %471 = vmatpush1.bf16.msra.mxu0 %v6035_v56  ;;  %512 = vmatpush1.bf16.msra.mxu1 %v6856_v7 }
  0x3c   :  { %472 = vmatprep.subr.bf16.mxu0 %v6039_v58  ;;  %513 = vmatprep.subr.bf16.mxu1 %v6861_v10 }
  0x3f   :  { %473 = vmatpush1.bf16.msra.mxu0 %v6041_v60  ;;  %514 = vmatpush1.bf16.msra.mxu1 %v6868_v11 }
  0x40   :  { %1073 = vmatprep.subr.bf16.mxu1 %v6551_v0  ;;  %v6060_v0 = vld [vmem:[%s8874_s4] sm:$0xff]  }
  0x42   :  { %475 = vmatmul.mubr.bf16.vlgmr.msra.gmra.mrb[0].mxu0 %v34_v8  ;;  %516 = vmatmul.mubr.bf16.vlgmr.msra.gmra.mrb[0].mxu1 %v34_v8 }
  0x43   :  { %1074 = vmatpush1.bf16.msra.mxu1 %v6556_v1  ;;  %v8878_v1 = vmov 0.0  }
  0x44   :  { %1075 = vmatprep.subr.bf16.mxu1 %v6562_v2  ;;  %5802 = vmatprep.subr.bf16.mxu0 %v8878_v1  ;;  %v6061_v2 = vld [vmem:[%s8874_s4 + $0x8] sm:$0xff]  }
  0x45   :  { %5803 = vmatpush3.bf16.msra.mxu0 %v6060_v0  ;;  %5818 = vmatprep.mubr.msk.bf16.mxu0 %vm6512_vm0, %v8878_v1  ;;  %v6494_v0 = vld [vmem:[%s8871_s2 + $0x2c] ss:$16 sps:$4 sm:$0xff]  }
  0x46   :  { %5804 = vmatprep.subr.bf16.mxu0 %v8878_v1 }
  0x47   :  { %1076 = vmatpush1.bf16.msra.mxu1 %v6568_v3  ;;  %v6062_v3 = vld [vmem:[%s8874_s4 + $0x10] sm:$0xff]  }
  0x48   :  { %1077 = vmatprep.subr.bf16.mxu1 %v6574_v4  ;;  %v6063_v4 = vld [vmem:[%s8874_s4 + $0x18] sm:$0xff]  }
  0x49   :  { %5805 = vmatpush3.bf16.msra.mxu0 %v6061_v2  ;;  %v6495_v2 = vld [vmem:[%s8871_s2 + $0x28] ss:$16 sps:$4 sm:$0xff]  }
  0x4a   :  { %5806 = vmatprep.subr.bf16.mxu0 %v8878_v1 }
  0x4b   :  { %1078 = vmatpush1.bf16.msra.mxu1 %v6580_v5  ;;  %v6064_v5 = vld [vmem:[%s8874_s4 + $0x20] sm:$0xff]  }
  0x4c   :  { %1079 = vmatprep.subr.bf16.mxu1 %v6585_v6  ;;  %v6065_v6 = vld [vmem:[%s8874_s4 + $0x28] sm:$0xff]  }
  0x4d   :  { %5807 = vmatpush3.bf16.msra.mxu0 %v6062_v3  ;;  %v6496_v3 = vld [vmem:[%s8871_s2 + $0x4c] ss:$16 sps:$4 sm:$0xff]  }
  0x4e   :  { %5808 = vmatprep.subr.bf16.mxu0 %v8878_v1 }
  0x4f   :  { %1080 = vmatpush1.bf16.msra.mxu1 %v6597_v9  ;;  %v6066_v9 = vld [vmem:[%s8874_s4 + $0x30] sm:$0xff]  }
  0x50   :  { %1081 = vmatprep.subr.bf16.mxu1 %v6610_v12  ;;  %v6067_v12 = vld [vmem:[%s8874_s4 + $0x38] sm:$0xff]  }
  0x51   :  { %5809 = vmatpush3.bf16.msra.mxu0 %v6063_v4  ;;  %v6497_v4 = vld [vmem:[%s8871_s2 + $0x48] ss:$16 sps:$4 sm:$0xff]  }
  0x52   :  { %5810 = vmatprep.subr.bf16.mxu0 %v8878_v1 }
  0x53   :  { %1082 = vmatpush1.bf16.msra.mxu1 %v6615_v13  ;;  %v6492_v13 = vld [vmem:[%s8871_s2 + $0xc] ss:$16 sps:$4 sm:$0xff]  }
  0x54   :  { %1083 = vmatprep.subr.bf16.mxu1 %v6624_v15  ;;  %v103_v15 = vshrl.u32 %v102_v14, 7  ;;  %v6503_v14 = vld [vmem:[%s8871_s2 + $0xa8] ss:$16 sps:$4 sm:$0xff]  }
  0x55   :  { %5811 = vmatpush3.bf16.msra.mxu0 %v6064_v5  ;;  %v6498_v5 = vld [vmem:[%s8871_s2 + $0x6c] ss:$16 sps:$4 sm:$0xff]  }
  0x56   :  { %5812 = vmatprep.subr.bf16.mxu0 %v8878_v1  ;;  %v6939_v16 = vsub.s32 0, %v103_v15  ;;  %v6948_v38 = vsub.s32 3, %v103_v15  ;;  %v6950_v39 = vsub.s32 2, %v103_v15 }
  0x57   :  { %1084 = vmatpush1.bf16.msra.mxu1 %v6636_v18  ;;  %v6944_v18 = vsub.s32 1, %v103_v15  ;;  %v6504_v15 = vld [vmem:[%s8871_s2 + $0xcc] ss:$16 sps:$4 sm:$0xff]  }
  0x58   :  { %1085 = vmatprep.subr.bf16.mxu1 %v6642_v19  ;;  %v105_v19 = vrot.slane %v100_v17, %v6939_v16  ;;  %v113_v41 = vrot.slane %v100_v17, %v6950_v39 }
  0x59   :  { %5813 = vmatpush3.bf16.msra.mxu0 %v6065_v6  ;;  %v109_v20 = vrot.slane %v100_v17, %v6944_v18  ;;  %v6499_v6 = vld [vmem:[%s8871_s2 + $0x68] ss:$16 sps:$4 sm:$0xff]  }
  0x5a   :  { %5814 = vmatprep.subr.bf16.mxu0 %v8878_v1 }
  0x5b   :  { %1086 = vmatpush1.bf16.msra.mxu1 %v6654_v22 }
  0x5c   :  { %1087 = vmatprep.subr.bf16.mxu1 %v6660_v23 }
  0x5d   :  { %5815 = vmatpush3.bf16.msra.mxu0 %v6066_v9  ;;  %v6500_v9 = vld [vmem:[%s8871_s2 + $0x8c] ss:$16 sps:$4 sm:$0xff]  }
  0x5e   :  { %5816 = vmatprep.subr.bf16.mxu0 %v8878_v1 }
  0x5f   :  { %1088 = vmatpush1.bf16.msra.mxu1 %v6672_v26 }
  0x60   :  { %1089 = vmatprep.subr.bf16.mxu1 %v6678_v27 }
  0x61   :  { %5817 = vmatpush3.bf16.msra.mxu0 %v6067_v12  ;;  %v6501_v12 = vld [vmem:[%s8871_s2 + $0x88] ss:$16 sps:$4 sm:$0xff]  }
  0x62   :  { %1114 = vmatprep.subr.bf16.mxu0 %v6492_v13  ;;  %v6502_v13 = vld [vmem:[%s8871_s2 + $0xac] ss:$16 sps:$4 sm:$0xff]  }
  0x63   :  { %1090 = vmatpush1.bf16.msra.mxu1 %v6690_v30 }
  0x64   :  { %1091 = vmatprep.subr.bf16.mxu1 %v6696_v31 }
  0x67   :  { %1092 = vmatpush1.bf16.msra.mxu1 %v6708_v34 }
  0x68   :  { %1093 = vmatprep.subr.bf16.mxu1 %v6723_v37 }
  0x6b   :  { %1094 = vmatpush1.bf16.msra.mxu1 %v6733_v40  ;;  %v117_v40 = vrot.slane %v100_v17, %v6948_v38  ;;  %v6505_v17 = vld [vmem:[%s8871_s2 + $0xc8] ss:$16 sps:$4 sm:$0xff]  }
  0x6c   :  { %1095 = vmatprep.subr.bf16.mxu1 %v6743_v42 }
  0x6f   :  { %1096 = vmatpush1.bf16.msra.mxu1 %v6751_v44 }
  0x70   :  { %1097 = vmatprep.subr.bf16.mxu1 %v6756_v45 }
  0x73   :  { %1098 = vmatpush1.bf16.msra.mxu1 %v6773_v48 }
  0x74   :  { %1099 = vmatprep.subr.bf16.mxu1 %v6783_v50 }
  0x77   :  { %1100 = vmatpush1.bf16.msra.mxu1 %v6797_v52 }
  0x78   :  { %1101 = vmatprep.subr.bf16.mxu1 %v6033_v54 }
  0x7b   :  { %1102 = vmatpush1.bf16.msra.mxu1 %v6035_v56 }
  0x7c   :  { %1103 = vmatprep.subr.bf16.mxu1 %v6039_v58  ;;  %v5163_v58 = vld [vmem:[%s8873_s0 + $0x8] sm:$0xff] }
  0x7d   :  { %v665_v8 = vpack.c.bf16 %v5163_v58, %v5163_v58  ;;  %v7252_v58 = vld [vmem:[%s8871_s2 + $0x1c0] ss:$16 sps:$4 sm:$0xff]  }
  0x7f   :  { %1104 = vmatpush1.bf16.msra.mxu1 %v6041_v60 }
  0x80   :  { %5822 = vmatprep.subr.bf16.mxu1 %v8878_v1 }
 0x115   :  { %v476_v21 = vpop.f32.mrb[0].mxu0  ;;  %v517_v29 = vpop.f32.mrb[0].mxu1 }
 0x116   :  { %v477_v22 = vadd.f32 %v476_v21, %v105_v19  ;;  %v478_v23 = vpop.f32.mrb[1].mxu0  ;;  %v519_v30 = vpop.f32.mrb[1].mxu1  ;;  %v518_v45 = vadd.f32 %v517_v29, %v113_v41  ;;  %v6506_v19 = vld [vmem:[%s8871_s2 + $0xec] ss:$16 sps:$4 sm:$0xff]   ;;  %v6092_v29 = vld [vmem:[%s8874_s4 + $0x30] sm:$0xff]  }
 0x117   :  { %v479_v24 = vadd.f32 %v478_v23, %v109_v20  ;;  %v480_v25 = vpop.f32.mrb[2].mxu0  ;;  %v521_v31 = vpop.f32.mrb[2].mxu1  ;;  %v520_v42 = vadd.f32 %v519_v30, %v117_v40  ;;  %v6507_v20 = vld [vmem:[%s8871_s2 + $0xe8] ss:$16 sps:$4 sm:$0xff]   ;;  %v6508_v21 = vld [vmem:[%s8871_s2 + $0x10c] ss:$16 sps:$4 sm:$0xff]  }
 0x118   :  { %v5152_v26 = vmul.f32 -1.442695, %v477_v22  ;;  %v481_v27 = vpop.f32.mrb[3].mxu0  ;;  %v522_v32 = vpop.f32.mrb[3].mxu1  ;;  %v6509_v22 = vld [vmem:[%s8871_s2 + $0x108] ss:$16 sps:$4 sm:$0xff]  }
 0x119   :  { %v5153_v28 = vmul.f32 -1.442695, %v479_v24  ;;  %v6510_v23 = vld [vmem:[%s8871_s2 + $0x12c] ss:$16 sps:$4 sm:$0xff]   ;;  %v7115_v24 = vld [vmem:[%s8871_s2 + $0x84] ss:$16 sps:$4 sm:$0xff]  }
 0x11a   :  { %6412 = vpow2.f32 %v5152_v26  ;;  %v7120_v25 = vld [vmem:[%s8871_s2 + $0x80] ss:$16 sps:$4 sm:$0xff]   ;;  %v6088_v26 = vld [vmem:[%s8874_s4 + $0x28] sm:$0xff]   ;;  %v7131_v27 = vld [vmem:[%s8871_s2 + $0xa4] ss:$16 sps:$4 sm:$0xff]  }
 0x11b   :  { %6414 = vpow2.f32 %v5153_v28  ;;  %v7136_v28 = vld [vmem:[%s8871_s2 + $0xa0] ss:$16 sps:$4 sm:$0xff]   ;;  %v7151_v31 = vld [vmem:[%s8871_s2 + $0xc4] ss:$16 sps:$4 sm:$0xff]   ;;  %v6096_v32 = vld [vmem:[%s8874_s4 + $0x38] sm:$0xff]  }
 0x11c   :  { %v7146_v30 = vld [vmem:[%s8871_s2 + $0xc0] ss:$16 sps:$4 sm:$0xff]   ;;  %v7185_v40 = vld [vmem:[%s8871_s2 + $0x104] ss:$16 sps:$4 sm:$0xff]  }
 0x11d   :  { %v7192_v41 = vld [vmem:[%s8871_s2 + $0x120] ss:$16 sps:$4 sm:$0xff]  }
 0x124   :  { %v6413_v33 = vpop.eup %6412 }
 0x125   :  { %v6415_v34 = vpop.eup %6414  ;;  %v527_v35 = vadd.f32 1.0, %v6413_v33  ;;  %v7160_v33 = vld [vmem:[%s8871_s2 + $0xe4] ss:$16 sps:$4 sm:$0xff]  }
 0x126   :  { %v533_v37 = vadd.f32 1.0, %v6415_v34  ;;  %v7166_v34 = vld [vmem:[%s8871_s2 + $0xc] ss:$16 sps:$4 sm:$0xff]  }
 0x127   :  { %6416 = vrcp.f32 %v527_v35  ;;  %v7172_v35 = vld [vmem:[%s8871_s2 + $0xe0] ss:$16 sps:$4 sm:$0xff]  }
 0x128   :  { %6418 = vrcp.f32 %v533_v37  ;;  %v7180_v37 = vld [vmem:[%s8871_s2 + $0x100] ss:$16 sps:$4 sm:$0xff]  }
 0x131   :  { %v6417_v43 = vpop.eup %6416 }
 0x132   :  { %v6419_v44 = vpop.eup %6418  ;;  %657 = vst [vmem:[%s8876_s6 + $0x10] sm:$0xff] %v6417_v43  ;;  %v536_v48 = vmul.f32 %v6417_v43, %v520_v42  ;;  %v7197_v42 = vld [vmem:[%s8871_s2 + $0x124] ss:$16 sps:$4 sm:$0xff]   ;;  %v7204_v43 = vld [vmem:[%s8871_s2 + $0x140] ss:$16 sps:$4 sm:$0xff]  }
 0x133   :  { %658 = vst [vmem:[%s8876_s6 + $0x18] sm:$0xff] %v6419_v44 }
 0x134   :  { %v537_v50 = vadd.f32 %v536_v48, %v518_v45  ;;  %v7216_v45 = vld [vmem:[%s8871_s2 + $0x160] ss:$16 sps:$4 sm:$0xff]   ;;  %v7221_v48 = vld [vmem:[%s8871_s2 + $0x164] ss:$16 sps:$4 sm:$0xff]  }
 0x136   :  { %6420 = vtanh.f32 %v537_v50  ;;  %v7228_v50 = vld [vmem:[%s8871_s2 + $0x180] ss:$16 sps:$4 sm:$0xff]  }
 0x140   :  { %v6421_v52 = vpop.eup %6420 }
 0x141   :  { %659 = vst [vmem:[%s8876_s6 + $0x20] sm:$0xff] %v6421_v52  ;;  %v539_v54 = vsub.f32 %v6717_v36, %v6421_v52  ;;  %v6493_v36 = vld [vmem:[%s8871_s2 + $0x8] ss:$16 sps:$4 sm:$0xff]  }
 0x143   :  { %v540_v56 = vmul.f32 %v6419_v44, %v539_v54  ;;  %v7209_v44 = vld [vmem:[%s8871_s2 + $0x144] ss:$16 sps:$4 sm:$0xff]   ;;  %v7240_v54 = vld [vmem:[%s8871_s2 + $0x1a0] ss:$16 sps:$4 sm:$0xff]  }
 0x145   :  { %v6967_v60 = vadd.f32 %v6421_v52, %v540_v56  ;;  %v7233_v52 = vld [vmem:[%s8871_s2 + $0x184] ss:$16 sps:$4 sm:$0xff]  }
 0x146   :  { %v7245_v56 = vld [vmem:[%s8871_s2 + $0x1a4] ss:$16 sps:$4 sm:$0xff]  }
 0x147   :  { %v542_v61 = vpack.c.bf16 %v6967_v60, %v6967_v60  ;;  %656 = vst [vmem:[%s8876_s6 + $0x8] sm:$0xff] %v6967_v60 }
 0x149   :  { %5819 = vmatmul.mubr.bf16.vlgmr.msra.gmra.mrb[4].mxu0 %v542_v61  ;;  %1105 = vmatprep.mubr.bf16.mxu1 %v542_v61 }
 0x14a   :  { %1115 = vmatpush1.bf16.msra.mxu0 %v6493_v36  ;;  %1146 = vmatprep.mubr.bf16.mxu0 %v542_v61  ;;  %v7257_v61 = vld [vmem:[%s8871_s2 + $0x1c4] ss:$16 sps:$4 sm:$0xff]  }
 0x14b   :  { %1116 = vmatprep.subr.bf16.mxu0 %v6494_v0  ;;  %1106 = vmatmul.mubr.bf16.vlgmr.msra.gmra.mrb[4].mxu1 %v665_v8  ;;  %v7269_v36 = vld [vmem:[%s8871_s2 + $0x1e4] ss:$16 sps:$4 sm:$0xff]   ;;  %v731_v0 = vld [vmem:[%s8875_s3] sm:$0xf] }
 0x14c   :  { %5838 = vmatprep.mubr.msk.bf16.mxu1 %vm6512_vm0, %v8878_v1 }
 0x14e   :  { %1117 = vmatpush1.bf16.msra.mxu0 %v6495_v2  ;;  %v7280_v2 = vld [vmem:[%s8877_s5] ss:$0 sm:$0xff] }
 0x14f   :  { %1118 = vmatprep.subr.bf16.mxu0 %v6496_v3  ;;  %v736_v3 = vrot.slane %v731_v0, %v6939_v16 }
 0x152   :  { %1119 = vmatpush1.bf16.msra.mxu0 %v6497_v4 }
 0x153   :  { %1120 = vmatprep.subr.bf16.mxu0 %v6498_v5  ;;  %v740_v5 = vrot.slane %v731_v0, %v6944_v18 }
 0x156   :  { %1121 = vmatpush1.bf16.msra.mxu0 %v6499_v6 }
 0x157   :  { %1122 = vmatprep.subr.bf16.mxu0 %v6500_v9 }
 0x15a   :  { %1123 = vmatpush1.bf16.msra.mxu0 %v6501_v12 }
 0x15b   :  { %1124 = vmatprep.subr.bf16.mxu0 %v6502_v13 }
 0x15e   :  { %1125 = vmatpush1.bf16.msra.mxu0 %v6503_v14 }
 0x15f   :  { %1126 = vmatprep.subr.bf16.mxu0 %v6504_v15 }
 0x162   :  { %1127 = vmatpush1.bf16.msra.mxu0 %v6505_v17 }
 0x163   :  { %1128 = vmatprep.subr.bf16.mxu0 %v6506_v19 }
 0x166   :  { %1129 = vmatpush1.bf16.msra.mxu0 %v6507_v20 }
 0x167   :  { %1130 = vmatprep.subr.bf16.mxu0 %v6508_v21 }
 0x16a   :  { %1131 = vmatpush1.bf16.msra.mxu0 %v6509_v22 }
 0x16b   :  { %1132 = vmatprep.subr.bf16.mxu0 %v6510_v23 }
 0x16e   :  { %1133 = vmatpush1.bf16.msra.mxu0 %v6762_v46  ;;  %v6068_v46 = vld [vmem:[%s8874_s4] sm:$0xff]  }
 0x16f   :  { %1134 = vmatprep.subr.bf16.mxu0 %v6767_v47  ;;  %v7050_v47 = vld [vmem:[%s8871_s2] ss:$16 sps:$4 sm:$0xff]   ;;  %5823 = vmatpush3.bf16.msra.mxu1 %v6068_v46 }
 0x170   :  { %5824 = vmatprep.subr.bf16.mxu1 %v8878_v1 }
 0x172   :  { %1135 = vmatpush1.bf16.msra.mxu0 %v6778_v49  ;;  %v7055_v49 = vld [vmem:[%s8871_s2 + $0x4] ss:$16 sps:$4 sm:$0xff]  }
 0x173   :  { %1136 = vmatprep.subr.bf16.mxu0 %v6788_v51  ;;  %v6072_v51 = vld [vmem:[%s8874_s4 + $0x8] sm:$0xff]  }
 0x174   :  { %5825 = vmatpush3.bf16.msra.mxu1 %v6072_v51 }
 0x175   :  { %5826 = vmatprep.subr.bf16.mxu1 %v8878_v1 }
 0x176   :  { %1137 = vmatpush1.bf16.msra.mxu0 %v6802_v53  ;;  %v7067_v53 = vld [vmem:[%s8871_s2 + $0x24] ss:$16 sps:$4 sm:$0xff]  }
 0x177   :  { %1138 = vmatprep.subr.bf16.mxu0 %v6810_v55  ;;  %v7072_v55 = vld [vmem:[%s8871_s2 + $0x20] ss:$16 sps:$4 sm:$0xff]  }
 0x17a   :  { %1139 = vmatpush1.bf16.msra.mxu0 %v6822_v57  ;;  %v6076_v57 = vld [vmem:[%s8874_s4 + $0x10] sm:$0xff]  }
 0x17b   :  { %1140 = vmatprep.subr.bf16.mxu0 %v6830_v59  ;;  %5827 = vmatpush3.bf16.msra.mxu1 %v6076_v57  ;;  %v7083_v59 = vld [vmem:[%s8871_s2 + $0x44] ss:$16 sps:$4 sm:$0xff]  }
 0x17c   :  { %5828 = vmatprep.subr.bf16.mxu1 %v8878_v1 }
 0x17e   :  { %1141 = vmatpush1.bf16.msra.mxu0 %v6844_v62  ;;  %v7088_v62 = vld [vmem:[%s8871_s2 + $0x40] ss:$16 sps:$4 sm:$0xff]  }
 0x17f   :  { %1142 = vmatprep.subr.bf16.mxu0 %v6849_v63  ;;  %v6080_v63 = vld [vmem:[%s8874_s4 + $0x18] sm:$0xff]  }
 0x180   :  { %5829 = vmatpush3.bf16.msra.mxu1 %v6080_v63 }
 0x181   :  { %5830 = vmatprep.subr.bf16.mxu1 %v8878_v1 }
 0x182   :  { %1143 = vmatpush1.bf16.msra.mxu0 %v6856_v7  ;;  %v7099_v7 = vld [vmem:[%s8871_s2 + $0x64] ss:$16 sps:$4 sm:$0xff]  }
 0x183   :  { %1144 = vmatprep.subr.bf16.mxu0 %v6861_v10  ;;  %v7104_v10 = vld [vmem:[%s8871_s2 + $0x60] ss:$16 sps:$4 sm:$0xff]  }
 0x186   :  { %1145 = vmatpush1.bf16.msra.mxu0 %v6868_v11  ;;  %v6084_v11 = vld [vmem:[%s8874_s4 + $0x20] sm:$0xff]  }
 0x187   :  { %1705 = vmatprep.subr.bf16.mxu0 %v7055_v49  ;;  %5831 = vmatpush3.bf16.msra.mxu1 %v6084_v11 }
 0x188   :  { %5832 = vmatprep.subr.bf16.mxu1 %v8878_v1 }
 0x189   :  { %1147 = vmatmul.mubr.bf16.vlgmr.msra.gmra.mrb[8].mxu0 %v665_v8  ;;  %v7264_v8 = vld [vmem:[%s8871_s2 + $0x1e0] ss:$16 sps:$4 sm:$0xff]  }
 0x18a   :  { %1706 = vmatpush1.bf16.msra.mxu0 %v7050_v47 }
 0x18b   :  { %1707 = vmatprep.subr.bf16.mxu0 %v7067_v53  ;;  %5833 = vmatpush3.bf16.msra.mxu1 %v6088_v26 }
 0x18c   :  { %5834 = vmatprep.subr.bf16.mxu1 %v8878_v1 }
 0x18e   :  { %1708 = vmatpush1.bf16.msra.mxu0 %v7072_v55 }
 0x18f   :  { %1709 = vmatprep.subr.bf16.mxu0 %v7083_v59  ;;  %5835 = vmatpush3.bf16.msra.mxu1 %v6092_v29  ;;  %v744_v29 = vrot.slane %v731_v0, %v6950_v39 }
 0x190   :  { %5836 = vmatprep.subr.bf16.mxu1 %v8878_v1 }
 0x192   :  { %1710 = vmatpush1.bf16.msra.mxu0 %v7088_v62 }
 0x193   :  { %1711 = vmatprep.subr.bf16.mxu0 %v7099_v7  ;;  %5837 = vmatpush3.bf16.msra.mxu1 %v6096_v32  ;;  %v748_v32 = vrot.slane %v731_v0, %v6948_v38  ;;  %v5244_v0 = vld [vmem:[%s8873_s0 + $0x10] sm:$0xff] }
 0x194   :  { %1746 = vmatprep.subr.bf16.mxu1 %v7166_v34 }
 0x196   :  { %1712 = vmatpush1.bf16.msra.mxu0 %v7104_v10 }
 0x197   :  { %1713 = vmatprep.subr.bf16.mxu0 %v7115_v24 }
 0x19a   :  { %1714 = vmatpush1.bf16.msra.mxu0 %v7120_v25 }
 0x19b   :  { %1715 = vmatprep.subr.bf16.mxu0 %v7131_v27 }
 0x19e   :  { %1716 = vmatpush1.bf16.msra.mxu0 %v7136_v28 }
 0x19f   :  { %1717 = vmatprep.subr.bf16.mxu0 %v7151_v31 }
 0x1a2   :  { %1718 = vmatpush1.bf16.msra.mxu0 %v7146_v30 }
 0x1a3   :  { %1719 = vmatprep.subr.bf16.mxu0 %v7160_v33 }
 0x1a6   :  { %1720 = vmatpush1.bf16.msra.mxu0 %v7172_v35 }
 0x1a7   :  { %1721 = vmatprep.subr.bf16.mxu0 %v7185_v40 }
 0x1aa   :  { %1722 = vmatpush1.bf16.msra.mxu0 %v7180_v37 }
 0x1ab   :  { %1723 = vmatprep.subr.bf16.mxu0 %v7197_v42 }
 0x1ae   :  { %1724 = vmatpush1.bf16.msra.mxu0 %v7192_v41 }
 0x1af   :  { %1725 = vmatprep.subr.bf16.mxu0 %v7209_v44 }
 0x1b2   :  { %1726 = vmatpush1.bf16.msra.mxu0 %v7204_v43 }
 0x1b3   :  { %1727 = vmatprep.subr.bf16.mxu0 %v7221_v48 }
 0x1b6   :  { %1728 = vmatpush1.bf16.msra.mxu0 %v7216_v45 }
 0x1b7   :  { %1729 = vmatprep.subr.bf16.mxu0 %v7233_v52 }
 0x1ba   :  { %1730 = vmatpush1.bf16.msra.mxu0 %v7228_v50 }
 0x1bb   :  { %1731 = vmatprep.subr.bf16.mxu0 %v7245_v56 }
 0x1be   :  { %1732 = vmatpush1.bf16.msra.mxu0 %v7240_v54 }
 0x1bf   :  { %1733 = vmatprep.subr.bf16.mxu0 %v7257_v61 }
 0x1c2   :  { %1734 = vmatpush1.bf16.msra.mxu0 %v7252_v58 }
 0x1c3   :  { %1735 = vmatprep.subr.bf16.mxu0 %v7269_v36 }
 0x1c6   :  { %1736 = vmatpush1.bf16.msra.mxu0 %v7264_v8 }
 0x1c7   :  { %5842 = vmatprep.subr.bf16.mxu0 %v8878_v1 }
 0x21c   :  { %v648_v4 = vpop.f32.mrb[4].mxu0 }
 0x21d   :  { %v649_v6 = vadd.f32 %v7280_v2, %v648_v4  ;;  %v5820_v9 = vpop.f32.mrb[5].mxu0 }
 0x21e   :  { %v651_v12 = vpop.f32.mrb[6].mxu0  ;;  %v1107_v13 = vpop.f32.mrb[4].mxu1 }
 0x21f   :  { %655 = vst [vmem:[%s8876_s6] sm:$0xff] %v649_v6  ;;  %v5821_v14 = vpop.f32.mrb[7].mxu0  ;;  %v1108_v15 = vadd.f32 %v1107_v13, %v736_v3  ;;  %v1109_v17 = vpop.f32.mrb[5].mxu1 }
 0x220   :  { %v1110_v19 = vadd.f32 %v1109_v17, %v740_v5  ;;  %v1111_v20 = vpop.f32.mrb[6].mxu1 }
 0x221   :  { %v5228_v21 = vmul.f32 -1.442695, %v1108_v15  ;;  %v1112_v22 = vpop.f32.mrb[7].mxu1 }
 0x222   :  { %v5229_v23 = vmul.f32 -1.442695, %v1110_v19 }
 0x223   :  { %6422 = vpow2.f32 %v5228_v21  ;;  %v7308_v21 = vld [vmem:[%s8871_s2 + $0x8] ss:$16 sps:$4 sm:$0xff]  }
 0x224   :  { %6424 = vpow2.f32 %v5229_v23  ;;  %v7321_v23 = vpack.c.bf16 %v5244_v0, %v5244_v0  ;;  %v7444_v0 = vld [vmem:[%s8871_s2 + $0x16c] ss:$16 sps:$4 sm:$0xff]  }
 0x225   :  { %8905 = vst [vmem:[#allocation5_spill] sm:$0xff] %v7444_v0 }
 0x22d   :  { %v6423_v46 = vpop.eup %6422 }
 0x22e   :  { %v6425_v51 = vpop.eup %6424  ;;  %v1158_v57 = vadd.f32 1.0, %v6423_v46  ;;  %v7327_v46 = vld [vmem:[%s8871_s2 + $0x28] ss:$16 sps:$4 sm:$0xff]  }
 0x22f   :  { %v1164_v63 = vadd.f32 1.0, %v6425_v51  ;;  %v7333_v51 = vld [vmem:[%s8871_s2 + $0x4c] ss:$16 sps:$4 sm:$0xff]  }
 0x230   :  { %6426 = vrcp.f32 %v1158_v57  ;;  %v7342_v57 = vld [vmem:[%s8871_s2 + $0x48] ss:$16 sps:$4 sm:$0xff]  }
 0x231   :  { %6428 = vrcp.f32 %v1164_v63  ;;  %v7348_v63 = vld [vmem:[%s8871_s2 + $0x6c] ss:$16 sps:$4 sm:$0xff]  }
 0x23a   :  { %v6427_v11 = vpop.eup %6426 }
 0x23b   :  { %v6429_v26 = vpop.eup %6428  ;;  %5241 = vst [vmem:[%s8876_s6 + $0x38] sm:$0xff] %v6427_v11 }
 0x23c   :  { %5242 = vst [vmem:[%s8876_s6 + $0x40] sm:$0xff] %v6429_v26 }
 0x25c   :  { %v1148_v3 = vpop.f32.mrb[8].mxu0 }
 0x25d   :  { %v1149_v4 = vadd.f32 %v1148_v3, %v744_v29  ;;  %v1150_v5 = vpop.f32.mrb[9].mxu0  ;;  %v7366_v29 = vld [vmem:[%s8871_s2 + $0x88] ss:$16 sps:$4 sm:$0xff]  }
 0x25e   :  { %v1151_v6 = vadd.f32 %v1150_v5, %v748_v32  ;;  %v1152_v9 = vpop.f32.mrb[10].mxu0  ;;  %v7372_v32 = vld [vmem:[%s8871_s2 + $0xac] ss:$16 sps:$4 sm:$0xff]   ;;  %v7378_v3 = vld [vmem:[%s8871_s2 + $0xa8] ss:$16 sps:$4 sm:$0xff]  }
 0x25f   :  { %v1153_v12 = vpop.f32.mrb[11].mxu0  ;;  %v7390_v5 = vld [vmem:[%s8871_s2 + $0xc8] ss:$16 sps:$4 sm:$0xff]  }
 0x260   :  { %v1167_v13 = vmul.f32 %v6427_v11, %v1151_v6  ;;  %v7354_v11 = vld [vmem:[%s8871_s2 + $0x68] ss:$16 sps:$4 sm:$0xff]   ;;  %v7396_v6 = vld [vmem:[%s8871_s2 + $0xec] ss:$16 sps:$4 sm:$0xff]  }
 0x261   :  { %v7402_v9 = vld [vmem:[%s8871_s2 + $0xe8] ss:$16 sps:$4 sm:$0xff]   ;;  %v7408_v12 = vld [vmem:[%s8871_s2 + $0x10c] ss:$16 sps:$4 sm:$0xff]  }
 0x262   :  { %v1168_v14 = vadd.f32 %v1167_v13, %v1149_v4  ;;  %v7384_v4 = vld [vmem:[%s8871_s2 + $0xcc] ss:$16 sps:$4 sm:$0xff]   ;;  %v7414_v13 = vld [vmem:[%s8871_s2 + $0x108] ss:$16 sps:$4 sm:$0xff]  }
 0x264   :  { %6430 = vtanh.f32 %v1168_v14  ;;  %v7420_v14 = vld [vmem:[%s8871_s2 + $0x12c] ss:$16 sps:$4 sm:$0xff]  }
 0x26e   :  { %v6431_v15 = vpop.eup %6430 }
 0x26f   :  { %5243 = vst [vmem:[%s8876_s6 + $0x48] sm:$0xff] %v6431_v15  ;;  %v1170_v17 = vsub.f32 %v6967_v60, %v6431_v15  ;;  %v7319_v60 = vld [vmem:[%s8871_s2 + $0x2c] ss:$16 sps:$4 sm:$0xff]  }
 0x271   :  { %v1171_v19 = vmul.f32 %v6429_v26, %v1170_v17  ;;  %v7360_v26 = vld [vmem:[%s8871_s2 + $0x8c] ss:$16 sps:$4 sm:$0xff]  }
 0x272   :  { %v7432_v17 = vld [vmem:[%s8871_s2 + $0x14c] ss:$16 sps:$4 sm:$0xff]  }
 0x273   :  { %v7303_v20 = vadd.f32 %v6431_v15, %v1171_v19  ;;  %v7426_v15 = vld [vmem:[%s8871_s2 + $0x128] ss:$16 sps:$4 sm:$0xff]   ;;  %8903 = vst [vmem:[#allocation3_spill] sm:$0xff] %v7432_v17 }
 0x274   :  { %v7438_v19 = vld [vmem:[%s8871_s2 + $0x148] ss:$16 sps:$4 sm:$0xff]  }
 0x275   :  { %v1173_v22 = vpack.c.bf16 %v7303_v20, %v7303_v20  ;;  %5240 = vst [vmem:[%s8876_s6 + $0x30] sm:$0xff] %v7303_v20  ;;  %8904 = vst [vmem:[#allocation4_spill] sm:$0xff] %v7438_v19 }
 0x277   :  { %5839 = vmatmul.mubr.bf16.vlgmr.msra.gmra.mrb[8].mxu1 %v1173_v22  ;;  %1737 = vmatprep.mubr.bf16.mxu0 %v1173_v22 }
 0x278   :  { %1747 = vmatpush1.bf16.msra.mxu1 %v7308_v21  ;;  %1778 = vmatprep.mubr.bf16.mxu1 %v1173_v22  ;;  %v7450_v22 = vld [vmem:[%s8871_s2 + $0x168] ss:$16 sps:$4 sm:$0xff]  }
 0x279   :  { %1748 = vmatprep.subr.bf16.mxu1 %v7319_v60  ;;  %1738 = vmatmul.mubr.bf16.vlgmr.msra.gmra.mrb[12].mxu0 %v7321_v23  ;;  %8906 = vst [vmem:[#allocation6_spill] sm:$0xff] %v7450_v22 }
 0x27a   :  { %5858 = vmatprep.mubr.msk.bf16.mxu0 %vm6512_vm0, %v8878_v1  ;;  %v7456_v1 = vld [vmem:[%s8871_s2 + $0x18c] ss:$16 sps:$4 sm:$0xff]  }
 0x27b   :  { %8907 = vst [vmem:[#allocation7_spill] sm:$0xff] %v7456_v1 }
 0x27c   :  { %1749 = vmatpush1.bf16.msra.mxu1 %v7327_v46 }
 0x27d   :  { %1750 = vmatprep.subr.bf16.mxu1 %v7333_v51 }
 0x280   :  { %1751 = vmatpush1.bf16.msra.mxu1 %v7342_v57 }
 0x281   :  { %1752 = vmatprep.subr.bf16.mxu1 %v7348_v63 }
 0x284   :  { %1753 = vmatpush1.bf16.msra.mxu1 %v7354_v11 }
 0x285   :  { %1754 = vmatprep.subr.bf16.mxu1 %v7360_v26 }
 0x288   :  { %1755 = vmatpush1.bf16.msra.mxu1 %v7366_v29 }
 0x289   :  { %1756 = vmatprep.subr.bf16.mxu1 %v7372_v32 }
 0x28c   :  { %1757 = vmatpush1.bf16.msra.mxu1 %v7378_v3 }
 0x28d   :  { %1758 = vmatprep.subr.bf16.mxu1 %v7384_v4 }
 0x290   :  { %1759 = vmatpush1.bf16.msra.mxu1 %v7390_v5 }
 0x291   :  { %1760 = vmatprep.subr.bf16.mxu1 %v7396_v6 }
 0x294   :  { %1761 = vmatpush1.bf16.msra.mxu1 %v7402_v9 }
 0x295   :  { %1762 = vmatprep.subr.bf16.mxu1 %v7408_v12 }
 0x298   :  { %1763 = vmatpush1.bf16.msra.mxu1 %v7414_v13 }
 0x299   :  { %1764 = vmatprep.subr.bf16.mxu1 %v7420_v14 }
 0x29c   :  { %1765 = vmatpush1.bf16.msra.mxu1 %v7426_v15 }
 0x29d   :  { %1766 = vmatprep.subr.bf16.mxu1 %v7432_v17  ;;  %v7462_v17 = vld [vmem:[%s8871_s2 + $0x188] ss:$16 sps:$4 sm:$0xff]  }
 0x29e   :  { %8908 = vst [vmem:[#allocation8_spill] sm:$0xff] %v7462_v17 }
 0x2a0   :  { %1767 = vmatpush1.bf16.msra.mxu1 %v7438_v19  ;;  %v7468_v19 = vld [vmem:[%s8871_s2 + $0x1ac] ss:$16 sps:$4 sm:$0xff]  }
 0x2a1   :  { %1768 = vmatprep.subr.bf16.mxu1 %v7444_v0  ;;  %8909 = vst [vmem:[#allocation9_spill] sm:$0xff] %v7468_v19  ;;  %v7474_v0 = vld [vmem:[%s8871_s2 + $0x1a8] ss:$16 sps:$4 sm:$0xff]  }
 0x2a4   :  { %1769 = vmatpush1.bf16.msra.mxu1 %v7450_v22  ;;  %v7480_v22 = vld [vmem:[%s8871_s2 + $0x1cc] ss:$16 sps:$4 sm:$0xff]  }
 0x2a5   :  { %1770 = vmatprep.subr.bf16.mxu1 %v7456_v1  ;;  %v7486_v1 = vld [vmem:[%s8871_s2 + $0x1c8] ss:$16 sps:$4 sm:$0xff]  }
 0x2a8   :  { %1771 = vmatpush1.bf16.msra.mxu1 %v7462_v17  ;;  %v7492_v17 = vld [vmem:[%s8871_s2 + $0x1ec] ss:$16 sps:$4 sm:$0xff]  }
 0x2a9   :  { %1772 = vmatprep.subr.bf16.mxu1 %v7468_v19  ;;  %v7498_v19 = vld [vmem:[%s8871_s2 + $0x1e8] ss:$16 sps:$4 sm:$0xff]  }
 0x2ac   :  { %1773 = vmatpush1.bf16.msra.mxu1 %v7474_v0 }
 0x2ad   :  { %1774 = vmatprep.subr.bf16.mxu1 %v7480_v22 }
 0x2b0   :  { %1775 = vmatpush1.bf16.msra.mxu1 %v7486_v1 }
 0x2b1   :  { %1776 = vmatprep.subr.bf16.mxu1 %v7492_v17 }
 0x2b4   :  { %1777 = vmatpush1.bf16.msra.mxu1 %v7498_v19 }
 0x2b5   :  { %2337 = vmatprep.subr.bf16.mxu1 %v7055_v49  ;;  %v6173_v49 = vld [vmem:[%s8874_s4 + $0x8] sm:$0xff]  }
 0x2b7   :  { %1779 = vmatmul.mubr.bf16.vlgmr.msra.gmra.mrb[12].mxu1 %v7321_v23 }
 0x2b8   :  { %2338 = vmatpush1.bf16.msra.mxu1 %v7050_v47  ;;  %v6172_v47 = vld [vmem:[%s8874_s4] sm:$0xff]  }
 0x2b9   :  { %2339 = vmatprep.subr.bf16.mxu1 %v7067_v53  ;;  %5843 = vmatpush3.bf16.msra.mxu0 %v6172_v47  ;;  %v8910_v53 = vmov 0.0  }
 0x2ba   :  { %5844 = vmatprep.subr.bf16.mxu0 %v8910_v53 }
 0x2bc   :  { %2340 = vmatpush1.bf16.msra.mxu1 %v7072_v55  ;;  %v6174_v55 = vld [vmem:[%s8874_s4 + $0x10] sm:$0xff]  }
 0x2bd   :  { %2341 = vmatprep.subr.bf16.mxu1 %v7083_v59  ;;  %5845 = vmatpush3.bf16.msra.mxu0 %v6173_v49  ;;  %v6175_v59 = vld [vmem:[%s8874_s4 + $0x18] sm:$0xff]  }
 0x2be   :  { %5846 = vmatprep.subr.bf16.mxu0 %v8910_v53 }
 0x2c0   :  { %2342 = vmatpush1.bf16.msra.mxu1 %v7088_v62  ;;  %v6176_v62 = vld [vmem:[%s8874_s4 + $0x20] sm:$0xff]  }
 0x2c1   :  { %2343 = vmatprep.subr.bf16.mxu1 %v7099_v7  ;;  %5847 = vmatpush3.bf16.msra.mxu0 %v6174_v55  ;;  %v6177_v7 = vld [vmem:[%s8874_s4 + $0x28] sm:$0xff]  }
 0x2c2   :  { %5848 = vmatprep.subr.bf16.mxu0 %v8910_v53 }
 0x2c4   :  { %2344 = vmatpush1.bf16.msra.mxu1 %v7104_v10  ;;  %v6178_v10 = vld [vmem:[%s8874_s4 + $0x30] sm:$0xff]  }
 0x2c5   :  { %2345 = vmatprep.subr.bf16.mxu1 %v7115_v24  ;;  %5849 = vmatpush3.bf16.msra.mxu0 %v6175_v59  ;;  %v6179_v24 = vld [vmem:[%s8874_s4 + $0x38] sm:$0xff]  }
 0x2c6   :  { %5850 = vmatprep.subr.bf16.mxu0 %v8910_v53 }
 0x2c8   :  { %2346 = vmatpush1.bf16.msra.mxu1 %v7120_v25  ;;  %v1363_v25 = vld [vmem:[%s8875_s3] sm:$0xf] }
 0x2c9   :  { %2347 = vmatprep.subr.bf16.mxu1 %v7131_v27  ;;  %5851 = vmatpush3.bf16.msra.mxu0 %v6176_v62  ;;  %v1368_v27 = vrot.slane %v1363_v25, %v6939_v16 }
 0x2ca   :  { %5852 = vmatprep.subr.bf16.mxu0 %v8910_v53 }
 0x2cc   :  { %2348 = vmatpush1.bf16.msra.mxu1 %v7136_v28 }
 0x2cd   :  { %2349 = vmatprep.subr.bf16.mxu1 %v7151_v31  ;;  %5853 = vmatpush3.bf16.msra.mxu0 %v6177_v7 }
 0x2ce   :  { %5854 = vmatprep.subr.bf16.mxu0 %v8910_v53 }
 0x2d0   :  { %2350 = vmatpush1.bf16.msra.mxu1 %v7146_v30  ;;  %v1372_v30 = vrot.slane %v1363_v25, %v6944_v18 }
 0x2d1   :  { %2351 = vmatprep.subr.bf16.mxu1 %v7160_v33  ;;  %5855 = vmatpush3.bf16.msra.mxu0 %v6178_v10 }
 0x2d2   :  { %5856 = vmatprep.subr.bf16.mxu0 %v8910_v53 }
 0x2d4   :  { %2352 = vmatpush1.bf16.msra.mxu1 %v7172_v35 }
 0x2d5   :  { %2353 = vmatprep.subr.bf16.mxu1 %v7185_v40  ;;  %5857 = vmatpush3.bf16.msra.mxu0 %v6179_v24 }
 0x2d6   :  { %2378 = vmatprep.subr.bf16.mxu0 %v7166_v34 }
 0x2d8   :  { %2354 = vmatpush1.bf16.msra.mxu1 %v7180_v37 }
 0x2d9   :  { %2355 = vmatprep.subr.bf16.mxu1 %v7197_v42 }
 0x2dc   :  { %2356 = vmatpush1.bf16.msra.mxu1 %v7192_v41 }
 0x2dd   :  { %2357 = vmatprep.subr.bf16.mxu1 %v7209_v44 }
 0x2e0   :  { %2358 = vmatpush1.bf16.msra.mxu1 %v7204_v43 }
 0x2e1   :  { %2359 = vmatprep.subr.bf16.mxu1 %v7221_v48 }
 0x2e4   :  { %2360 = vmatpush1.bf16.msra.mxu1 %v7216_v45 }
 0x2e5   :  { %2361 = vmatprep.subr.bf16.mxu1 %v7233_v52 }
 0x2e8   :  { %2362 = vmatpush1.bf16.msra.mxu1 %v7228_v50 }
 0x2e9   :  { %2363 = vmatprep.subr.bf16.mxu1 %v7245_v56 }
 0x2ec   :  { %2364 = vmatpush1.bf16.msra.mxu1 %v7240_v54 }
 0x2ed   :  { %2365 = vmatprep.subr.bf16.mxu1 %v7257_v61 }
 0x2f0   :  { %2366 = vmatpush1.bf16.msra.mxu1 %v7252_v58 }
 0x2f1   :  { %2367 = vmatprep.subr.bf16.mxu1 %v7269_v36  ;;  %v1380_v36 = vrot.slane %v1363_v25, %v6948_v38 }
 0x2f4   :  { %2368 = vmatpush1.bf16.msra.mxu1 %v7264_v8  ;;  %v1376_v8 = vrot.slane %v1363_v25, %v6950_v39  ;;  %v5325_v25 = vld [vmem:[%s8873_s0 + $0x18] sm:$0xff] }
 0x2f5   :  { %5862 = vmatprep.subr.bf16.mxu1 %v8910_v53 }
 0x34a   :  { %v1279_v28 = vpop.f32.mrb[8].mxu1 }
 0x34b   :  { %v1280_v31 = vadd.f32 %v7280_v2, %v1279_v28  ;;  %v5840_v33 = vpop.f32.mrb[9].mxu1 }
 0x34c   :  { %v1282_v35 = vpop.f32.mrb[10].mxu1  ;;  %v1739_v37 = vpop.f32.mrb[12].mxu0  ;;  %v6204_v33 = vld [vmem:[%s8874_s4 + $0x30] sm:$0xff]  }
 0x34d   :  { %5239 = vst [vmem:[%s8876_s6 + $0x28] sm:$0xff] %v1280_v31  ;;  %v5841_v40 = vpop.f32.mrb[11].mxu1  ;;  %v1740_v34 = vadd.f32 %v1739_v37, %v1368_v27  ;;  %v1741_v41 = vpop.f32.mrb[13].mxu0  ;;  %v1929_v31 = vpack.c.bf16 %v5325_v25, %v5325_v25  ;;  %v7735_v35 = vld [vmem:[%s8871_s2 + $0xc0] ss:$16 sps:$4 sm:$0xff]  }
 0x34e   :  { %v1742_v42 = vadd.f32 %v1741_v41, %v1372_v30  ;;  %v1743_v43 = vpop.f32.mrb[14].mxu0  ;;  %v7740_v37 = vld [vmem:[%s8871_s2 + $0xc4] ss:$16 sps:$4 sm:$0xff]   ;;  %v6208_v40 = vld [vmem:[%s8874_s4 + $0x38] sm:$0xff]  }
 0x34f   :  { %v5309_v44 = vmul.f32 -1.442695, %v1740_v34  ;;  %v1744_v45 = vpop.f32.mrb[15].mxu0  ;;  %v7749_v34 = vld [vmem:[%s8871_s2 + $0xe4] ss:$16 sps:$4 sm:$0xff]  }
 0x350   :  { %v5310_v48 = vmul.f32 -1.442695, %v1742_v42  ;;  %v7755_v41 = vld [vmem:[%s8871_s2 + $0xc] ss:$16 sps:$4 sm:$0xff]   ;;  %v7761_v42 = vld [vmem:[%s8871_s2 + $0xe0] ss:$16 sps:$4 sm:$0xff]  }
 0x351   :  { %6432 = vpow2.f32 %v5309_v44  ;;  %v7769_v43 = vld [vmem:[%s8871_s2 + $0x100] ss:$16 sps:$4 sm:$0xff]   ;;  %v7774_v44 = vld [vmem:[%s8871_s2 + $0x104] ss:$16 sps:$4 sm:$0xff]  }
 0x352   :  { %6434 = vpow2.f32 %v5310_v48  ;;  %v7781_v45 = vld [vmem:[%s8871_s2 + $0x120] ss:$16 sps:$4 sm:$0xff]   ;;  %v7786_v48 = vld [vmem:[%s8871_s2 + $0x124] ss:$16 sps:$4 sm:$0xff]  }
 0x35b   :  { %v6433_v50 = vpop.eup %6432 }
 0x35c   :  { %v6435_v52 = vpop.eup %6434  ;;  %v1790_v54 = vadd.f32 1.0, %v6433_v50  ;;  %v7793_v50 = vld [vmem:[%s8871_s2 + $0x140] ss:$16 sps:$4 sm:$0xff]  }
 0x35d   :  { %v1796_v56 = vadd.f32 1.0, %v6435_v52  ;;  %v7798_v52 = vld [vmem:[%s8871_s2 + $0x144] ss:$16 sps:$4 sm:$0xff]  }
 0x35e   :  { %6436 = vrcp.f32 %v1790_v54  ;;  %v7805_v54 = vld [vmem:[%s8871_s2 + $0x160] ss:$16 sps:$4 sm:$0xff]  }
 0x35f   :  { %6438 = vrcp.f32 %v1796_v56  ;;  %v7810_v56 = vld [vmem:[%s8871_s2 + $0x164] ss:$16 sps:$4 sm:$0xff]  }
 0x368   :  { %v6437_v58 = vpop.eup %6436 }
 0x369   :  { %v6439_v61 = vpop.eup %6438  ;;  %5322 = vst [vmem:[%s8876_s6 + $0x60] sm:$0xff] %v6437_v58 }
 0x36a   :  { %5323 = vst [vmem:[%s8876_s6 + $0x68] sm:$0xff] %v6439_v61 }
 0x38a   :  { %v1780_v2 = vpop.f32.mrb[12].mxu1 }
 0x38b   :  { %v1781_v23 = vadd.f32 %v1780_v2, %v1376_v8  ;;  %v1782_v47 = vpop.f32.mrb[13].mxu1  ;;  %v7829_v8 = vld [vmem:[%s8871_s2 + $0x1a0] ss:$16 sps:$4 sm:$0xff]  }
 0x38c   :  { %v1783_v49 = vadd.f32 %v1782_v47, %v1380_v36  ;;  %v1784_v55 = vpop.f32.mrb[14].mxu1  ;;  %v7834_v36 = vld [vmem:[%s8871_s2 + $0x1a4] ss:$16 sps:$4 sm:$0xff]   ;;  %v7841_v2 = vld [vmem:[%s8871_s2 + $0x1c0] ss:$16 sps:$4 sm:$0xff]  }
 0x38d   :  { %v1785_v59 = vpop.f32.mrb[15].mxu1  ;;  %v7853_v47 = vld [vmem:[%s8871_s2 + $0x1e0] ss:$16 sps:$4 sm:$0xff]  }
 0x38e   :  { %v1799_v62 = vmul.f32 %v6437_v58, %v1783_v49  ;;  %v7817_v58 = vld [vmem:[%s8871_s2 + $0x180] ss:$16 sps:$4 sm:$0xff]   ;;  %v7858_v49 = vld [vmem:[%s8871_s2 + $0x1e4] ss:$16 sps:$4 sm:$0xff]  }
 0x38f   :  { %v1995_v55 = vld [vmem:[%s8875_s3] sm:$0xf] }
 0x390   :  { %v1800_v7 = vadd.f32 %v1799_v62, %v1781_v23  ;;  %v7846_v23 = vld [vmem:[%s8871_s2 + $0x1c4] ss:$16 sps:$4 sm:$0xff]   ;;  %v7869_v59 = vld [vmem:[%s8877_s5] ss:$0 sm:$0xff]  ;;  %v2000_v62 = vrot.slane %v1995_v55, %v6939_v16 }
 0x392   :  { %6440 = vtanh.f32 %v1800_v7 }
 0x39c   :  { %v6441_v10 = vpop.eup %6440 }
 0x39d   :  { %5324 = vst [vmem:[%s8876_s6 + $0x70] sm:$0xff] %v6441_v10  ;;  %v1802_v24 = vsub.f32 %v7303_v20, %v6441_v10  ;;  %v8911_v20 = vld [vmem:[#allocation3_spill] sm:$0xff] }
 0x39f   :  { %v1803_v27 = vmul.f32 %v6439_v61, %v1802_v24  ;;  %v7822_v61 = vld [vmem:[%s8871_s2 + $0x184] ss:$16 sps:$4 sm:$0xff]  }
 0x3a1   :  { %v7592_v28 = vadd.f32 %v6441_v10, %v1803_v27  ;;  %v2004_v10 = vrot.slane %v1995_v55, %v6944_v18 }
 0x3a3   :  { %v1805_v30 = vpack.c.bf16 %v7592_v28, %v7592_v28  ;;  %5321 = vst [vmem:[%s8876_s6 + $0x58] sm:$0xff] %v7592_v28 }
 0x3a5   :  { %5859 = vmatmul.mubr.bf16.vlgmr.msra.gmra.mrb[16].mxu0 %v1805_v30  ;;  %2369 = vmatprep.mubr.bf16.mxu1 %v1805_v30 }
 0x3a6   :  { %2379 = vmatpush1.bf16.msra.mxu0 %v7308_v21  ;;  %2410 = vmatprep.mubr.bf16.mxu0 %v1805_v30  ;;  %v8912_v21 = vld [vmem:[#allocation4_spill] sm:$0xff] }
 0x3a7   :  { %2380 = vmatprep.subr.bf16.mxu0 %v7319_v60  ;;  %2370 = vmatmul.mubr.bf16.vlgmr.msra.gmra.mrb[16].mxu1 %v1929_v31  ;;  %v8913_v60 = vld [vmem:[#allocation5_spill] sm:$0xff] }
 0x3a8   :  { %5878 = vmatprep.mubr.msk.bf16.mxu1 %vm6512_vm0, %v8910_v53 }
 0x3aa   :  { %2381 = vmatpush1.bf16.msra.mxu0 %v7327_v46  ;;  %v8914_v46 = vld [vmem:[#allocation6_spill] sm:$0xff] }
 0x3ab   :  { %2382 = vmatprep.subr.bf16.mxu0 %v7333_v51  ;;  %v8915_v51 = vld [vmem:[#allocation7_spill] sm:$0xff] }
 0x3ae   :  { %2383 = vmatpush1.bf16.msra.mxu0 %v7342_v57  ;;  %v8916_v57 = vld [vmem:[#allocation8_spill] sm:$0xff] }
 0x3af   :  { %2384 = vmatprep.subr.bf16.mxu0 %v7348_v63  ;;  %v8917_v63 = vld [vmem:[#allocation9_spill] sm:$0xff] }
 0x3b2   :  { %2385 = vmatpush1.bf16.msra.mxu0 %v7354_v11  ;;  %v6180_v11 = vld [vmem:[%s8874_s4] sm:$0xff]  }
 0x3b3   :  { %2386 = vmatprep.subr.bf16.mxu0 %v7360_v26  ;;  %v7639_v26 = vld [vmem:[%s8871_s2] ss:$16 sps:$4 sm:$0xff]   ;;  %5863 = vmatpush3.bf16.msra.mxu1 %v6180_v11 }
 0x3b4   :  { %5864 = vmatprep.subr.bf16.mxu1 %v8910_v53 }
 0x3b6   :  { %2387 = vmatpush1.bf16.msra.mxu0 %v7366_v29  ;;  %v7644_v29 = vld [vmem:[%s8871_s2 + $0x4] ss:$16 sps:$4 sm:$0xff]  }
 0x3b7   :  { %2388 = vmatprep.subr.bf16.mxu0 %v7372_v32  ;;  %v7656_v32 = vld [vmem:[%s8871_s2 + $0x24] ss:$16 sps:$4 sm:$0xff]  }
 0x3ba   :  { %2389 = vmatpush1.bf16.msra.mxu0 %v7378_v3  ;;  %v7661_v3 = vld [vmem:[%s8871_s2 + $0x20] ss:$16 sps:$4 sm:$0xff]  }
 0x3bb   :  { %2390 = vmatprep.subr.bf16.mxu0 %v7384_v4  ;;  %v6188_v4 = vld [vmem:[%s8874_s4 + $0x10] sm:$0xff]  }
 0x3be   :  { %2391 = vmatpush1.bf16.msra.mxu0 %v7390_v5  ;;  %v7672_v5 = vld [vmem:[%s8871_s2 + $0x44] ss:$16 sps:$4 sm:$0xff]  }
 0x3bf   :  { %2392 = vmatprep.subr.bf16.mxu0 %v7396_v6  ;;  %v7677_v6 = vld [vmem:[%s8871_s2 + $0x40] ss:$16 sps:$4 sm:$0xff]  }
 0x3c2   :  { %2393 = vmatpush1.bf16.msra.mxu0 %v7402_v9  ;;  %v6192_v9 = vld [vmem:[%s8874_s4 + $0x18] sm:$0xff]  }
 0x3c3   :  { %2394 = vmatprep.subr.bf16.mxu0 %v7408_v12  ;;  %v7688_v12 = vld [vmem:[%s8871_s2 + $0x64] ss:$16 sps:$4 sm:$0xff]  }
 0x3c6   :  { %2395 = vmatpush1.bf16.msra.mxu0 %v7414_v13  ;;  %v7693_v13 = vld [vmem:[%s8871_s2 + $0x60] ss:$16 sps:$4 sm:$0xff]  }
 0x3c7   :  { %2396 = vmatprep.subr.bf16.mxu0 %v7420_v14  ;;  %v6196_v14 = vld [vmem:[%s8874_s4 + $0x20] sm:$0xff]  }
 0x3ca   :  { %2397 = vmatpush1.bf16.msra.mxu0 %v7426_v15  ;;  %v7704_v15 = vld [vmem:[%s8871_s2 + $0x84] ss:$16 sps:$4 sm:$0xff]  }
 0x3cb   :  { %2398 = vmatprep.subr.bf16.mxu0 %v8911_v20 }
 0x3ce   :  { %2399 = vmatpush1.bf16.msra.mxu0 %v8912_v21 }
 0x3cf   :  { %2400 = vmatprep.subr.bf16.mxu0 %v8913_v60 }
 0x3d2   :  { %2401 = vmatpush1.bf16.msra.mxu0 %v8914_v46 }
 0x3d3   :  { %2402 = vmatprep.subr.bf16.mxu0 %v8915_v51 }
 0x3d6   :  { %2403 = vmatpush1.bf16.msra.mxu0 %v8916_v57 }
 0x3d7   :  { %2404 = vmatprep.subr.bf16.mxu0 %v8917_v63 }
 0x3da   :  { %2405 = vmatpush1.bf16.msra.mxu0 %v7474_v0  ;;  %v7720_v0 = vld [vmem:[%s8871_s2 + $0xa4] ss:$16 sps:$4 sm:$0xff]  }
 0x3db   :  { %2406 = vmatprep.subr.bf16.mxu0 %v7480_v22  ;;  %v7725_v22 = vld [vmem:[%s8871_s2 + $0xa0] ss:$16 sps:$4 sm:$0xff]  }
 0x3de   :  { %2407 = vmatpush1.bf16.msra.mxu0 %v7486_v1  ;;  %v6184_v1 = vld [vmem:[%s8874_s4 + $0x8] sm:$0xff]  }
 0x3df   :  { %2408 = vmatprep.subr.bf16.mxu0 %v7492_v17  ;;  %5865 = vmatpush3.bf16.msra.mxu1 %v6184_v1  ;;  %v7709_v17 = vld [vmem:[%s8871_s2 + $0x80] ss:$16 sps:$4 sm:$0xff]  }
 0x3e0   :  { %5866 = vmatprep.subr.bf16.mxu1 %v8910_v53 }
 0x3e2   :  { %2409 = vmatpush1.bf16.msra.mxu0 %v7498_v19  ;;  %v6200_v19 = vld [vmem:[%s8874_s4 + $0x28] sm:$0xff]  }
 0x3e3   :  { %2969 = vmatprep.subr.bf16.mxu0 %v7644_v29  ;;  %5867 = vmatpush3.bf16.msra.mxu1 %v6188_v4 }
 0x3e4   :  { %5868 = vmatprep.subr.bf16.mxu1 %v8910_v53 }
 0x3e5   :  { %2411 = vmatmul.mubr.bf16.vlgmr.msra.gmra.mrb[20].mxu0 %v1929_v31 }
 0x3e6   :  { %2970 = vmatpush1.bf16.msra.mxu0 %v7639_v26 }
 0x3e7   :  { %2971 = vmatprep.subr.bf16.mxu0 %v7656_v32  ;;  %5869 = vmatpush3.bf16.msra.mxu1 %v6192_v9 }
 0x3e8   :  { %5870 = vmatprep.subr.bf16.mxu1 %v8910_v53 }
 0x3ea   :  { %2972 = vmatpush1.bf16.msra.mxu0 %v7661_v3 }
 0x3eb   :  { %2973 = vmatprep.subr.bf16.mxu0 %v7672_v5  ;;  %5871 = vmatpush3.bf16.msra.mxu1 %v6196_v14 }
 0x3ec   :  { %5872 = vmatprep.subr.bf16.mxu1 %v8910_v53 }
 0x3ee   :  { %2974 = vmatpush1.bf16.msra.mxu0 %v7677_v6 }
 0x3ef   :  { %2975 = vmatprep.subr.bf16.mxu0 %v7688_v12  ;;  %5873 = vmatpush3.bf16.msra.mxu1 %v6200_v19 }
 0x3f0   :  { %5874 = vmatprep.subr.bf16.mxu1 %v8910_v53 }
 0x3f2   :  { %2976 = vmatpush1.bf16.msra.mxu0 %v7693_v13 }
 0x3f3   :  { %2977 = vmatprep.subr.bf16.mxu0 %v7704_v15  ;;  %5875 = vmatpush3.bf16.msra.mxu1 %v6204_v33  ;;  %v2008_v33 = vrot.slane %v1995_v55, %v6950_v39 }
 0x3f4   :  { %5876 = vmatprep.subr.bf16.mxu1 %v8910_v53 }
 0x3f6   :  { %2978 = vmatpush1.bf16.msra.mxu0 %v7709_v17 }
 0x3f7   :  { %2979 = vmatprep.subr.bf16.mxu0 %v7720_v0  ;;  %5877 = vmatpush3.bf16.msra.mxu1 %v6208_v40  ;;  %v2012_v40 = vrot.slane %v1995_v55, %v6948_v38  ;;  %v5406_v55 = vld [vmem:[%s8873_s0 + $0x20] sm:$0xff] }
 0x3f8   :  { %3010 = vmatprep.subr.bf16.mxu1 %v7755_v41 }
 0x3fa   :  { %2980 = vmatpush1.bf16.msra.mxu0 %v7725_v22 }
 0x3fb   :  { %2981 = vmatprep.subr.bf16.mxu0 %v7740_v37 }
 0x3fe   :  { %2982 = vmatpush1.bf16.msra.mxu0 %v7735_v35 }
 0x3ff   :  { %2983 = vmatprep.subr.bf16.mxu0 %v7749_v34 }
 0x402   :  { %2984 = vmatpush1.bf16.msra.mxu0 %v7761_v42 }
 0x403   :  { %2985 = vmatprep.subr.bf16.mxu0 %v7774_v44 }
 0x406   :  { %2986 = vmatpush1.bf16.msra.mxu0 %v7769_v43 }
 0x407   :  { %2987 = vmatprep.subr.bf16.mxu0 %v7786_v48 }
 0x40a   :  { %2988 = vmatpush1.bf16.msra.mxu0 %v7781_v45 }
 0x40b   :  { %2989 = vmatprep.subr.bf16.mxu0 %v7798_v52 }
 0x40e   :  { %2990 = vmatpush1.bf16.msra.mxu0 %v7793_v50 }
 0x40f   :  { %2991 = vmatprep.subr.bf16.mxu0 %v7810_v56 }
 0x412   :  { %2992 = vmatpush1.bf16.msra.mxu0 %v7805_v54 }
 0x413   :  { %2993 = vmatprep.subr.bf16.mxu0 %v7822_v61 }
 0x416   :  { %2994 = vmatpush1.bf16.msra.mxu0 %v7817_v58 }
 0x417   :  { %2995 = vmatprep.subr.bf16.mxu0 %v7834_v36 }
 0x41a   :  { %2996 = vmatpush1.bf16.msra.mxu0 %v7829_v8 }
 0x41b   :  { %2997 = vmatprep.subr.bf16.mxu0 %v7846_v23 }
 0x41e   :  { %2998 = vmatpush1.bf16.msra.mxu0 %v7841_v2 }
 0x41f   :  { %2999 = vmatprep.subr.bf16.mxu0 %v7858_v49 }
 0x422   :  { %3000 = vmatpush1.bf16.msra.mxu0 %v7853_v47 }
 0x423   :  { %5882 = vmatprep.subr.bf16.mxu0 %v8910_v53 }
 0x478   :  { %v1911_v7 = vpop.f32.mrb[16].mxu0 }
 0x479   :  { %v1912_v24 = vadd.f32 %v7869_v59, %v1911_v7  ;;  %v5860_v27 = vpop.f32.mrb[17].mxu0 }
 0x47a   :  { %v1914_v25 = vpop.f32.mrb[18].mxu0  ;;  %v2371_v30 = vpop.f32.mrb[16].mxu1 }
 0x47b   :  { %5320 = vst [vmem:[%s8876_s6 + $0x50] sm:$0xff] %v1912_v24  ;;  %v5861_v31 = vpop.f32.mrb[19].mxu0  ;;  %v2372_v20 = vadd.f32 %v2371_v30, %v2000_v62  ;;  %v2373_v21 = vpop.f32.mrb[17].mxu1 }
 0x47c   :  { %v2374_v60 = vadd.f32 %v2373_v21, %v2004_v10  ;;  %v2375_v46 = vpop.f32.mrb[18].mxu1 }
 0x47d   :  { %v5390_v51 = vmul.f32 -1.442695, %v2372_v20  ;;  %v2376_v57 = vpop.f32.mrb[19].mxu1 }
 0x47e   :  { %v5391_v63 = vmul.f32 -1.442695, %v2374_v60 }
 0x47f   :  { %6442 = vpow2.f32 %v5390_v51  ;;  %v7897_v51 = vld [vmem:[%s8871_s2 + $0x8] ss:$16 sps:$4 sm:$0xff]  }
 0x480   :  { %6444 = vpow2.f32 %v5391_v63  ;;  %v7910_v63 = vpack.c.bf16 %v5406_v55, %v5406_v55  ;;  %v8033_v55 = vld [vmem:[%s8871_s2 + $0x16c] ss:$16 sps:$4 sm:$0xff]  }
 0x481   :  { %8921 = vst [vmem:[#allocation6_spill] sm:$0xff] %v8033_v55 }
 0x489   :  { %v6443_v11 = vpop.eup %6442 }
 0x48a   :  { %v6445_v1 = vpop.eup %6444  ;;  %v2422_v4 = vadd.f32 1.0, %v6443_v11  ;;  %v7916_v11 = vld [vmem:[%s8871_s2 + $0x28] ss:$16 sps:$4 sm:$0xff]  }
 0x48b   :  { %v2428_v9 = vadd.f32 1.0, %v6445_v1  ;;  %v7922_v1 = vld [vmem:[%s8871_s2 + $0x4c] ss:$16 sps:$4 sm:$0xff]  }
 0x48c   :  { %6446 = vrcp.f32 %v2422_v4  ;;  %v7931_v4 = vld [vmem:[%s8871_s2 + $0x48] ss:$16 sps:$4 sm:$0xff]  }
 0x48d   :  { %6448 = vrcp.f32 %v2428_v9  ;;  %v7937_v9 = vld [vmem:[%s8871_s2 + $0x6c] ss:$16 sps:$4 sm:$0xff]  }
 0x496   :  { %v6447_v14 = vpop.eup %6446 }
 0x497   :  { %v6449_v19 = vpop.eup %6448  ;;  %5403 = vst [vmem:[%s8876_s6 + $0x88] sm:$0xff] %v6447_v14 }
 0x498   :  { %5404 = vst [vmem:[%s8876_s6 + $0x90] sm:$0xff] %v6449_v19 }
 0x4b8   :  { %v2412_v62 = vpop.f32.mrb[20].mxu0 }
 0x4b9   :  { %v2413_v7 = vadd.f32 %v2412_v62, %v2008_v33  ;;  %v2414_v10 = vpop.f32.mrb[21].mxu0  ;;  %v7955_v33 = vld [vmem:[%s8871_s2 + $0x88] ss:$16 sps:$4 sm:$0xff]  }
 0x4ba   :  { %v2415_v24 = vadd.f32 %v2414_v10, %v2012_v40  ;;  %v2416_v27 = vpop.f32.mrb[22].mxu0  ;;  %v7961_v40 = vld [vmem:[%s8871_s2 + $0xac] ss:$16 sps:$4 sm:$0xff]   ;;  %v7967_v62 = vld [vmem:[%s8871_s2 + $0xa8] ss:$16 sps:$4 sm:$0xff]  }
 0x4bb   :  { %v2417_v25 = vpop.f32.mrb[23].mxu0  ;;  %v7979_v10 = vld [vmem:[%s8871_s2 + $0xc8] ss:$16 sps:$4 sm:$0xff]  }
 0x4bc   :  { %v2431_v30 = vmul.f32 %v6447_v14, %v2415_v24  ;;  %v7943_v14 = vld [vmem:[%s8871_s2 + $0x68] ss:$16 sps:$4 sm:$0xff]   ;;  %v7985_v24 = vld [vmem:[%s8871_s2 + $0xec] ss:$16 sps:$4 sm:$0xff]  }
 0x4bd   :  { %v7991_v27 = vld [vmem:[%s8871_s2 + $0xe8] ss:$16 sps:$4 sm:$0xff]   ;;  %v7997_v25 = vld [vmem:[%s8871_s2 + $0x10c] ss:$16 sps:$4 sm:$0xff]  }
 0x4be   :  { %v2432_v31 = vadd.f32 %v2431_v30, %v2413_v7  ;;  %v7973_v7 = vld [vmem:[%s8871_s2 + $0xcc] ss:$16 sps:$4 sm:$0xff]   ;;  %v8003_v30 = vld [vmem:[%s8871_s2 + $0x108] ss:$16 sps:$4 sm:$0xff]  }
 0x4c0   :  { %6450 = vtanh.f32 %v2432_v31  ;;  %v8009_v31 = vld [vmem:[%s8871_s2 + $0x12c] ss:$16 sps:$4 sm:$0xff]  }
 0x4ca   :  { %v6451_v20 = vpop.eup %6450 }
 0x4cb   :  { %5405 = vst [vmem:[%s8876_s6 + $0x98] sm:$0xff] %v6451_v20  ;;  %v2434_v21 = vsub.f32 %v7592_v28, %v6451_v20  ;;  %v7908_v28 = vld [vmem:[%s8871_s2 + $0x2c] ss:$16 sps:$4 sm:$0xff]  }
 0x4cd   :  { %v2435_v60 = vmul.f32 %v6449_v19, %v2434_v21  ;;  %v7949_v19 = vld [vmem:[%s8871_s2 + $0x8c] ss:$16 sps:$4 sm:$0xff]  }
 0x4ce   :  { %v8021_v21 = vld [vmem:[%s8871_s2 + $0x14c] ss:$16 sps:$4 sm:$0xff]  }
 0x4cf   :  { %v7892_v46 = vadd.f32 %v6451_v20, %v2435_v60  ;;  %v8015_v20 = vld [vmem:[%s8871_s2 + $0x128] ss:$16 sps:$4 sm:$0xff]   ;;  %8919 = vst [vmem:[#allocation4_spill] sm:$0xff] %v8021_v21 }
 0x4d0   :  { %8918 = vst [vmem:[#allocation3_spill] sm:$0xff] %v8015_v20  ;;  %v8027_v60 = vld [vmem:[%s8871_s2 + $0x148] ss:$16 sps:$4 sm:$0xff]  }
 0x4d1   :  { %v2437_v57 = vpack.c.bf16 %v7892_v46, %v7892_v46  ;;  %5402 = vst [vmem:[%s8876_s6 + $0x80] sm:$0xff] %v7892_v46  ;;  %8920 = vst [vmem:[#allocation5_spill] sm:$0xff] %v8027_v60 }
 0x4d3   :  { %5879 = vmatmul.mubr.bf16.vlgmr.msra.gmra.mrb[20].mxu1 %v2437_v57  ;;  %3001 = vmatprep.mubr.bf16.mxu0 %v2437_v57 }
 0x4d4   :  { %3011 = vmatpush1.bf16.msra.mxu1 %v7897_v51  ;;  %3042 = vmatprep.mubr.bf16.mxu1 %v2437_v57  ;;  %v8039_v57 = vld [vmem:[%s8871_s2 + $0x168] ss:$16 sps:$4 sm:$0xff]  }
 0x4d5   :  { %3012 = vmatprep.subr.bf16.mxu1 %v7908_v28  ;;  %3002 = vmatmul.mubr.bf16.vlgmr.msra.gmra.mrb[24].mxu0 %v7910_v63  ;;  %8922 = vst [vmem:[#allocation7_spill] sm:$0xff] %v8039_v57 }
 0x4d6   :  { %5898 = vmatprep.mubr.msk.bf16.mxu0 %vm6512_vm0, %v8910_v53 }
 0x4d8   :  { %3013 = vmatpush1.bf16.msra.mxu1 %v7916_v11 }
 0x4d9   :  { %3014 = vmatprep.subr.bf16.mxu1 %v7922_v1 }
 0x4dc   :  { %3015 = vmatpush1.bf16.msra.mxu1 %v7931_v4 }
 0x4dd   :  { %3016 = vmatprep.subr.bf16.mxu1 %v7937_v9 }
 0x4e0   :  { %3017 = vmatpush1.bf16.msra.mxu1 %v7943_v14 }
 0x4e1   :  { %3018 = vmatprep.subr.bf16.mxu1 %v7949_v19 }
 0x4e4   :  { %3019 = vmatpush1.bf16.msra.mxu1 %v7955_v33 }
 0x4e5   :  { %3020 = vmatprep.subr.bf16.mxu1 %v7961_v40 }
 0x4e8   :  { %3021 = vmatpush1.bf16.msra.mxu1 %v7967_v62 }
 0x4e9   :  { %3022 = vmatprep.subr.bf16.mxu1 %v7973_v7 }
 0x4ec   :  { %3023 = vmatpush1.bf16.msra.mxu1 %v7979_v10 }
 0x4ed   :  { %3024 = vmatprep.subr.bf16.mxu1 %v7985_v24 }
 0x4f0   :  { %3025 = vmatpush1.bf16.msra.mxu1 %v7991_v27 }
 0x4f1   :  { %3026 = vmatprep.subr.bf16.mxu1 %v7997_v25 }
 0x4f4   :  { %3027 = vmatpush1.bf16.msra.mxu1 %v8003_v30 }
 0x4f5   :  { %3028 = vmatprep.subr.bf16.mxu1 %v8009_v31 }
 0x4f8   :  { %3029 = vmatpush1.bf16.msra.mxu1 %v8015_v20  ;;  %v8045_v20 = vld [vmem:[%s8871_s2 + $0x18c] ss:$16 sps:$4 sm:$0xff]  }
 0x4f9   :  { %3030 = vmatprep.subr.bf16.mxu1 %v8021_v21  ;;  %8923 = vst [vmem:[#allocation8_spill] sm:$0xff] %v8045_v20  ;;  %v8051_v21 = vld [vmem:[%s8871_s2 + $0x188] ss:$16 sps:$4 sm:$0xff]  }
 0x4fa   :  { %8924 = vst [vmem:[#allocation9_spill] sm:$0xff] %v8051_v21 }
 0x4fc   :  { %3031 = vmatpush1.bf16.msra.mxu1 %v8027_v60  ;;  %v8057_v60 = vld [vmem:[%s8871_s2 + $0x1ac] ss:$16 sps:$4 sm:$0xff]  }
 0x4fd   :  { %3032 = vmatprep.subr.bf16.mxu1 %v8033_v55  ;;  %8925 = vst [vmem:[#allocation10_spill] sm:$0xff] %v8057_v60  ;;  %v8063_v55 = vld [vmem:[%s8871_s2 + $0x1a8] ss:$16 sps:$4 sm:$0xff]  }
 0x500   :  { %3033 = vmatpush1.bf16.msra.mxu1 %v8039_v57  ;;  %v8069_v57 = vld [vmem:[%s8871_s2 + $0x1cc] ss:$16 sps:$4 sm:$0xff]  }
 0x501   :  { %3034 = vmatprep.subr.bf16.mxu1 %v8045_v20  ;;  %v8075_v20 = vld [vmem:[%s8871_s2 + $0x1c8] ss:$16 sps:$4 sm:$0xff]  }
 0x504   :  { %3035 = vmatpush1.bf16.msra.mxu1 %v8051_v21  ;;  %v8081_v21 = vld [vmem:[%s8871_s2 + $0x1ec] ss:$16 sps:$4 sm:$0xff]  }
 0x505   :  { %3036 = vmatprep.subr.bf16.mxu1 %v8057_v60  ;;  %v8087_v60 = vld [vmem:[%s8871_s2 + $0x1e8] ss:$16 sps:$4 sm:$0xff]  }
 0x508   :  { %3037 = vmatpush1.bf16.msra.mxu1 %v8063_v55 }
 0x509   :  { %3038 = vmatprep.subr.bf16.mxu1 %v8069_v57 }
 0x50c   :  { %3039 = vmatpush1.bf16.msra.mxu1 %v8075_v20 }
 0x50d   :  { %3040 = vmatprep.subr.bf16.mxu1 %v8081_v21 }
 0x510   :  { %3041 = vmatpush1.bf16.msra.mxu1 %v8087_v60 }
 0x511   :  { %3601 = vmatprep.subr.bf16.mxu1 %v7644_v29  ;;  %v6285_v29 = vld [vmem:[%s8874_s4 + $0x8] sm:$0xff]  }
 0x513   :  { %3043 = vmatmul.mubr.bf16.vlgmr.msra.gmra.mrb[24].mxu1 %v7910_v63 }
 0x514   :  { %3602 = vmatpush1.bf16.msra.mxu1 %v7639_v26  ;;  %v6284_v26 = vld [vmem:[%s8874_s4] sm:$0xff]  }
 0x515   :  { %3603 = vmatprep.subr.bf16.mxu1 %v7656_v32  ;;  %5883 = vmatpush3.bf16.msra.mxu0 %v6284_v26  ;;  %v6286_v32 = vld [vmem:[%s8874_s4 + $0x10] sm:$0xff]  }
 0x516   :  { %5884 = vmatprep.subr.bf16.mxu0 %v8910_v53 }
 0x518   :  { %3604 = vmatpush1.bf16.msra.mxu1 %v7661_v3  ;;  %v6287_v3 = vld [vmem:[%s8874_s4 + $0x18] sm:$0xff]  }
 0x519   :  { %3605 = vmatprep.subr.bf16.mxu1 %v7672_v5  ;;  %5885 = vmatpush3.bf16.msra.mxu0 %v6285_v29  ;;  %v6288_v5 = vld [vmem:[%s8874_s4 + $0x20] sm:$0xff]  }
 0x51a   :  { %5886 = vmatprep.subr.bf16.mxu0 %v8910_v53 }
 0x51c   :  { %3606 = vmatpush1.bf16.msra.mxu1 %v7677_v6  ;;  %v6289_v6 = vld [vmem:[%s8874_s4 + $0x28] sm:$0xff]  }
 0x51d   :  { %3607 = vmatprep.subr.bf16.mxu1 %v7688_v12  ;;  %5887 = vmatpush3.bf16.msra.mxu0 %v6286_v32  ;;  %v6290_v12 = vld [vmem:[%s8874_s4 + $0x30] sm:$0xff]  }
 0x51e   :  { %5888 = vmatprep.subr.bf16.mxu0 %v8910_v53 }
 0x520   :  { %3608 = vmatpush1.bf16.msra.mxu1 %v7693_v13  ;;  %v6291_v13 = vld [vmem:[%s8874_s4 + $0x38] sm:$0xff]  }
 0x521   :  { %3609 = vmatprep.subr.bf16.mxu1 %v7704_v15  ;;  %5889 = vmatpush3.bf16.msra.mxu0 %v6287_v3  ;;  %v2627_v15 = vld [vmem:[%s8875_s3] sm:$0xf] }
 0x522   :  { %5890 = vmatprep.subr.bf16.mxu0 %v8910_v53 }
 0x524   :  { %3610 = vmatpush1.bf16.msra.mxu1 %v7709_v17  ;;  %v2632_v17 = vrot.slane %v2627_v15, %v6939_v16 }
 0x525   :  { %3611 = vmatprep.subr.bf16.mxu1 %v7720_v0  ;;  %5891 = vmatpush3.bf16.msra.mxu0 %v6288_v5 }
 0x526   :  { %5892 = vmatprep.subr.bf16.mxu0 %v8910_v53 }
 0x528   :  { %3612 = vmatpush1.bf16.msra.mxu1 %v7725_v22  ;;  %v2636_v22 = vrot.slane %v2627_v15, %v6944_v18 }
 0x529   :  { %3613 = vmatprep.subr.bf16.mxu1 %v7740_v37  ;;  %5893 = vmatpush3.bf16.msra.mxu0 %v6289_v6 }
 0x52a   :  { %5894 = vmatprep.subr.bf16.mxu0 %v8910_v53 }
 0x52c   :  { %3614 = vmatpush1.bf16.msra.mxu1 %v7735_v35 }
 0x52d   :  { %3615 = vmatprep.subr.bf16.mxu1 %v7749_v34  ;;  %5895 = vmatpush3.bf16.msra.mxu0 %v6290_v12 }
 0x52e   :  { %5896 = vmatprep.subr.bf16.mxu0 %v8910_v53 }
 0x530   :  { %3616 = vmatpush1.bf16.msra.mxu1 %v7761_v42 }
 0x531   :  { %3617 = vmatprep.subr.bf16.mxu1 %v7774_v44  ;;  %5897 = vmatpush3.bf16.msra.mxu0 %v6291_v13 }
 0x532   :  { %3642 = vmatprep.subr.bf16.mxu0 %v7755_v41 }
 0x534   :  { %3618 = vmatpush1.bf16.msra.mxu1 %v7769_v43 }
 0x535   :  { %3619 = vmatprep.subr.bf16.mxu1 %v7786_v48 }
 0x538   :  { %3620 = vmatpush1.bf16.msra.mxu1 %v7781_v45 }
 0x539   :  { %3621 = vmatprep.subr.bf16.mxu1 %v7798_v52 }
 0x53c   :  { %3622 = vmatpush1.bf16.msra.mxu1 %v7793_v50 }
 0x53d   :  { %3623 = vmatprep.subr.bf16.mxu1 %v7810_v56 }
 0x540   :  { %3624 = vmatpush1.bf16.msra.mxu1 %v7805_v54 }
 0x541   :  { %3625 = vmatprep.subr.bf16.mxu1 %v7822_v61 }
 0x544   :  { %3626 = vmatpush1.bf16.msra.mxu1 %v7817_v58 }
 0x545   :  { %3627 = vmatprep.subr.bf16.mxu1 %v7834_v36 }
 0x548   :  { %3628 = vmatpush1.bf16.msra.mxu1 %v7829_v8 }
 0x549   :  { %3629 = vmatprep.subr.bf16.mxu1 %v7846_v23  ;;  %v2640_v23 = vrot.slane %v2627_v15, %v6950_v39 }
 0x54c   :  { %3630 = vmatpush1.bf16.msra.mxu1 %v7841_v2 }
 0x54d   :  { %3631 = vmatprep.subr.bf16.mxu1 %v7858_v49 }
 0x550   :  { %3632 = vmatpush1.bf16.msra.mxu1 %v7853_v47  ;;  %v2644_v47 = vrot.slane %v2627_v15, %v6948_v38  ;;  %v5487_v15 = vld [vmem:[%s8873_s0 + $0x28] sm:$0xff] }
 0x551   :  { %5902 = vmatprep.subr.bf16.mxu1 %v8910_v53 }
 0x5a6   :  { %v2543_v0 = vpop.f32.mrb[20].mxu1 }
 0x5a7   :  { %v2544_v35 = vadd.f32 %v7869_v59, %v2543_v0  ;;  %v5880_v37 = vpop.f32.mrb[21].mxu1 }
 0x5a8   :  { %v2546_v34 = vpop.f32.mrb[22].mxu1  ;;  %v3003_v42 = vpop.f32.mrb[24].mxu0  ;;  %v8314_v37 = vld [vmem:[%s8871_s2 + $0xa0] ss:$16 sps:$4 sm:$0xff]  }
 0x5a9   :  { %5401 = vst [vmem:[%s8876_s6 + $0x78] sm:$0xff] %v2544_v35  ;;  %v5881_v43 = vpop.f32.mrb[23].mxu1  ;;  %v3004_v41 = vadd.f32 %v3003_v42, %v2632_v17  ;;  %v3005_v44 = vpop.f32.mrb[25].mxu0  ;;  %v8309_v35 = vld [vmem:[%s8871_s2 + $0xa4] ss:$16 sps:$4 sm:$0xff]  }
 0x5aa   :  { %v3006_v45 = vadd.f32 %v3005_v44, %v2636_v22  ;;  %v3007_v48 = vpop.f32.mrb[26].mxu0  ;;  %v3193_v22 = vpack.c.bf16 %v5487_v15, %v5487_v15  ;;  %v6316_v34 = vld [vmem:[%s8874_s4 + $0x30] sm:$0xff]  }
 0x5ab   :  { %v5471_v50 = vmul.f32 -1.442695, %v3004_v41  ;;  %v3008_v52 = vpop.f32.mrb[27].mxu0  ;;  %v8324_v42 = vld [vmem:[%s8871_s2 + $0xc0] ss:$16 sps:$4 sm:$0xff]   ;;  %v6320_v41 = vld [vmem:[%s8874_s4 + $0x38] sm:$0xff]  }
 0x5ac   :  { %v5472_v54 = vmul.f32 -1.442695, %v3006_v45  ;;  %v8329_v43 = vld [vmem:[%s8871_s2 + $0xc4] ss:$16 sps:$4 sm:$0xff]   ;;  %v8344_v45 = vld [vmem:[%s8871_s2 + $0xc] ss:$16 sps:$4 sm:$0xff]  }
 0x5ad   :  { %6452 = vpow2.f32 %v5471_v50  ;;  %v8338_v44 = vld [vmem:[%s8871_s2 + $0xe4] ss:$16 sps:$4 sm:$0xff]   ;;  %v8350_v48 = vld [vmem:[%s8871_s2 + $0xe0] ss:$16 sps:$4 sm:$0xff]  }
 0x5ae   :  { %6454 = vpow2.f32 %v5472_v54  ;;  %v8358_v50 = vld [vmem:[%s8871_s2 + $0x100] ss:$16 sps:$4 sm:$0xff]   ;;  %v8363_v52 = vld [vmem:[%s8871_s2 + $0x104] ss:$16 sps:$4 sm:$0xff]  }
 0x5af   :  { %v8370_v54 = vld [vmem:[%s8871_s2 + $0x120] ss:$16 sps:$4 sm:$0xff]  }
 0x5b7   :  { %v6453_v56 = vpop.eup %6452 }
 0x5b8   :  { %v6455_v58 = vpop.eup %6454  ;;  %v3054_v61 = vadd.f32 1.0, %v6453_v56  ;;  %v8375_v56 = vld [vmem:[%s8871_s2 + $0x124] ss:$16 sps:$4 sm:$0xff]  }
 0x5b9   :  { %v3060_v8 = vadd.f32 1.0, %v6455_v58  ;;  %v8382_v58 = vld [vmem:[%s8871_s2 + $0x140] ss:$16 sps:$4 sm:$0xff]  }
 0x5ba   :  { %6456 = vrcp.f32 %v3054_v61  ;;  %v8387_v61 = vld [vmem:[%s8871_s2 + $0x144] ss:$16 sps:$4 sm:$0xff]  }
 0x5bb   :  { %6458 = vrcp.f32 %v3060_v8  ;;  %v8394_v8 = vld [vmem:[%s8871_s2 + $0x160] ss:$16 sps:$4 sm:$0xff]  }
 0x5c4   :  { %v6457_v36 = vpop.eup %6456 }
 0x5c5   :  { %v6459_v2 = vpop.eup %6458  ;;  %5484 = vst [vmem:[%s8876_s6 + $0xb0] sm:$0xff] %v6457_v36 }
 0x5c6   :  { %5485 = vst [vmem:[%s8876_s6 + $0xb8] sm:$0xff] %v6459_v2 }
 0x5e6   :  { %v3044_v49 = vpop.f32.mrb[24].mxu1 }
 0x5e7   :  { %v3045_v59 = vadd.f32 %v3044_v49, %v2640_v23  ;;  %v3046_v63 = vpop.f32.mrb[25].mxu1  ;;  %v8411_v23 = vld [vmem:[%s8871_s2 + $0x184] ss:$16 sps:$4 sm:$0xff]  }
 0x5e8   :  { %v3047_v26 = vadd.f32 %v3046_v63, %v2644_v47  ;;  %v3048_v29 = vpop.f32.mrb[26].mxu1  ;;  %v8418_v47 = vld [vmem:[%s8871_s2 + $0x1a0] ss:$16 sps:$4 sm:$0xff]   ;;  %v8423_v49 = vld [vmem:[%s8871_s2 + $0x1a4] ss:$16 sps:$4 sm:$0xff]  }
 0x5e9   :  { %v3049_v32 = vpop.f32.mrb[27].mxu1  ;;  %v8435_v63 = vld [vmem:[%s8871_s2 + $0x1c4] ss:$16 sps:$4 sm:$0xff]  }
 0x5ea   :  { %v3063_v3 = vmul.f32 %v6457_v36, %v3047_v26  ;;  %v8399_v36 = vld [vmem:[%s8871_s2 + $0x164] ss:$16 sps:$4 sm:$0xff]   ;;  %v8442_v26 = vld [vmem:[%s8871_s2 + $0x1e0] ss:$16 sps:$4 sm:$0xff]  }
 0x5eb   :  { %v8447_v29 = vld [vmem:[%s8871_s2 + $0x1e4] ss:$16 sps:$4 sm:$0xff]   ;;  %v3259_v32 = vld [vmem:[%s8875_s3] sm:$0xf] }
 0x5ec   :  { %v3064_v5 = vadd.f32 %v3063_v3, %v3045_v59  ;;  %v8430_v59 = vld [vmem:[%s8871_s2 + $0x1c0] ss:$16 sps:$4 sm:$0xff]  }
 0x5ed   :  { %v8458_v3 = vld [vmem:[%s8877_s5] ss:$0 sm:$0xff] }
 0x5ee   :  { %6460 = vtanh.f32 %v3064_v5  ;;  %v3264_v5 = vrot.slane %v3259_v32, %v6939_v16 }
 0x5f8   :  { %v6461_v6 = vpop.eup %6460 }
 0x5f9   :  { %5486 = vst [vmem:[%s8876_s6 + $0xc0] sm:$0xff] %v6461_v6  ;;  %v3066_v12 = vsub.f32 %v7892_v46, %v6461_v6  ;;  %v8926_v46 = vld [vmem:[#allocation3_spill] sm:$0xff] }
 0x5fb   :  { %v3067_v13 = vmul.f32 %v6459_v2, %v3066_v12  ;;  %v8406_v2 = vld [vmem:[%s8871_s2 + $0x180] ss:$16 sps:$4 sm:$0xff]   ;;  %v3268_v12 = vrot.slane %v3259_v32, %v6944_v18 }
 0x5fd   :  { %v8181_v17 = vadd.f32 %v6461_v6, %v3067_v13 }
 0x5ff   :  { %v3069_v0 = vpack.c.bf16 %v8181_v17, %v8181_v17  ;;  %5483 = vst [vmem:[%s8876_s6 + $0xa8] sm:$0xff] %v8181_v17 }
 0x601   :  { %5899 = vmatmul.mubr.bf16.vlgmr.msra.gmra.mrb[28].mxu0 %v3069_v0  ;;  %3633 = vmatprep.mubr.bf16.mxu1 %v3069_v0 }
 0x602   :  { %3643 = vmatpush1.bf16.msra.mxu0 %v7897_v51  ;;  %3674 = vmatprep.mubr.bf16.mxu0 %v3069_v0  ;;  %v8927_v51 = vld [vmem:[#allocation4_spill] sm:$0xff] }
 0x603   :  { %3644 = vmatprep.subr.bf16.mxu0 %v7908_v28  ;;  %3634 = vmatmul.mubr.bf16.vlgmr.msra.gmra.mrb[28].mxu1 %v3193_v22  ;;  %v8928_v28 = vld [vmem:[#allocation5_spill] sm:$0xff] }
 0x604   :  { %5918 = vmatprep.mubr.msk.bf16.mxu1 %vm6512_vm0, %v8910_v53 }
 0x606   :  { %3645 = vmatpush1.bf16.msra.mxu0 %v7916_v11  ;;  %v8929_v11 = vld [vmem:[#allocation6_spill] sm:$0xff] }
 0x607   :  { %3646 = vmatprep.subr.bf16.mxu0 %v7922_v1  ;;  %v8930_v1 = vld [vmem:[#allocation7_spill] sm:$0xff] }
 0x60a   :  { %3647 = vmatpush1.bf16.msra.mxu0 %v7931_v4  ;;  %v8931_v4 = vld [vmem:[#allocation8_spill] sm:$0xff] }
 0x60b   :  { %3648 = vmatprep.subr.bf16.mxu0 %v7937_v9  ;;  %v8932_v9 = vld [vmem:[#allocation9_spill] sm:$0xff] }
 0x60e   :  { %3649 = vmatpush1.bf16.msra.mxu0 %v7943_v14  ;;  %v8933_v14 = vld [vmem:[#allocation10_spill] sm:$0xff] }
 0x60f   :  { %3650 = vmatprep.subr.bf16.mxu0 %v7949_v19  ;;  %v6292_v19 = vld [vmem:[%s8874_s4] sm:$0xff]  }
 0x610   :  { %5903 = vmatpush3.bf16.msra.mxu1 %v6292_v19 }
 0x611   :  { %5904 = vmatprep.subr.bf16.mxu1 %v8910_v53 }
 0x612   :  { %3651 = vmatpush1.bf16.msra.mxu0 %v7955_v33  ;;  %v8228_v33 = vld [vmem:[%s8871_s2] ss:$16 sps:$4 sm:$0xff]  }
 0x613   :  { %3652 = vmatprep.subr.bf16.mxu0 %v7961_v40  ;;  %v8233_v40 = vld [vmem:[%s8871_s2 + $0x4] ss:$16 sps:$4 sm:$0xff]  }
 0x616   :  { %3653 = vmatpush1.bf16.msra.mxu0 %v7967_v62  ;;  %v6296_v62 = vld [vmem:[%s8874_s4 + $0x8] sm:$0xff]  }
 0x617   :  { %3654 = vmatprep.subr.bf16.mxu0 %v7973_v7  ;;  %5905 = vmatpush3.bf16.msra.mxu1 %v6296_v62  ;;  %v8245_v7 = vld [vmem:[%s8871_s2 + $0x24] ss:$16 sps:$4 sm:$0xff]  }
 0x618   :  { %5906 = vmatprep.subr.bf16.mxu1 %v8910_v53 }
 0x61a   :  { %3655 = vmatpush1.bf16.msra.mxu0 %v7979_v10  ;;  %v8250_v10 = vld [vmem:[%s8871_s2 + $0x20] ss:$16 sps:$4 sm:$0xff]  }
 0x61b   :  { %3656 = vmatprep.subr.bf16.mxu0 %v7985_v24  ;;  %v6300_v24 = vld [vmem:[%s8874_s4 + $0x10] sm:$0xff]  }
 0x61c   :  { %5907 = vmatpush3.bf16.msra.mxu1 %v6300_v24 }
 0x61d   :  { %5908 = vmatprep.subr.bf16.mxu1 %v8910_v53 }
 0x61e   :  { %3657 = vmatpush1.bf16.msra.mxu0 %v7991_v27  ;;  %v8261_v27 = vld [vmem:[%s8871_s2 + $0x44] ss:$16 sps:$4 sm:$0xff]  }
 0x61f   :  { %3658 = vmatprep.subr.bf16.mxu0 %v7997_v25  ;;  %v8266_v25 = vld [vmem:[%s8871_s2 + $0x40] ss:$16 sps:$4 sm:$0xff]  }
 0x622   :  { %3659 = vmatpush1.bf16.msra.mxu0 %v8003_v30  ;;  %v6304_v30 = vld [vmem:[%s8874_s4 + $0x18] sm:$0xff]  }
 0x623   :  { %3660 = vmatprep.subr.bf16.mxu0 %v8009_v31  ;;  %5909 = vmatpush3.bf16.msra.mxu1 %v6304_v30  ;;  %v8277_v31 = vld [vmem:[%s8871_s2 + $0x64] ss:$16 sps:$4 sm:$0xff]  }
 0x624   :  { %5910 = vmatprep.subr.bf16.mxu1 %v8910_v53 }
 0x626   :  { %3661 = vmatpush1.bf16.msra.mxu0 %v8926_v46 }
 0x627   :  { %3662 = vmatprep.subr.bf16.mxu0 %v8927_v51 }
 0x62a   :  { %3663 = vmatpush1.bf16.msra.mxu0 %v8928_v28 }
 0x62b   :  { %3664 = vmatprep.subr.bf16.mxu0 %v8929_v11 }
 0x62e   :  { %3665 = vmatpush1.bf16.msra.mxu0 %v8930_v1 }
 0x62f   :  { %3666 = vmatprep.subr.bf16.mxu0 %v8931_v4 }
 0x632   :  { %3667 = vmatpush1.bf16.msra.mxu0 %v8932_v9 }
 0x633   :  { %3668 = vmatprep.subr.bf16.mxu0 %v8933_v14 }
 0x636   :  { %3669 = vmatpush1.bf16.msra.mxu0 %v8063_v55  ;;  %v8298_v55 = vld [vmem:[%s8871_s2 + $0x80] ss:$16 sps:$4 sm:$0xff]  }
 0x637   :  { %3670 = vmatprep.subr.bf16.mxu0 %v8069_v57  ;;  %v6312_v57 = vld [vmem:[%s8874_s4 + $0x28] sm:$0xff]  }
 0x63a   :  { %3671 = vmatpush1.bf16.msra.mxu0 %v8075_v20  ;;  %v8282_v20 = vld [vmem:[%s8871_s2 + $0x60] ss:$16 sps:$4 sm:$0xff]  }
 0x63b   :  { %3672 = vmatprep.subr.bf16.mxu0 %v8081_v21  ;;  %v6308_v21 = vld [vmem:[%s8874_s4 + $0x20] sm:$0xff]  }
 0x63c   :  { %5911 = vmatpush3.bf16.msra.mxu1 %v6308_v21 }
 0x63d   :  { %5912 = vmatprep.subr.bf16.mxu1 %v8910_v53 }
 0x63e   :  { %3673 = vmatpush1.bf16.msra.mxu0 %v8087_v60  ;;  %v8293_v60 = vld [vmem:[%s8871_s2 + $0x84] ss:$16 sps:$4 sm:$0xff]  }
 0x63f   :  { %4233 = vmatprep.subr.bf16.mxu0 %v8233_v40 }
 0x640   :  { %5913 = vmatpush3.bf16.msra.mxu1 %v6312_v57 }
 0x641   :  { %3675 = vmatmul.mubr.bf16.vlgmr.msra.gmra.mrb[32].mxu0 %v3193_v22  ;;  %5914 = vmatprep.subr.bf16.mxu1 %v8910_v53 }
 0x642   :  { %4234 = vmatpush1.bf16.msra.mxu0 %v8228_v33 }
 0x643   :  { %4235 = vmatprep.subr.bf16.mxu0 %v8245_v7 }
 0x644   :  { %5915 = vmatpush3.bf16.msra.mxu1 %v6316_v34  ;;  %v3272_v34 = vrot.slane %v3259_v32, %v6950_v39 }
 0x645   :  { %5916 = vmatprep.subr.bf16.mxu1 %v8910_v53 }
 0x646   :  { %4236 = vmatpush1.bf16.msra.mxu0 %v8250_v10 }
 0x647   :  { %4237 = vmatprep.subr.bf16.mxu0 %v8261_v27 }
 0x648   :  { %5917 = vmatpush3.bf16.msra.mxu1 %v6320_v41  ;;  %v3276_v41 = vrot.slane %v3259_v32, %v6948_v38  ;;  %v5568_v32 = vld [vmem:[%s8873_s0 + $0x30] sm:$0xff] }
 0x649   :  { %4274 = vmatprep.subr.bf16.mxu1 %v8344_v45 }
 0x64a   :  { %4238 = vmatpush1.bf16.msra.mxu0 %v8266_v25 }
 0x64b   :  { %4239 = vmatprep.subr.bf16.mxu0 %v8277_v31 }
 0x64e   :  { %4240 = vmatpush1.bf16.msra.mxu0 %v8282_v20 }
 0x64f   :  { %4241 = vmatprep.subr.bf16.mxu0 %v8293_v60 }
 0x652   :  { %4242 = vmatpush1.bf16.msra.mxu0 %v8298_v55 }
 0x653   :  { %4243 = vmatprep.subr.bf16.mxu0 %v8309_v35 }
 0x656   :  { %4244 = vmatpush1.bf16.msra.mxu0 %v8314_v37 }
 0x657   :  { %4245 = vmatprep.subr.bf16.mxu0 %v8329_v43 }
 0x65a   :  { %4246 = vmatpush1.bf16.msra.mxu0 %v8324_v42 }
 0x65b   :  { %4247 = vmatprep.subr.bf16.mxu0 %v8338_v44 }
 0x65e   :  { %4248 = vmatpush1.bf16.msra.mxu0 %v8350_v48 }
 0x65f   :  { %4249 = vmatprep.subr.bf16.mxu0 %v8363_v52 }
 0x662   :  { %4250 = vmatpush1.bf16.msra.mxu0 %v8358_v50 }
 0x663   :  { %4251 = vmatprep.subr.bf16.mxu0 %v8375_v56 }
 0x666   :  { %4252 = vmatpush1.bf16.msra.mxu0 %v8370_v54 }
 0x667   :  { %4253 = vmatprep.subr.bf16.mxu0 %v8387_v61 }
 0x66a   :  { %4254 = vmatpush1.bf16.msra.mxu0 %v8382_v58 }
 0x66b   :  { %4255 = vmatprep.subr.bf16.mxu0 %v8399_v36 }
 0x66e   :  { %4256 = vmatpush1.bf16.msra.mxu0 %v8394_v8 }
 0x66f   :  { %4257 = vmatprep.subr.bf16.mxu0 %v8411_v23 }
 0x672   :  { %4258 = vmatpush1.bf16.msra.mxu0 %v8406_v2 }
 0x673   :  { %4259 = vmatprep.subr.bf16.mxu0 %v8423_v49 }
 0x676   :  { %4260 = vmatpush1.bf16.msra.mxu0 %v8418_v47 }
 0x677   :  { %4261 = vmatprep.subr.bf16.mxu0 %v8435_v63 }
 0x67a   :  { %4262 = vmatpush1.bf16.msra.mxu0 %v8430_v59 }
 0x67b   :  { %4263 = vmatprep.subr.bf16.mxu0 %v8447_v29 }
 0x67e   :  { %4264 = vmatpush1.bf16.msra.mxu0 %v8442_v26 }
 0x67f   :  { %5922 = vmatprep.subr.bf16.mxu0 %v8910_v53 }
 0x6d4   :  { %v3175_v6 = vpop.f32.mrb[28].mxu0 }
 0x6d5   :  { %v3176_v13 = vadd.f32 %v8458_v3, %v3175_v6  ;;  %v5900_v15 = vpop.f32.mrb[29].mxu0 }
 0x6d6   :  { %v3178_v0 = vpop.f32.mrb[30].mxu0  ;;  %v3635_v22 = vpop.f32.mrb[28].mxu1 }
 0x6d7   :  { %5482 = vst [vmem:[%s8876_s6 + $0xa0] sm:$0xff] %v3176_v13  ;;  %v5901_v46 = vpop.f32.mrb[31].mxu0  ;;  %v3636_v51 = vadd.f32 %v3635_v22, %v3264_v5  ;;  %v3637_v28 = vpop.f32.mrb[29].mxu1 }
 0x6d8   :  { %v3638_v11 = vadd.f32 %v3637_v28, %v3268_v12  ;;  %v3639_v1 = vpop.f32.mrb[30].mxu1 }
 0x6d9   :  { %v5552_v4 = vmul.f32 -1.442695, %v3636_v51  ;;  %v3640_v9 = vpop.f32.mrb[31].mxu1 }
 0x6da   :  { %v5553_v14 = vmul.f32 -1.442695, %v3638_v11 }
 0x6db   :  { %6462 = vpow2.f32 %v5552_v4  ;;  %v8486_v4 = vld [vmem:[%s8871_s2 + $0x8] ss:$16 sps:$4 sm:$0xff]  }
 0x6dc   :  { %6464 = vpow2.f32 %v5553_v14  ;;  %v8499_v14 = vpack.c.bf16 %v5568_v32, %v5568_v32  ;;  %v8622_v32 = vld [vmem:[%s8871_s2 + $0x16c] ss:$16 sps:$4 sm:$0xff]  }
 0x6dd   :  { %8937 = vst [vmem:[#allocation6_spill] sm:$0xff] %v8622_v32 }
 0x6e5   :  { %v6463_v19 = vpop.eup %6462 }
 0x6e6   :  { %v6465_v62 = vpop.eup %6464  ;;  %v3686_v24 = vadd.f32 1.0, %v6463_v19  ;;  %v8505_v19 = vld [vmem:[%s8871_s2 + $0x28] ss:$16 sps:$4 sm:$0xff]  }
 0x6e7   :  { %v3692_v30 = vadd.f32 1.0, %v6465_v62  ;;  %v8511_v62 = vld [vmem:[%s8871_s2 + $0x4c] ss:$16 sps:$4 sm:$0xff]  }
 0x6e8   :  { %6466 = vrcp.f32 %v3686_v24  ;;  %v8520_v24 = vld [vmem:[%s8871_s2 + $0x48] ss:$16 sps:$4 sm:$0xff]  }
 0x6e9   :  { %6468 = vrcp.f32 %v3692_v30  ;;  %v8526_v30 = vld [vmem:[%s8871_s2 + $0x6c] ss:$16 sps:$4 sm:$0xff]  }
 0x6f2   :  { %v6467_v21 = vpop.eup %6466 }
 0x6f3   :  { %v6469_v57 = vpop.eup %6468  ;;  %5565 = vst [vmem:[%s8876_s6 + $0xd8] sm:$0xff] %v6467_v21 }
 0x6f4   :  { %5566 = vst [vmem:[%s8876_s6 + $0xe0] sm:$0xff] %v6469_v57 }
 0x714   :  { %v3676_v5 = vpop.f32.mrb[32].mxu0 }
 0x715   :  { %v3677_v6 = vadd.f32 %v3676_v5, %v3272_v34  ;;  %v3678_v12 = vpop.f32.mrb[33].mxu0  ;;  %v8544_v34 = vld [vmem:[%s8871_s2 + $0x88] ss:$16 sps:$4 sm:$0xff]  }
 0x716   :  { %v3679_v13 = vadd.f32 %v3678_v12, %v3276_v41  ;;  %v3680_v15 = vpop.f32.mrb[34].mxu0  ;;  %v8550_v41 = vld [vmem:[%s8871_s2 + $0xac] ss:$16 sps:$4 sm:$0xff]   ;;  %v8556_v5 = vld [vmem:[%s8871_s2 + $0xa8] ss:$16 sps:$4 sm:$0xff]  }
 0x717   :  { %v3681_v0 = vpop.f32.mrb[35].mxu0  ;;  %v8568_v12 = vld [vmem:[%s8871_s2 + $0xc8] ss:$16 sps:$4 sm:$0xff]  }
 0x718   :  { %v3695_v22 = vmul.f32 %v6467_v21, %v3679_v13  ;;  %v8532_v21 = vld [vmem:[%s8871_s2 + $0x68] ss:$16 sps:$4 sm:$0xff]   ;;  %v8574_v13 = vld [vmem:[%s8871_s2 + $0xec] ss:$16 sps:$4 sm:$0xff]  }
 0x719   :  { %v8580_v15 = vld [vmem:[%s8871_s2 + $0xe8] ss:$16 sps:$4 sm:$0xff]   ;;  %v8586_v0 = vld [vmem:[%s8871_s2 + $0x10c] ss:$16 sps:$4 sm:$0xff]  }
 0x71a   :  { %v3696_v46 = vadd.f32 %v3695_v22, %v3677_v6  ;;  %v8562_v6 = vld [vmem:[%s8871_s2 + $0xcc] ss:$16 sps:$4 sm:$0xff]   ;;  %v8592_v22 = vld [vmem:[%s8871_s2 + $0x108] ss:$16 sps:$4 sm:$0xff]  }
 0x71c   :  { %6470 = vtanh.f32 %v3696_v46  ;;  %v8598_v46 = vld [vmem:[%s8871_s2 + $0x12c] ss:$16 sps:$4 sm:$0xff]  }
 0x726   :  { %v6471_v51 = vpop.eup %6470 }
 0x727   :  { %5567 = vst [vmem:[%s8876_s6 + $0xe8] sm:$0xff] %v6471_v51  ;;  %v3698_v28 = vsub.f32 %v8181_v17, %v6471_v51  ;;  %v8497_v17 = vld [vmem:[%s8871_s2 + $0x2c] ss:$16 sps:$4 sm:$0xff]  }
 0x729   :  { %v3699_v11 = vmul.f32 %v6469_v57, %v3698_v28  ;;  %v8538_v57 = vld [vmem:[%s8871_s2 + $0x8c] ss:$16 sps:$4 sm:$0xff]  }
 0x72a   :  { %v8610_v28 = vld [vmem:[%s8871_s2 + $0x14c] ss:$16 sps:$4 sm:$0xff]  }
 0x72b   :  { %v8481_v1 = vadd.f32 %v6471_v51, %v3699_v11  ;;  %v8604_v51 = vld [vmem:[%s8871_s2 + $0x128] ss:$16 sps:$4 sm:$0xff]   ;;  %8935 = vst [vmem:[#allocation4_spill] sm:$0xff] %v8610_v28 }
 0x72c   :  { %8934 = vst [vmem:[#allocation3_spill] sm:$0xff] %v8604_v51  ;;  %v8616_v11 = vld [vmem:[%s8871_s2 + $0x148] ss:$16 sps:$4 sm:$0xff]  }
 0x72d   :  { %v3701_v9 = vpack.c.bf16 %v8481_v1, %v8481_v1  ;;  %5564 = vst [vmem:[%s8876_s6 + $0xd0] sm:$0xff] %v8481_v1  ;;  %8936 = vst [vmem:[#allocation5_spill] sm:$0xff] %v8616_v11 }
 0x72f   :  { %5919 = vmatmul.mubr.bf16.vlgmr.msra.gmra.mrb[32].mxu1 %v3701_v9  ;;  %4265 = vmatprep.mubr.bf16.mxu0 %v3701_v9 }
 0x730   :  { %4275 = vmatpush1.bf16.msra.mxu1 %v8486_v4  ;;  %4306 = vmatprep.mubr.bf16.mxu1 %v3701_v9  ;;  %v8628_v9 = vld [vmem:[%s8871_s2 + $0x168] ss:$16 sps:$4 sm:$0xff]  }
 0x731   :  { %4276 = vmatprep.subr.bf16.mxu1 %v8497_v17  ;;  %4266 = vmatmul.mubr.bf16.vlgmr.msra.gmra.mrb[36].mxu0 %v8499_v14  ;;  %8938 = vst [vmem:[#allocation7_spill] sm:$0xff] %v8628_v9 }
 0x732   :  { %5938 = vmatprep.mubr.msk.bf16.mxu0 %vm6512_vm0, %v8910_v53 }
 0x734   :  { %4277 = vmatpush1.bf16.msra.mxu1 %v8505_v19 }
 0x735   :  { %4278 = vmatprep.subr.bf16.mxu1 %v8511_v62 }
 0x738   :  { %4279 = vmatpush1.bf16.msra.mxu1 %v8520_v24 }
 0x739   :  { %4280 = vmatprep.subr.bf16.mxu1 %v8526_v30 }
 0x73c   :  { %4281 = vmatpush1.bf16.msra.mxu1 %v8532_v21 }
 0x73d   :  { %4282 = vmatprep.subr.bf16.mxu1 %v8538_v57 }
 0x740   :  { %4283 = vmatpush1.bf16.msra.mxu1 %v8544_v34 }
 0x741   :  { %4284 = vmatprep.subr.bf16.mxu1 %v8550_v41 }
 0x744   :  { %4285 = vmatpush1.bf16.msra.mxu1 %v8556_v5 }
 0x745   :  { %4286 = vmatprep.subr.bf16.mxu1 %v8562_v6 }
 0x748   :  { %4287 = vmatpush1.bf16.msra.mxu1 %v8568_v12 }
 0x749   :  { %4288 = vmatprep.subr.bf16.mxu1 %v8574_v13 }
 0x74c   :  { %4289 = vmatpush1.bf16.msra.mxu1 %v8580_v15 }
 0x74d   :  { %4290 = vmatprep.subr.bf16.mxu1 %v8586_v0 }
 0x750   :  { %4291 = vmatpush1.bf16.msra.mxu1 %v8592_v22 }
 0x751   :  { %4292 = vmatprep.subr.bf16.mxu1 %v8598_v46 }
 0x754   :  { %4293 = vmatpush1.bf16.msra.mxu1 %v8604_v51  ;;  %v8634_v51 = vld [vmem:[%s8871_s2 + $0x18c] ss:$16 sps:$4 sm:$0xff]  }
 0x755   :  { %4294 = vmatprep.subr.bf16.mxu1 %v8610_v28  ;;  %8939 = vst [vmem:[#allocation8_spill] sm:$0xff] %v8634_v51  ;;  %v8640_v28 = vld [vmem:[%s8871_s2 + $0x188] ss:$16 sps:$4 sm:$0xff]  }
 0x756   :  { %8940 = vst [vmem:[#allocation9_spill] sm:$0xff] %v8640_v28 }
 0x758   :  { %4295 = vmatpush1.bf16.msra.mxu1 %v8616_v11  ;;  %v8646_v11 = vld [vmem:[%s8871_s2 + $0x1ac] ss:$16 sps:$4 sm:$0xff]  }
 0x759   :  { %4296 = vmatprep.subr.bf16.mxu1 %v8622_v32  ;;  %8941 = vst [vmem:[#allocation10_spill] sm:$0xff] %v8646_v11  ;;  %v8652_v32 = vld [vmem:[%s8871_s2 + $0x1a8] ss:$16 sps:$4 sm:$0xff]  }
 0x75c   :  { %4297 = vmatpush1.bf16.msra.mxu1 %v8628_v9  ;;  %v8658_v9 = vld [vmem:[%s8871_s2 + $0x1cc] ss:$16 sps:$4 sm:$0xff]  }
 0x75d   :  { %4298 = vmatprep.subr.bf16.mxu1 %v8634_v51  ;;  %v8664_v51 = vld [vmem:[%s8871_s2 + $0x1c8] ss:$16 sps:$4 sm:$0xff]  }
 0x760   :  { %4299 = vmatpush1.bf16.msra.mxu1 %v8640_v28  ;;  %v8670_v28 = vld [vmem:[%s8871_s2 + $0x1ec] ss:$16 sps:$4 sm:$0xff]  }
 0x761   :  { %4300 = vmatprep.subr.bf16.mxu1 %v8646_v11  ;;  %v8676_v11 = vld [vmem:[%s8871_s2 + $0x1e8] ss:$16 sps:$4 sm:$0xff]  }
 0x764   :  { %4301 = vmatpush1.bf16.msra.mxu1 %v8652_v32 }
 0x765   :  { %4302 = vmatprep.subr.bf16.mxu1 %v8658_v9 }
 0x768   :  { %4303 = vmatpush1.bf16.msra.mxu1 %v8664_v51 }
 0x769   :  { %4304 = vmatprep.subr.bf16.mxu1 %v8670_v28 }
 0x76c   :  { %4305 = vmatpush1.bf16.msra.mxu1 %v8676_v11 }
 0x76d   :  { %4865 = vmatprep.subr.bf16.mxu1 %v8233_v40  ;;  %v6397_v40 = vld [vmem:[%s8874_s4 + $0x8] sm:$0xff]  }
 0x76f   :  { %4307 = vmatmul.mubr.bf16.vlgmr.msra.gmra.mrb[36].mxu1 %v8499_v14 }
 0x770   :  { %4866 = vmatpush1.bf16.msra.mxu1 %v8228_v33  ;;  %v6396_v33 = vld [vmem:[%s8874_s4] sm:$0xff]  }
 0x771   :  { %4867 = vmatprep.subr.bf16.mxu1 %v8245_v7  ;;  %5923 = vmatpush3.bf16.msra.mxu0 %v6396_v33  ;;  %v6398_v7 = vld [vmem:[%s8874_s4 + $0x10] sm:$0xff]  }
 0x772   :  { %5924 = vmatprep.subr.bf16.mxu0 %v8910_v53 }
 0x774   :  { %4868 = vmatpush1.bf16.msra.mxu1 %v8250_v10  ;;  %v6399_v10 = vld [vmem:[%s8874_s4 + $0x18] sm:$0xff]  }
 0x775   :  { %4869 = vmatprep.subr.bf16.mxu1 %v8261_v27  ;;  %5925 = vmatpush3.bf16.msra.mxu0 %v6397_v40  ;;  %v6400_v27 = vld [vmem:[%s8874_s4 + $0x20] sm:$0xff]  }
 0x776   :  { %5926 = vmatprep.subr.bf16.mxu0 %v8910_v53 }
 0x778   :  { %4870 = vmatpush1.bf16.msra.mxu1 %v8266_v25  ;;  %v6401_v25 = vld [vmem:[%s8874_s4 + $0x28] sm:$0xff]  }
 0x779   :  { %4871 = vmatprep.subr.bf16.mxu1 %v8277_v31  ;;  %5927 = vmatpush3.bf16.msra.mxu0 %v6398_v7  ;;  %v6402_v31 = vld [vmem:[%s8874_s4 + $0x30] sm:$0xff]  }
 0x77a   :  { %5928 = vmatprep.subr.bf16.mxu0 %v8910_v53 }
 0x77c   :  { %4872 = vmatpush1.bf16.msra.mxu1 %v8282_v20  ;;  %v6403_v20 = vld [vmem:[%s8874_s4 + $0x38] sm:$0xff]  }
 0x77d   :  { %4873 = vmatprep.subr.bf16.mxu1 %v8293_v60  ;;  %5929 = vmatpush3.bf16.msra.mxu0 %v6399_v10  ;;  %v3891_v60 = vld [vmem:[%s8875_s3] sm:$0xf] }
 0x77e   :  { %5930 = vmatprep.subr.bf16.mxu0 %v8910_v53 }
 0x780   :  { %4874 = vmatpush1.bf16.msra.mxu1 %v8298_v55  ;;  %v3896_v55 = vrot.slane %v3891_v60, %v6939_v16 }
 0x781   :  { %4875 = vmatprep.subr.bf16.mxu1 %v8309_v35  ;;  %5931 = vmatpush3.bf16.msra.mxu0 %v6400_v27 }
 0x782   :  { %5932 = vmatprep.subr.bf16.mxu0 %v8910_v53 }
 0x784   :  { %4876 = vmatpush1.bf16.msra.mxu1 %v8314_v37  ;;  %v3900_v37 = vrot.slane %v3891_v60, %v6944_v18 }
 0x785   :  { %4877 = vmatprep.subr.bf16.mxu1 %v8329_v43  ;;  %5933 = vmatpush3.bf16.msra.mxu0 %v6401_v25 }
 0x786   :  { %5934 = vmatprep.subr.bf16.mxu0 %v8910_v53 }
 0x788   :  { %4878 = vmatpush1.bf16.msra.mxu1 %v8324_v42 }
 0x789   :  { %4879 = vmatprep.subr.bf16.mxu1 %v8338_v44  ;;  %5935 = vmatpush3.bf16.msra.mxu0 %v6402_v31 }
 0x78a   :  { %5936 = vmatprep.subr.bf16.mxu0 %v8910_v53 }
 0x78c   :  { %4880 = vmatpush1.bf16.msra.mxu1 %v8350_v48 }
 0x78d   :  { %4881 = vmatprep.subr.bf16.mxu1 %v8363_v52  ;;  %5937 = vmatpush3.bf16.msra.mxu0 %v6403_v20 }
 0x78e   :  { %4906 = vmatprep.subr.bf16.mxu0 %v8344_v45 }
 0x790   :  { %4882 = vmatpush1.bf16.msra.mxu1 %v8358_v50 }
 0x791   :  { %4883 = vmatprep.subr.bf16.mxu1 %v8375_v56 }
 0x794   :  { %4884 = vmatpush1.bf16.msra.mxu1 %v8370_v54 }
 0x795   :  { %4885 = vmatprep.subr.bf16.mxu1 %v8387_v61 }
 0x798   :  { %4886 = vmatpush1.bf16.msra.mxu1 %v8382_v58 }
 0x799   :  { %4887 = vmatprep.subr.bf16.mxu1 %v8399_v36 }
 0x79c   :  { %4888 = vmatpush1.bf16.msra.mxu1 %v8394_v8 }
 0x79d   :  { %4889 = vmatprep.subr.bf16.mxu1 %v8411_v23 }
 0x7a0   :  { %4890 = vmatpush1.bf16.msra.mxu1 %v8406_v2 }
 0x7a1   :  { %4891 = vmatprep.subr.bf16.mxu1 %v8423_v49 }
 0x7a4   :  { %4892 = vmatpush1.bf16.msra.mxu1 %v8418_v47 }
 0x7a5   :  { %4893 = vmatprep.subr.bf16.mxu1 %v8435_v63  ;;  %v3904_v63 = vrot.slane %v3891_v60, %v6950_v39 }
 0x7a8   :  { %4894 = vmatpush1.bf16.msra.mxu1 %v8430_v59 }
 0x7a9   :  { %4895 = vmatprep.subr.bf16.mxu1 %v8447_v29 }
 0x7ac   :  { %4896 = vmatpush1.bf16.msra.mxu1 %v8442_v26  ;;  %v3908_v26 = vrot.slane %v3891_v60, %v6948_v38  ;;  %v5649_v60 = vld [vmem:[%s8873_s0 + $0x38] sm:$0xff] }
 0x7ad   :  { %5942 = vmatprep.subr.bf16.mxu1 %v8910_v53 }
 0x802   :  { %v3807_v35 = vpop.f32.mrb[32].mxu1 }
 0x803   :  { %v3808_v42 = vadd.f32 %v8458_v3, %v3807_v35  ;;  %v5920_v43 = vpop.f32.mrb[33].mxu1 }
 0x804   :  { %v3810_v44 = vpop.f32.mrb[34].mxu1  ;;  %v4267_v48 = vpop.f32.mrb[36].mxu0 }
 0x805   :  { %5563 = vst [vmem:[%s8876_s6 + $0xc8] sm:$0xff] %v3808_v42  ;;  %v5921_v50 = vpop.f32.mrb[35].mxu1  ;;  %v4268_v45 = vadd.f32 %v4267_v48, %v3896_v55  ;;  %v4269_v52 = vpop.f32.mrb[37].mxu0 }
 0x806   :  { %v4270_v54 = vadd.f32 %v4269_v52, %v3900_v37  ;;  %v4271_v56 = vpop.f32.mrb[38].mxu0  ;;  %v4457_v37 = vpack.c.bf16 %v5649_v60, %v5649_v60 }
 0x807   :  { %v5633_v58 = vmul.f32 -1.442695, %v4268_v45  ;;  %v4272_v61 = vpop.f32.mrb[39].mxu0 }
 0x808   :  { %v5634_v8 = vmul.f32 -1.442695, %v4270_v54 }
 0x809   :  { %6472 = vpow2.f32 %v5633_v58 }
 0x80a   :  { %6474 = vpow2.f32 %v5634_v8 }
 0x813   :  { %v6473_v36 = vpop.eup %6472 }
 0x814   :  { %v6475_v2 = vpop.eup %6474  ;;  %v4318_v23 = vadd.f32 1.0, %v6473_v36 }
 0x815   :  { %v4324_v47 = vadd.f32 1.0, %v6475_v2 }
 0x816   :  { %6476 = vrcp.f32 %v4318_v23 }
 0x817   :  { %6478 = vrcp.f32 %v4324_v47 }
 0x820   :  { %v6477_v49 = vpop.eup %6476 }
 0x821   :  { %v6479_v59 = vpop.eup %6478  ;;  %5646 = vst [vmem:[%s8876_s6 + $0x100] sm:$0xff] %v6477_v49 }
 0x822   :  { %5647 = vst [vmem:[%s8876_s6 + $0x108] sm:$0xff] %v6479_v59 }
 0x842   :  { %v4308_v29 = vpop.f32.mrb[36].mxu1 }
 0x843   :  { %v4309_v3 = vadd.f32 %v4308_v29, %v3904_v63  ;;  %v4310_v14 = vpop.f32.mrb[37].mxu1 }
 0x844   :  { %v4311_v33 = vadd.f32 %v4310_v14, %v3908_v26  ;;  %v4312_v40 = vpop.f32.mrb[38].mxu1 }
 0x845   :  { %v4313_v7 = vpop.f32.mrb[39].mxu1 }
 0x846   :  { %v4327_v10 = vmul.f32 %v6477_v49, %v4311_v33 }
 0x848   :  { %v4328_v27 = vadd.f32 %v4327_v10, %v4309_v3 }
 0x84a   :  { %6480 = vtanh.f32 %v4328_v27 }
 0x854   :  { %v6481_v25 = vpop.eup %6480 }
 0x855   :  { %5648 = vst [vmem:[%s8876_s6 + $0x110] sm:$0xff] %v6481_v25  ;;  %v4330_v31 = vsub.f32 %v8481_v1, %v6481_v25  ;;  %v8942_v1 = vld [vmem:[#allocation3_spill] sm:$0xff] }
 0x857   :  { %v4331_v20 = vmul.f32 %v6479_v59, %v4330_v31 }
 0x859   :  { %v8770_v55 = vadd.f32 %v6481_v25, %v4331_v20 }
 0x85b   :  { %v4333_v35 = vpack.c.bf16 %v8770_v55, %v8770_v55  ;;  %5645 = vst [vmem:[%s8876_s6 + $0xf8] sm:$0xff] %v8770_v55 }
 0x85d   :  { %5939 = vmatmul.mubr.bf16.vlgmr.msra.gmra.mrb[40].mxu0 %v4333_v35  ;;  %4897 = vmatprep.mubr.bf16.mxu1 %v4333_v35 }
 0x85e   :  { %4907 = vmatpush1.bf16.msra.mxu0 %v8486_v4  ;;  %4938 = vmatprep.mubr.bf16.mxu0 %v4333_v35  ;;  %v8943_v4 = vld [vmem:[#allocation4_spill] sm:$0xff] }
 0x85f   :  { %4908 = vmatprep.subr.bf16.mxu0 %v8497_v17  ;;  %4898 = vmatmul.mubr.bf16.vlgmr.msra.gmra.mrb[40].mxu1 %v4457_v37  ;;  %v8944_v17 = vld [vmem:[#allocation5_spill] sm:$0xff] }
 0x860   :  { %5958 = vmatprep.mubr.msk.bf16.mxu1 %vm6512_vm0, %v8910_v53 }
 0x862   :  { %4909 = vmatpush1.bf16.msra.mxu0 %v8505_v19  ;;  %v8945_v19 = vld [vmem:[#allocation6_spill] sm:$0xff] }
 0x863   :  { %4910 = vmatprep.subr.bf16.mxu0 %v8511_v62  ;;  %v8946_v62 = vld [vmem:[#allocation7_spill] sm:$0xff] }
 0x866   :  { %4911 = vmatpush1.bf16.msra.mxu0 %v8520_v24  ;;  %v8947_v24 = vld [vmem:[#allocation8_spill] sm:$0xff] }
 0x867   :  { %4912 = vmatprep.subr.bf16.mxu0 %v8526_v30  ;;  %v8948_v30 = vld [vmem:[#allocation9_spill] sm:$0xff] }
 0x86a   :  { %4913 = vmatpush1.bf16.msra.mxu0 %v8532_v21  ;;  %v8949_v21 = vld [vmem:[#allocation10_spill] sm:$0xff] }
 0x86b   :  { %4914 = vmatprep.subr.bf16.mxu0 %v8538_v57  ;;  %v6404_v57 = vld [vmem:[%s8874_s4] sm:$0xff]  }
 0x86c   :  { %5943 = vmatpush3.bf16.msra.mxu1 %v6404_v57 }
 0x86d   :  { %5944 = vmatprep.subr.bf16.mxu1 %v8910_v53 }
 0x86e   :  { %4915 = vmatpush1.bf16.msra.mxu0 %v8544_v34  ;;  %v6405_v34 = vld [vmem:[%s8874_s4 + $0x8] sm:$0xff]  }
 0x86f   :  { %4916 = vmatprep.subr.bf16.mxu0 %v8550_v41  ;;  %v6406_v41 = vld [vmem:[%s8874_s4 + $0x10] sm:$0xff]  }
 0x870   :  { %5945 = vmatpush3.bf16.msra.mxu1 %v6405_v34 }
 0x871   :  { %5946 = vmatprep.subr.bf16.mxu1 %v8910_v53 }
 0x872   :  { %4917 = vmatpush1.bf16.msra.mxu0 %v8556_v5  ;;  %v6407_v5 = vld [vmem:[%s8874_s4 + $0x18] sm:$0xff]  }
 0x873   :  { %4918 = vmatprep.subr.bf16.mxu0 %v8562_v6  ;;  %v6408_v6 = vld [vmem:[%s8874_s4 + $0x20] sm:$0xff]  }
 0x874   :  { %5947 = vmatpush3.bf16.msra.mxu1 %v6406_v41 }
 0x875   :  { %5948 = vmatprep.subr.bf16.mxu1 %v8910_v53 }
 0x876   :  { %4919 = vmatpush1.bf16.msra.mxu0 %v8568_v12  ;;  %v6409_v12 = vld [vmem:[%s8874_s4 + $0x28] sm:$0xff]  }
 0x877   :  { %4920 = vmatprep.subr.bf16.mxu0 %v8574_v13  ;;  %v6410_v13 = vld [vmem:[%s8874_s4 + $0x30] sm:$0xff]  }
 0x878   :  { %5949 = vmatpush3.bf16.msra.mxu1 %v6407_v5 }
 0x879   :  { %5950 = vmatprep.subr.bf16.mxu1 %v8910_v53 }
 0x87a   :  { %4921 = vmatpush1.bf16.msra.mxu0 %v8580_v15  ;;  %v6411_v15 = vld [vmem:[%s8874_s4 + $0x38] sm:$0xff]  }
 0x87b   :  { %4922 = vmatprep.subr.bf16.mxu0 %v8586_v0  ;;  %v4523_v0 = vld [vmem:[%s8875_s3] sm:$0xf] }
 0x87c   :  { %5951 = vmatpush3.bf16.msra.mxu1 %v6408_v6  ;;  %v4536_v36 = vrot.slane %v4523_v0, %v6950_v39  ;;  %v4540_v2 = vrot.slane %v4523_v0, %v6948_v38 }
 0x87d   :  { %5952 = vmatprep.subr.bf16.mxu1 %v8910_v53 }
 0x87e   :  { %4923 = vmatpush1.bf16.msra.mxu0 %v8592_v22  ;;  %v5635_v22 = vld [vmem:[%s8877_s5] ss:$0 sm:$0xff] }
 0x87f   :  { %4924 = vmatprep.subr.bf16.mxu0 %v8598_v46  ;;  %v4528_v46 = vrot.slane %v4523_v0, %v6939_v16 }
 0x880   :  { %5953 = vmatpush3.bf16.msra.mxu1 %v6409_v12 }
 0x881   :  { %5954 = vmatprep.subr.bf16.mxu1 %v8910_v53 }
 0x882   :  { %4925 = vmatpush1.bf16.msra.mxu0 %v8942_v1 }
 0x883   :  { %4926 = vmatprep.subr.bf16.mxu0 %v8943_v4 }
 0x884   :  { %5955 = vmatpush3.bf16.msra.mxu1 %v6410_v13 }
 0x885   :  { %5956 = vmatprep.subr.bf16.mxu1 %v8910_v53 }
 0x886   :  { %4927 = vmatpush1.bf16.msra.mxu0 %v8944_v17 }
 0x887   :  { %4928 = vmatprep.subr.bf16.mxu0 %v8945_v19 }
 0x888   :  { %5957 = vmatpush3.bf16.msra.mxu1 %v6411_v15 }
 0x88a   :  { %4929 = vmatpush1.bf16.msra.mxu0 %v8946_v62 }
 0x88b   :  { %4930 = vmatprep.subr.bf16.mxu0 %v8947_v24 }
 0x88e   :  { %4931 = vmatpush1.bf16.msra.mxu0 %v8948_v30 }
 0x88f   :  { %4932 = vmatprep.subr.bf16.mxu0 %v8949_v21 }
 0x892   :  { %4933 = vmatpush1.bf16.msra.mxu0 %v8652_v32 }
 0x893   :  { %4934 = vmatprep.subr.bf16.mxu0 %v8658_v9 }
 0x896   :  { %4935 = vmatpush1.bf16.msra.mxu0 %v8664_v51 }
 0x897   :  { %4936 = vmatprep.subr.bf16.mxu0 %v8670_v28  ;;  %v4532_v28 = vrot.slane %v4523_v0, %v6944_v18 }
 0x89a   :  { %4937 = vmatpush1.bf16.msra.mxu0 %v8676_v11 }
 0x89d   :  { %4939 = vmatmul.mubr.bf16.vlgmr.msra.gmra.mrb[44].mxu0 %v4457_v37 }
 0x930   :  { %v4439_v51 = vpop.f32.mrb[40].mxu0 }
 0x931   :  { %v4440_v11 = vadd.f32 %v5635_v22, %v4439_v51  ;;  %v5940_v32 = vpop.f32.mrb[41].mxu0 }
 0x932   :  { %v4442_v9 = vpop.f32.mrb[42].mxu0  ;;  %v4899_v42 = vpop.f32.mrb[40].mxu1 }
 0x933   :  { %5644 = vst [vmem:[%s8876_s6 + $0xf0] sm:$0xff] %v4440_v11  ;;  %v5941_v53 = vpop.f32.mrb[43].mxu0  ;;  %v4900_v43 = vadd.f32 %v4899_v42, %v4528_v46  ;;  %v4901_v44 = vpop.f32.mrb[41].mxu1 }
 0x934   :  { %v4902_v48 = vadd.f32 %v4901_v44, %v4532_v28  ;;  %v4903_v50 = vpop.f32.mrb[42].mxu1 }
 0x935   :  { %v5714_v45 = vmul.f32 -1.442695, %v4900_v43  ;;  %v4904_v52 = vpop.f32.mrb[43].mxu1 }
 0x936   :  { %v5715_v54 = vmul.f32 -1.442695, %v4902_v48 }
 0x937   :  { %6482 = vpow2.f32 %v5714_v45 }
 0x938   :  { %6484 = vpow2.f32 %v5715_v54 }
 0x941   :  { %v6483_v16 = vpop.eup %6482 }
 0x942   :  { %v6485_v18 = vpop.eup %6484  ;;  %v4950_v56 = vadd.f32 1.0, %v6483_v16 }
 0x943   :  { %v4956_v58 = vadd.f32 1.0, %v6485_v18 }
 0x944   :  { %6486 = vrcp.f32 %v4950_v56 }
 0x945   :  { %6488 = vrcp.f32 %v4956_v58 }
 0x94e   :  { %v6487_v61 = vpop.eup %6486 }
 0x94f   :  { %v6489_v8 = vpop.eup %6488  ;;  %5727 = vst [vmem:[%s8876_s6 + $0x128] sm:$0xff] %v6487_v61 }
 0x950   :  { %5728 = vst [vmem:[%s8876_s6 + $0x130] sm:$0xff] %v6489_v8 }
 0x970   :  { %v4940_v23 = vpop.f32.mrb[44].mxu0 }
 0x971   :  { %v4941_v47 = vadd.f32 %v4940_v23, %v4536_v36  ;;  %v4942_v49 = vpop.f32.mrb[45].mxu0 }
 0x972   :  { %v4943_v59 = vadd.f32 %v4942_v49, %v4540_v2  ;;  %v4944_v63 = vpop.f32.mrb[46].mxu0 }
 0x973   :  { %v4945_v26 = vpop.f32.mrb[47].mxu0 }
 0x974   :  { %v4959_v29 = vmul.f32 %v6487_v61, %v4943_v59 }
 0x976   :  { %v4960_v3 = vadd.f32 %v4959_v29, %v4941_v47 }
 0x978   :  { %6490 = vtanh.f32 %v4960_v3 }
 0x982   :  { %v6491_v14 = vpop.eup %6490 }
 0x983   :  { %5729 = vst [vmem:[%s8876_s6 + $0x138] sm:$0xff] %v6491_v14  ;;  %v4962_v33 = vsub.f32 %v8770_v55, %v6491_v14 }
 0x985   :  { %v4963_v40 = vmul.f32 %v6489_v8, %v4962_v33 }
 0x987   :  { %v4964_v39 = vadd.f32 %v6491_v14, %v4963_v40 }
 0x989   :  { %v4965_v7 = vpack.c.bf16 %v4964_v39, %v4964_v39  ;;  %5726 = vst [vmem:[%s8876_s6 + $0x120] sm:$0xff] %v4964_v39 }
 0x98b   :  { %5959 = vmatmul.mubr.bf16.vlgmr.msra.gmra.mrb[44].mxu1 %v4965_v7 }
 0xa5e   :  { %v5071_v38 = vpop.f32.mrb[44].mxu1 }
 0xa5f   :  { %v5072_v10 = vadd.f32 %v5635_v22, %v5071_v38  ;;  %v5960_v27 = vpop.f32.mrb[45].mxu1 }
 0xa60   :  { %v5074_v25 = vpop.f32.mrb[46].mxu1 }
 0xa61   :  { %5725 = vst [vmem:[%s8876_s6 + $0x118] sm:$0xff] %v5072_v10  ;;  %v5961_v31 = vpop.f32.mrb[47].mxu1 }

</bundles_post_ra>
